<compile_context>
chip_gen: v7x
topology: tpu7x:2x2x1
jax: 0.10.0
libtpu: 0.0.40
codegen_flags: <defaults>
</compile_context>

<pallas_src>
import jax
import jax.numpy as jnp
from jax.experimental import pallas as pl
from jax.experimental.pallas import tpu as pltpu

_EPS = 1e-8  # F.cosine_similarity default eps (per-norm clamp; see note below)


def _encoder_kernel(ids_ref,      # (B, L) int32 token ids, SMEM (scalar prefetch)
                    lookup_ref,   # (V, E) f32 embedding table, HBM (pl.ANY)
                    a_ref,        # (A_pad, E) bf16 pre-normalized aspects, VMEM
                    z_ref,        # out (TB, E) f32
                    attn_ref,     # out (TB, L) f32
                    x_vmem,       # scratch (TB, L, E) f32 gathered embeddings
                    gather_sem):  # DMA completion semaphore
    tb, L, E = x_vmem.shape
    b0 = pl.program_id(0) * tb

    # ---- fused embedding gather: one HBM row DMA per token -----------------
    @pl.loop(0, tb)
    def _(bi):
        @pl.loop(0, L)
        def _(li):
            tok = ids_ref[b0 + bi, li]
            pltpu.make_async_copy(lookup_ref.at[pl.ds(tok, 1)],
                                  x_vmem.at[bi, pl.ds(li, 1)],
                                  gather_sem).start()

    @pl.loop(0, tb)
    def _(bi):
        @pl.loop(0, L)
        def _(li):
            # every copy has the same size, so waiting with row 0 as the
            # descriptor source is equivalent (only the size matters).
            pltpu.make_async_copy(lookup_ref.at[pl.ds(0, 1)],
                                  x_vmem.at[bi, pl.ds(li, 1)],
                                  gather_sem).wait()

    x = x_vmem[...]                                   # (tb, L, E) f32
    xb = x.astype(jnp.bfloat16)
    a_hat = a_ref[...]                                # (A_pad, E) bf16

    # cosine numerators: lane-dense batched matmul (L on lanes), f32 accumulate
    a_b = jnp.broadcast_to(a_hat[None], (tb,) + a_hat.shape)     # (tb, A_pad, E)
    dots = jnp.einsum("bae,ble->bal", a_b, xb,
                      preferred_element_type=jnp.float32)        # (tb, A_pad, L)

    # max over aspects (padded rows duplicate a real aspect -> never win)
    sim = jnp.max(dots, axis=1)                                  # (tb, L)

    # per-token inverse norm applied AFTER the max (positive scale commutes).
    # NOTE: clamps ||x|| and ||a|| separately (== old torch behavior); only
    # differs from clamping the product for degenerate near-zero rows.
    ss = jnp.sum(x * x, axis=-1)                                 # (tb, L)
    inv_xn = jnp.minimum(jax.lax.rsqrt(ss), 1.0 / _EPS)          # == 1/max(||x||, eps)
    sim = sim * inv_xn

    # softmax over the sequence (lane) axis, f32
    m = jnp.max(sim, axis=-1, keepdims=True)
    e = jnp.exp(sim - m)
    denom = jnp.sum(e, axis=-1, keepdims=True)
    attn = e * pl.reciprocal(denom, approx=True)                 # (tb, L)

    # attention-weighted sum of word embeddings: VPU broadcast-mul + reduce
    z = jnp.sum(attn[:, :, None] * x, axis=1)                    # (tb, E)

    z_ref[...] = z.astype(z_ref.dtype)
    attn_ref[...] = attn.astype(attn_ref.dtype)


def _vmem_budget_bytes():
    """Chip-aware VMEM budget (v7x has 64 MiB/TC, v5e/v6e have 128 MiB)."""
    try:
        cap = pltpu.get_tpu_info().vmem_capacity_bytes
    except Exception:
        cap = 64 << 20
    return int(cap * 0.75)


def _pick_block_b(B, L, E, budget):
    """Largest batch tile (multiple of 8, dividing B) whose working set fits."""
    if B <= 8:
        return B
    # ~3 f32 copies of the (TB, L, E) tile live at once; keep 2x headroom.
    tb = max(8, budget // (3 * L * E * 4 * 2))
    tb = min(B, (tb // 8) * 8)
    while tb > 8 and B % tb != 0:
        tb -= 8
    return tb if B % tb == 0 else B


def aspect_memory_encode(inputs, lookup, a_emb, *, block_b=None):
    """inputs: (B, L) int token ids; lookup: (V, E) f32; a_emb: (A, E) f32."""
    B, L = inputs.shape
    _, E = lookup.shape
    A = a_emb.shape[0]

    # plain-JAX prep (tiny, A x E): pre-normalize aspects, pad to a sublane group
    a_norm = jnp.maximum(
        jnp.sqrt(jnp.sum(a_emb * a_emb, axis=-1, keepdims=True)), _EPS)
    a_hat = a_emb / a_norm
    a_pad = max(8, -(-A // 8) * 8)
    if a_pad > A:
        # pad with copies of a real normalized aspect so padding never wins the max
        a_hat = jnp.concatenate(
            [a_hat, jnp.broadcast_to(a_hat[:1], (a_pad - A, E))], axis=0)
    a_hat = a_hat.astype(jnp.bfloat16)

    budget = _vmem_budget_bytes()
    tb = block_b if block_b is not None else _pick_block_b(B, L, E, budget)
    assert B % tb == 0, "batch tile must divide the batch"

    grid_spec = pltpu.PrefetchScalarGridSpec(
        num_scalar_prefetch=1,                                   # token ids -> SMEM
        grid=(B // tb,),
        in_specs=[
            pl.BlockSpec(memory_space=pl.ANY),                   # table stays in HBM
            pl.BlockSpec((a_pad, E), lambda b, ids: (0, 0)),     # aspects, broadcast
        ],
        out_specs=(
            pl.BlockSpec((tb, E), lambda b, ids: (b, 0)),        # z block
            pl.BlockSpec((tb, L), lambda b, ids: (b, 0)),        # attention block
        ),
        scratch_shapes=[
            pltpu.VMEM((tb, L, E), jnp.float32),                 # gathered embeddings
            pltpu.SemaphoreType.DMA(()),                         # gather completion
        ],
    )

    return pl.pallas_call(
        _encoder_kernel,
        out_shape=(
            jax.ShapeDtypeStruct((B, E), jnp.float32),           # z (encoded output)
            jax.ShapeDtypeStruct((B, L), jnp.float32),           # attention weights
        ),
        grid_spec=grid_spec,
        compiler_params=pltpu.CompilerParams(
            dimension_semantics=("parallel",),                   # independent batch blocks
            vmem_limit_bytes=budget,
        ),
    )(inputs.astype(jnp.int32), lookup, a_hat)


class AspectMemoryEncoderJAX:
    """Parameter container mirroring the PyTorch module's __init__ shapes."""

    def __init__(self, vocab_size, emb_size, num_aspects, extend_aspect, key,
                 block_b=None):
        k1, k2, k3 = jax.random.split(key, 3)
        bound_w = jnp.sqrt(6.0 / (vocab_size + emb_size))
        self.lookup = jax.random.uniform(
            k1, (vocab_size, emb_size), jnp.float32, -bound_w, bound_w)
        bound_a = jnp.sqrt(6.0 / (num_aspects + emb_size))
        self.a_emb1 = jax.random.uniform(
            k2, (num_aspects, emb_size), jnp.float32, -bound_a, bound_a)
        self.extend_aspect = extend_aspect
        if extend_aspect:
            bound_e = jnp.sqrt(6.0 / (extend_aspect + emb_size))
            self.a_emb2 = jax.random.uniform(
                k3, (extend_aspect, emb_size), jnp.float32, -bound_e, bound_e)
        self.block_b = block_b

    def __call__(self, inputs):
        if self.extend_aspect:
            a_emb = jnp.concatenate([self.a_emb1, self.a_emb2], axis=0)
        else:
            a_emb = self.a_emb1
        return aspect_memory_encode(inputs, self.lookup, a_emb,
                                    block_b=self.block_b)


def _reference(x_wrd, a_emb):
    """Pure-JAX reference mirroring the PyTorch math (for verification)."""
    x_norm = jnp.maximum(jnp.linalg.norm(x_wrd, axis=-1, keepdims=True), _EPS)
    a_norm = jnp.maximum(jnp.linalg.norm(a_emb, axis=-1, keepdims=True), _EPS)
    dots = jnp.einsum("ble,ae->abl", x_wrd, a_emb)
    sim = dots / (a_norm[:, :, None] * x_norm[None, :, :, 0])
    sim = jnp.max(sim, axis=0)                       # (B, L)
    attn = jax.nn.softmax(sim, axis=1)
    z = jnp.einsum("bl,ble->be", attn, x_wrd)
    return z, attn


if __name__ == "__main__":
    key = jax.random.PRNGKey(0)
    vocab_size, emb_size = 100, 128      # lane-dense E (multiple of 128)
    num_aspects, extend_aspect = 4, 2    # 6 aspects total -> padded to 8 internally
    B, L = 16, 128                       # lane-dense L; block_b=8 -> 2 grid steps

    model = AspectMemoryEncoderJAX(vocab_size, emb_size, num_aspects,
                                   extend_aspect, key, block_b=8)
    inputs = jax.random.randint(jax.random.PRNGKey(1), (B, L), 0, vocab_size)

    z, attn = model(inputs)
    z = jax.block_until_ready(z)
    attn = jax.block_until_ready(attn)

    # silent correctness check against the pure-JAX reference
    a_full = jnp.concatenate([model.a_emb1, model.a_emb2], axis=0)
    z_ref, attn_ref = _reference(model.lookup[inputs], a_full)
    assert z.shape == (B, emb_size) and attn.shape == (B, L)
    # bf16 similarity matmul + approx reciprocal => slightly relaxed tolerances
    assert jnp.allclose(attn, attn_ref, atol=5e-3, rtol=5e-2)
    assert jnp.allclose(z, z_ref, atol=5e-3, rtol=5e-2)

    print("KERNEL_OK")
</pallas_src>

<mosaic_0001>
module attributes {stable_mosaic.version = 11 : i64} {
  func.func @_encoder_kernel(%arg0: i32, %arg1: memref<16x128xi32, #tpu.memory_space<smem>>, %arg2: memref<100x128xf32, #tpu.memory_space<any>>, %arg3: memref<8x128xbf16, #tpu.memory_space<vmem>>, %arg4: memref<8x128xf32, #tpu.memory_space<vmem>>, %arg5: memref<8x128xf32, #tpu.memory_space<vmem>>, %arg6: memref<8x128x128xf32, #tpu.memory_space<vmem>>, %arg7: memref<!tpu.dma_semaphore, #tpu.memory_space<semaphore_mem>>) attributes {dimension_semantics = [#tpu.dimension_semantics<parallel>], iteration_bounds = array<i64: 2>, scalar_prefetch = 1 : i64, scratch_operands = 2 : i64, tpu.core_type = #tpu.core_type<tc>, window_params = [{}, {pipeline_mode = #tpu.pipeline_mode<synchronous>, transform_indices = @transform_1, window_bounds = array<i64: 8, 128>}, {transform_indices = @transform_2, window_bounds = array<i64: 8, 128>}, {transform_indices = @transform_3, window_bounds = array<i64: 8, 128>}]} {
    %c8_i32 = arith.constant 8 : i32
    %0 = arith.muli %arg0, %c8_i32 : i32
    %c0_i32 = arith.constant 0 : i32
    %c8_i32_0 = arith.constant 8 : i32
    %1 = arith.addi %c0_i32, %c8_i32_0 : i32
    %c1_i32 = arith.constant 1 : i32
    scf.for %arg8 = %c0_i32 to %1 step %c1_i32  : i32 {
      %c1_i32_20 = arith.constant 1 : i32
      %33 = arith.muli %arg8, %c1_i32_20 : i32
      %c0_i32_21 = arith.constant 0 : i32
      %34 = arith.addi %c0_i32_21, %33 : i32
      %c0_i32_22 = arith.constant 0 : i32
      %c128_i32 = arith.constant 128 : i32
      %35 = arith.addi %c0_i32_22, %c128_i32 : i32
      %c1_i32_23 = arith.constant 1 : i32
      scf.for %arg9 = %c0_i32_22 to %35 step %c1_i32_23  : i32 {
        %c1_i32_25 = arith.constant 1 : i32
        %36 = arith.muli %arg9, %c1_i32_25 : i32
        %c0_i32_26 = arith.constant 0 : i32
        %37 = arith.addi %c0_i32_26, %36 : i32
        %38 = arith.addi %0, %34 : i32
        %39 = arith.index_cast %38 : i32 to index
        %40 = arith.index_cast %37 : i32 to index
        %41 = memref.load %arg1[%39, %40] : memref<16x128xi32, #tpu.memory_space<smem>>
        %c0_i32_27 = arith.constant 0 : i32
        %42 = tpu.memref_slice %arg2[%41, %c0_i32_27] : memref<100x128xf32, #tpu.memory_space<any>> -> memref<1x128xf32, #tpu.memory_space<any>>
        %c0_i32_28 = arith.constant 0 : i32
        %43 = tpu.memref_slice %arg6[%34, %37, %c0_i32_28] : memref<8x128x128xf32, #tpu.memory_space<vmem>> -> memref<1x1x128xf32, #tpu.memory_space<vmem>>
        %44 = tpu.memref_squeeze %43 : memref<1x1x128xf32, #tpu.memory_space<vmem>> -> memref<1x128xf32, #tpu.memory_space<vmem>>
        tpu.enqueue_dma source(%42 : memref<1x128xf32, #tpu.memory_space<any>>) target(%44 : memref<1x128xf32, #tpu.memory_space<vmem>>) target_semaphore(%arg7 : memref<!tpu.dma_semaphore, #tpu.memory_space<semaphore_mem>>)
      }
      %c128_i32_24 = arith.constant 128 : i32
    }
    %c8_i32_1 = arith.constant 8 : i32
    %c0_i32_2 = arith.constant 0 : i32
    %c8_i32_3 = arith.constant 8 : i32
    %2 = arith.addi %c0_i32_2, %c8_i32_3 : i32
    %c1_i32_4 = arith.constant 1 : i32
    scf.for %arg8 = %c0_i32_2 to %2 step %c1_i32_4  : i32 {
      %c1_i32_20 = arith.constant 1 : i32
      %33 = arith.muli %arg8, %c1_i32_20 : i32
      %c0_i32_21 = arith.constant 0 : i32
      %34 = arith.addi %c0_i32_21, %33 : i32
      %c0_i32_22 = arith.constant 0 : i32
      %c128_i32 = arith.constant 128 : i32
      %35 = arith.addi %c0_i32_22, %c128_i32 : i32
      %c1_i32_23 = arith.constant 1 : i32
      scf.for %arg9 = %c0_i32_22 to %35 step %c1_i32_23  : i32 {
        %c1_i32_25 = arith.constant 1 : i32
        %36 = arith.muli %arg9, %c1_i32_25 : i32
        %c0_i32_26 = arith.constant 0 : i32
        %37 = arith.addi %c0_i32_26, %36 : i32
        %c0_i32_27 = arith.constant 0 : i32
        %c0_i32_28 = arith.constant 0 : i32
        %38 = tpu.memref_slice %arg2[%c0_i32_27, %c0_i32_28] : memref<100x128xf32, #tpu.memory_space<any>> -> memref<1x128xf32, #tpu.memory_space<any>>
        %c0_i32_29 = arith.constant 0 : i32
        %39 = tpu.memref_slice %arg6[%34, %37, %c0_i32_29] : memref<8x128x128xf32, #tpu.memory_space<vmem>> -> memref<1x1x128xf32, #tpu.memory_space<vmem>>
        %40 = tpu.memref_squeeze %39 : memref<1x1x128xf32, #tpu.memory_space<vmem>> -> memref<1x128xf32, #tpu.memory_space<vmem>>
        tpu.wait_dma2 semaphore(%arg7 : memref<!tpu.dma_semaphore, #tpu.memory_space<semaphore_mem>>) src(%38 : memref<1x128xf32, #tpu.memory_space<any>>) dst(%40 : memref<1x128xf32, #tpu.memory_space<vmem>>)
      }
      %c128_i32_24 = arith.constant 128 : i32
    }
    %c8_i32_5 = arith.constant 8 : i32
    %c0 = arith.constant 0 : index
    %c0_6 = arith.constant 0 : index
    %c0_7 = arith.constant 0 : index
    %3 = vector.load %arg6[%c0, %c0_6, %c0_7] : memref<8x128x128xf32, #tpu.memory_space<vmem>>, vector<8x128x128xf32>
    %4 = arith.truncf %3 : vector<8x128x128xf32> to vector<8x128x128xbf16>
    %c0_8 = arith.constant 0 : index
    %c0_9 = arith.constant 0 : index
    %5 = vector.load %arg3[%c0_8, %c0_9] : memref<8x128xbf16, #tpu.memory_space<vmem>>, vector<8x128xbf16>
    %6 = vector.shape_cast %5 : vector<8x128xbf16> to vector<1x8x128xbf16>
    %7 = vector.shape_cast %6 : vector<1x8x128xbf16> to vector<1x8x128xbf16>
    %8 = vector.broadcast %7 : vector<1x8x128xbf16> to vector<8x8x128xbf16>
    "tpu.trace_start"() <{level = 10 : i32, message = "bae,ble->bal"}> : () -> ()
    %cst = arith.constant dense<0.000000e+00> : vector<8x8x128xf32>
    %9 = tpu.matmul %8, %4, %cst {dimension_numbers = #tpu.dot_dimension_numbers<[2], [2], [1], [1], [0, 0, 0, 1, 1, 1], [0], [0]>} : vector<8x8x128xbf16>, vector<8x128x128xbf16>, vector<8x8x128xf32> -> vector<8x8x128xf32>
    "tpu.trace_stop"() : () -> ()
    %cst_10 = arith.constant dense<0xFF800000> : vector<8x128xf32>
    %10 = vector.multi_reduction <maximumf>, %9, %cst_10 [1] : vector<8x8x128xf32> to vector<8x128xf32>
    %11 = arith.mulf %3, %3 : vector<8x128x128xf32>
    %cst_11 = arith.constant dense<0.000000e+00> : vector<8x128xf32>
    %12 = vector.multi_reduction <add>, %11, %cst_11 [2] : vector<8x128x128xf32> to vector<8x128xf32>
    %13 = math.rsqrt %12 : vector<8x128xf32>
    %cst_12 = arith.constant 1.000000e+08 : f32
    %14 = vector.broadcast %cst_12 : f32 to vector<8x128xf32>
    %15 = arith.minimumf %13, %14 : vector<8x128xf32>
    %16 = arith.mulf %10, %15 : vector<8x128xf32>
    %cst_13 = arith.constant dense<0xFF800000> : vector<8xf32>
    %17 = vector.multi_reduction <maximumf>, %16, %cst_13 [1] : vector<8x128xf32> to vector<8xf32>
    %18 = vector.shape_cast %17 : vector<8xf32> to vector<8x1xf32>
    %19 = vector.broadcast %18 : vector<8x1xf32> to vector<8x128xf32>
    %20 = arith.subf %16, %19 : vector<8x128xf32>
    %21 = math.exp %20 : vector<8x128xf32>
    %cst_14 = arith.constant dense<0.000000e+00> : vector<8xf32>
    %22 = vector.multi_reduction <add>, %21, %cst_14 [1] : vector<8x128xf32> to vector<8xf32>
    %23 = vector.shape_cast %22 : vector<8xf32> to vector<8x1xf32>
    %24 = tpu.reciprocal %23 {approx = true} : vector<8x1xf32> -> vector<8x1xf32>
    %25 = vector.broadcast %24 : vector<8x1xf32> to vector<8x128xf32>
    %26 = arith.mulf %21, %25 : vector<8x128xf32>
    %27 = vector.shape_cast %26 : vector<8x128xf32> to vector<8x128x1xf32>
    %28 = vector.broadcast %27 : vector<8x128x1xf32> to vector<8x128x128xf32>
    %29 = arith.mulf %28, %3 : vector<8x128x128xf32>
    %cst_15 = arith.constant dense<0.000000e+00> : vector<8x128xf32>
    %30 = vector.multi_reduction <add>, %29, %cst_15 [1] : vector<8x128x128xf32> to vector<8x128xf32>
    %c0_16 = arith.constant 0 : index
    %c0_17 = arith.constant 0 : index
    %31 = vector.load %arg4[%c0_16, %c0_17] : memref<8x128xf32, #tpu.memory_space<vmem>>, vector<8x128xf32>
    tpu.vector_store %arg4[%c0_16, %c0_17], %30 {strides = array<i32>} : memref<8x128xf32, #tpu.memory_space<vmem>>, vector<8x128xf32>,
    %c0_18 = arith.constant 0 : index
    %c0_19 = arith.constant 0 : index
    %32 = vector.load %arg5[%c0_18, %c0_19] : memref<8x128xf32, #tpu.memory_space<vmem>>, vector<8x128xf32>
    tpu.vector_store %arg5[%c0_18, %c0_19], %26 {strides = array<i32>} : memref<8x128xf32, #tpu.memory_space<vmem>>, vector<8x128xf32>,
    return
  }
  func.func @transform_1(%arg0: i32, %arg1: memref<16x128xi32, #tpu.memory_space<smem>>) -> (i32, i32) {
    %c0_i32 = arith.constant 0 : i32
    %c0_i32_0 = arith.constant 0 : i32
    %c0_i32_1 = arith.constant 0 : i32
    return %c0_i32, %c0_i32_0 : i32, i32
  }
  func.func @transform_2(%arg0: i32, %arg1: memref<16x128xi32, #tpu.memory_space<smem>>) -> (i32, i32) {
    %c0_i32 = arith.constant 0 : i32
    %c0_i32_0 = arith.constant 0 : i32
    return %arg0, %c0_i32 : i32, i32
  }
  func.func @transform_3(%arg0: i32, %arg1: memref<16x128xi32, #tpu.memory_space<smem>>) -> (i32, i32) {
    %c0_i32 = arith.constant 0 : i32
    %c0_i32_0 = arith.constant 0 : i32
    return %arg0, %c0_i32 : i32, i32
  }
}

</mosaic_0001>

<bundles_post_ra>
// kernel: tpu_custom_call.1
= control target key start
LH: loop header
LB: loop body
LE: loop exit
PB: predicated region body
PF: predicated region fallthrough
CT: control target
= control target key end

     0   :  { %s5732_s0 = inlined_call_operand.hbm [shape: s32[16,128], index: 0, kind: input, shape index: {}]   ;;  %s5733_s1 = inlined_call_operand.hbm [shape: f32[100,128], index: 1, kind: input, shape index: {}]   ;;  %s5734_s2 = inlined_call_operand.vmem [shape: bf16[8,128], index: 2, kind: input, shape index: {}]   ;;  %s5735_s3 = inlined_call_operand.hbm [shape: f32[16,128], index: 3, kind: output, shape index: {0}]   ;;  %s5736_s4 = inlined_call_operand.hbm [shape: f32[16,128], index: 4, kind: output, shape index: {1}]  }
   0x1   :  { %s4069_s17 = scalar_lea.hbm %s5732_s0, 256 }
   0x2   :  { %p4070_p0 = scmp.ne.s32.totalorder %s5732_s0, %s4069_s17  ;;  %p4073_p1 = scmp.lt.u32.totalorder %s4069_s17, %s5732_s0 }
   0x4   :  { %p4075_p2 = pnand %p4073_p1, %p4070_p0 }
   0x6   :  { %4078 = shalt.err (!%p4075_p2)  }
   0x7   :  { %s4235_s22 = smov [#allocation5]  }
   0x8   :  { %11 = dma.hbm_to_smem %s5732_s0, 256, %s4235_s22, [#allocation4] }
   0x9   :  { %4191 = dma.done.wait [#allocation4], 256 }
   0xa   :  { %4192 = vsyncadd [#allocation4], 4294967040 }
   0xb   :  { %13 = sfence }
   0xc   :  { %14 = vsyncpa [#allocation7], 0 }
   0xd   :  { %16 = vsyncpa [#allocation7 + $0x1], 0 }
   0xe   :  { %17 = vsyncpa [#allocation9], 0 }
   0xf   :  { %19 = vsyncpa [#allocation9 + $0x1], 0  ;;  %s4278_s25 = smov 0   ;;  %s4280_s26 = smov 0  }
  0x10   :  { %s4282_s27 = smov 0   ;;  %s4284_s28 = smov 0  }
  0x11 LB: > { %5769 = sst [smem:[#allocation18_spill]] %s4205_s25  ;;  %s4299_s0 = sadd.s32 4294967295, %s4217_s28   ;;  %s4217_s28 = sphi %s4284_s28, %s5863_s28   ;;  %s4213_s27 = sphi %s4282_s27, %s5866_s27   ;;  %s4209_s26 = sphi %s4280_s26, %s5865_s26   ;;  %s4205_s25 = sphi %s4278_s25, %s5864_s25  }
  0x12   : > { %5770 = sst [smem:[#allocation19_spill]] %s4209_s26  ;;  %s3339_s29 = sadd.s32 4294967294, %s4217_s28  }
  0x13   : > { %5771 = sst [smem:[#allocation20_spill]] %s4213_s27  ;;  %s4303_s30 = sadd.s32 1, %s4217_s28  }
  0x14   : > { %5772 = sst [smem:[#allocation21_spill]] %s4217_s28  ;;  %s53_s5 = sadd.s32 1, %s4213_s27 }
  0x15   : > { %5773 = sst [smem:[#allocation22_spill]] %s4303_s30  ;;  %s50_s6 = ssub.s32 %s4217_s28, %s4303_s30 }
  0x16   : > { %p63_p3 = scmp.ne.s32.totalorder %s4213_s27, %s4209_s26  ;;  %p51_p4 = scmp.eq.s32.totalorder %s50_s6, 0 }
  0x17   : > { %p64_p5 = scmp.eq.s32.totalorder %s4299_s0, 1  ;;  %p69_p6 = scmp.ne.s32.totalorder %s4209_s26, %s4205_s25 }
  0x18   : > { %p70_p7 = scmp.eq.s32.totalorder %s3339_s29, 1  ;;  %p3341_p10 = scmp.ge.s32.totalorder %s4217_s28, 1 }
  0x19   : > { %s4314_s7 = scalar_select %p51_p4, %s4213_s27, %s53_s5  }
  0x1a   : > { %p4316_p8 = por %p64_p5, %p63_p3  ;;  %p4320_p9 = por %p70_p7, %p69_p6 }
  0x1b   : > { %5774 = sst [smem:[#allocation23_spill]] %s4314_s7  ;;  %p117_p11 = scmp.lt.s32.totalorder %s4217_s28, 3 }
  0x1c   : > { %s5776_s9 = scalar_select %p4320_p9, 1, 0 }
  0x1d   : > { %p118_p12 = pnand %p3341_p10, %p117_p11 }
  0x1e   : > { %5777 = sst [smem:[#allocation24_spill]] %s5776_s9 }
  0x1f   : > { %121 = sbr.rel (%p118_p12) target bundleno = 1334 (0x536), region = 24 }
  0x26   : > { %s4327_s10 = sand.u32 1, %s4209_s26   ;;  %s4335_s15 = smov 0  }
  0x27   : > { %s3342_s12 = sshll.u32 %s4327_s10, 3 }
  0x28   : > { %s4331_s13 = scalar_lea.vmem [#allocation6], %s3342_s12  ;;  %s4333_s14 = scalar_lea.vmem [#allocation8], %s3342_s12 }
  0x29 LB: >> { %s4340_s16 = smov 0   ;;  %s4221_s15 = sphi %s4335_s15, %s146_s15  }
  0x2a LB: >>> { %s5778_s11 = sshll.u32 %s4299_s0, 3  ;;  %s3347_s18 = sshll.u32 %s4221_s15, 7  ;;  %s4225_s16 = sphi %s4340_s16, %s152_s16  }
  0x2b   : >>> { %s153_s17 = sadd.s32 %s4221_s15, %s5778_s11  ;;  %s154_s19 = sshra.s32 %s4225_s16, 7 }
  0x2c   : >>> { %s159_s20 = sand.u32 127, %s4225_s16  ;;  %s156_s21 = sadd.s32 %s154_s19, %s153_s17 }
  0x2d   : >>> { %s165_s22 = sadd.s32 %s4225_s16, %s3347_s18  ;;  %s3345_s23 = sshll.u32 %s156_s21, 7 }
  0x2e   : >>> { %s160_s24 = sadd.s32 %s3345_s23, %s159_s20  ;;  %s166_s5 = scalar_lea.vmem [#allocation2], %s165_s22 }
  0x2f   : >>> { %s161_s29 = sld [smem:[#allocation5 + %s160_s24]]  ;;  %s174_s6 = sshll.u32 %s166_s5, 4  ;;  %s175_s6 = int_to_ptr.vmem [resolvable:$true] %s174_s6 }
  0x30   : >>> { %s4081_s25 = scalar_lea.hbm %s5733_s1, 1664 }
  0x35   : >>> { %s3346_s12 = sshll.u32 %s161_s29, 4 }
  0x36   : >>> { %s163_s26 = scalar_lea.hbm %s5733_s1, %s3346_s12 }
  0x37   : >>> { %s4079_s30 = scalar_lea.hbm %s163_s26, 16  ;;  %p4082_p0 = scmp.lt.u32.totalorder %s163_s26, %s5733_s1 }
  0x38   : >>> { %p4080_p13 = scmp.ne.s32.totalorder %s163_s26, %s4079_s30  ;;  %p4083_p1 = scmp.lt.u32.totalorder %s4081_s25, %s4079_s30 }
  0x39   : >>> { %p4085_p3 = scmp.lt.u32.totalorder %s4079_s30, %s163_s26 }
  0x3a   : >>> { %p4084_p2 = por %p4083_p1, %p4082_p0 }
  0x3c   : >>> { %p4086_p4 = por %p4085_p3, %p4084_p2 }
  0x3e   : >>> { %p4087_p5 = pnand %p4086_p4, %p4080_p13 }
  0x40   : >>> { %4090 = shalt.err (!%p4087_p5)  }
  0x41   : >>> { %s4091_s18 = scalar_lea.vmem %s175_s6, 16  ;;  %s4236_s27 = smov [#allocation2]  }
  0x42   : >>> { %p4092_p6 = scmp.ne.s32.totalorder %s175_s6, %s4091_s18  ;;  %s4093_s7 = sshll.u32 %s4236_s27, 4  ;;  %s4094_s7 = int_to_ptr.vmem [resolvable:$false] %s4093_s7 }
  0x43   : >>> { %s4095_s19 = scalar_lea.vmem %s4094_s7, 16384  ;;  %p4096_p7 = scmp.lt.s32.totalorder %s175_s6, %s4094_s7 }
  0x44   : >>> { %p4097_p10 = scmp.lt.s32.totalorder %s4095_s19, %s4091_s18 }
  0x46   : >>> { %p4098_p11 = por %p4097_p10, %p4096_p7 }
  0x48   : >>> { %p4099_p12 = pnand %p4098_p11, %p4092_p6 }
  0x4a   : >>> { %4102 = shalt.err (!%p4099_p12)  }
  0x4b   : >>> { %177 = dma.hbm_to_vmem [thread:$0]  %s163_s26, 16, %s175_s6, [#allocation3] }
  0x4c   : >>> { %s152_s16 = sadd.s32 1, %s4225_s16  }
  0x4d   : >>> { %p149_p9 = scmp.ge.s32.totalorder %s152_s16, 128  }
  0x4e   : >> { %s146_s15 = sadd.s32 (%p149_p9), 1, %s4221_s15  }
  0x4f   : >> { %151 = sbr.rel (!%p149_p9) target bundleno = 42 (0x2a), region = 107  ;;  %p143_p13 = scmp.ge.s32.totalorder (%p149_p9), %s146_s15, 8  }
  0x56   : > { %145 = sbr.rel (!%p143_p13) target bundleno = 41 (0x29), region = 118  ;;  %s4227_s25 = smov (%p143_p13), 0  }
  0x5d LB: >> { %s4231_s28 = smov 0   ;;  %s4229_s25 = sphi %s4227_s25, %s183_s25  }
  0x5e LB: >>> { %4193 = dma.done.wait [#allocation3], 16  ;;  %s4233_s28 = sphi %s4231_s28, %s189_s28  }
  0x5f   : >>> { %4194 = vsyncadd [#allocation3], 4294967280  ;;  %s189_s28 = sadd.s32 1, %s4233_s28  }
  0x60   : >>> { %p186_p0 = scmp.ge.s32.totalorder %s189_s28, 128  }
  0x61   : >> { %s183_s25 = sadd.s32 (%p186_p0), 1, %s4229_s25  }
  0x62   : >> { %188 = sbr.rel (!%p186_p0) target bundleno = 94 (0x5e), region = 129  ;;  %p180_p9 = scmp.ge.s32.totalorder (%p186_p0), %s183_s25, 8  }
  0x69   : > { %182 = sbr.rel (!%p180_p9) target bundleno = 93 (0x5d), region = 140  ;;  %v4367_v0 = vld [vmem:[#allocation2 + $0x80] sm:$0xff] (%p180_p9)  ;;  %v4369_v1 = vld [vmem:[#allocation2 + $0x88] sm:$0xff] (%p180_p9)  ;;  %v195_v2 = vld [vmem:[#allocation2 + $0x10] sm:$0xff] (%p180_p9)  ;;  %v5744_v3 = vmov (%p180_p9), 0.0   ;;  %vm4238_vm0 = vmmov (%p180_p9), 0  }
  0x6a   : > { %3427 = vmatprep.subr.bf16.mxu0 (%p180_p9), %v5744_v3  ;;  %3447 = vmatprep.subr.bf16.mxu1 (%p180_p9), %v5744_v3  ;;  %v329_v4 = vpack.c.bf16 (%p180_p9), %v4369_v1, %v4367_v0  ;;  %v756_v5 = vmul.f32 (%p180_p9), %v195_v2, %v195_v2  ;;  %v193_v6 = vld [vmem:[#allocation2] sm:$0xff] (%p180_p9)  ;;  %v194_v7 = vld [vmem:[#allocation2 + $0x8] sm:$0xff] (%p180_p9)  ;;  %v196_v8 = vld [vmem:[#allocation2 + $0x18] sm:$0xff] (%p180_p9)  ;;  %v771_v52 = vmul.f32 (%p180_p9), %v4369_v1, %v4369_v1  ;;  %vm1533_vm1 = vcmask (%p180_p9), 130112   ;;  %s3350_s15 = sshll.u32 (%p180_p9), %s4299_s0, 7  ;;  %s3229_s22 = sshll.u32 (%p180_p9), %s4333_s14, 4  ;;  %s5602_s22 = int_to_ptr.vmem [resolvable:$true] %s3229_s22 }
  0x6b   : > { %v754_v9 = vmul.f32 (%p180_p9), %v193_v6, %v193_v6  ;;  %v321_v10 = vpack.c.bf16 (%p180_p9), %v194_v7, %v193_v6  ;;  %3443 = vmatprep.mubr.msk.bf16.mxu0 (%p180_p9), %vm4238_vm0, %v5744_v3  ;;  %v757_v11 = vmul.f32 (%p180_p9), %v196_v8, %v196_v8  ;;  %v755_v12 = vmul.f32 (%p180_p9), %v194_v7, %v194_v7  ;;  %v4377_v13 = vld [vmem:[#allocation2 + $0x90] sm:$0xff] (%p180_p9)  ;;  %v4379_v14 = vld [vmem:[#allocation2 + $0x98] sm:$0xff] (%p180_p9)  ;;  %v198_v15 = vld [vmem:[#allocation2 + $0x28] sm:$0xff] (%p180_p9)  ;;  %s5599_s21 = scalar_lea.hbm (%p180_p9), %s5736_s4, %s3350_s15  ;;  %s3203_s23 = scalar_lea.sflag (%p180_p9), [#allocation9], %s4327_s10 }
  0x6c   : > { %3448 = vmatpush3.bf16.xpose.msra.mxu1 (%p180_p9), %v329_v4  ;;  %886 = vadd.xlane.f32.xlu1 (%p180_p9), %v756_v5  ;;  %v197_v16 = vld [vmem:[#allocation2 + $0x20] sm:$0xff] (%p180_p9)  ;;  %v330_v17 = vpack.c.bf16 (%p180_p9), %v4379_v14, %v4377_v13  ;;  %v759_v18 = vmul.f32 (%p180_p9), %v198_v15, %v198_v15  ;;  %v322_v20 = vpack.c.bf16 (%p180_p9), %v196_v8, %v195_v2  ;;  %v200_v21 = vld [vmem:[#allocation2 + $0x38] sm:$0xff] (%p180_p9)  ;;  %v199_v22 = vld [vmem:[#allocation2 + $0x30] sm:$0xff] (%p180_p9)  ;;  %vm1540_vm2 = vcmask (%p180_p9), 195712   ;;  %s4103_s24 = scalar_lea.vmem (%p180_p9), %s5602_s22, 128  ;;  %s4239_s29 = smov (%p180_p9), [#allocation8]  }
  0x6d   : > { %882 = vadd.xlane.f32.xlu0 (%p180_p9), %v754_v9  ;;  %3428 = vmatpush3.bf16.xpose.msra.mxu0 (%p180_p9), %v321_v10  ;;  %v758_v19 = vmul.f32 (%p180_p9), %v197_v16, %v197_v16  ;;  %v761_v23 = vmul.f32 (%p180_p9), %v200_v21, %v200_v21  ;;  %v760_v24 = vmul.f32 (%p180_p9), %v199_v22, %v199_v22  ;;  %v4387_v25 = vld [vmem:[#allocation2 + $0xa0] sm:$0xff] (%p180_p9)  ;;  %v214_v26 = vld [vmem:[#allocation2 + $0xa8] sm:$0xff] (%p180_p9)  ;;  %v204_v33 = vld [vmem:[#allocation2 + $0x58] sm:$0xff] (%p180_p9)  ;;  %vm1547_vm3 = vcmask (%p180_p9), 261312   ;;  %p4104_p1 = scmp.ne.s32.totalorder (%p180_p9), %s5602_s22, %s4103_s24  ;;  %s4107_s5 = sshll.u32 (%p180_p9), %s4239_s29, 4  ;;  %s4108_s5 = int_to_ptr.vmem [resolvable:$false] %s4107_s5 }
  0x6e   : > { %3429 = vmatprep.subr.bf16.mxu0 (%p180_p9), %v5744_v3  ;;  %3449 = vmatprep.subr.bf16.mxu1 (%p180_p9), %v5744_v3  ;;  %v202_v27 = vld [vmem:[#allocation2 + $0x48] sm:$0xff] (%p180_p9)  ;;  %v201_v28 = vld [vmem:[#allocation2 + $0x40] sm:$0xff] (%p180_p9)  ;;  %v331_v29 = vpack.c.bf16 (%p180_p9), %v214_v26, %v4387_v25  ;;  %v323_v32 = vpack.c.bf16 (%p180_p9), %v198_v15, %v197_v16  ;;  %v203_v34 = vld [vmem:[#allocation2 + $0x50] sm:$0xff] (%p180_p9)  ;;  %v765_v35 = vmul.f32 (%p180_p9), %v204_v33, %v204_v33  ;;  %vm1554_vm4 = vcmask (%p180_p9), 326912   ;;  %s4109_s6 = scalar_lea.vmem (%p180_p9), %s4108_s5, 256  ;;  %p4110_p4 = scmp.lt.s32.totalorder (%p180_p9), %s5602_s22, %s4108_s5 }
  0x6f   : > { %3463 = vmatprep.mubr.msk.bf16.mxu1 (%p180_p9), %vm4238_vm0, %v5744_v3  ;;  %v763_v30 = vmul.f32 (%p180_p9), %v202_v27, %v202_v27  ;;  %v762_v31 = vmul.f32 (%p180_p9), %v201_v28, %v201_v28  ;;  %v764_v36 = vmul.f32 (%p180_p9), %v203_v34, %v203_v34  ;;  %v215_v37 = vld [vmem:[#allocation2 + $0xb0] sm:$0xff] (%p180_p9)  ;;  %v216_v38 = vld [vmem:[#allocation2 + $0xb8] sm:$0xff] (%p180_p9)  ;;  %v4392_v39 = vld [vmem:[#allocation2 + $0x68] sm:$0xff] (%p180_p9)  ;;  %v324_v44 = vpack.c.bf16 (%p180_p9), %v200_v21, %v199_v22  ;;  %p4105_p2 = pnand (%p180_p9), %p4104_p1, %p4316_p8  ;;  %p4111_p5 = scmp.lt.s32.totalorder (%p180_p9), %s4109_s6, %s4103_s24 }
  0x70   : > { %888 = vadd.xlane.f32.xlu1 %v757_v11  ;;  %v205_v40 = vld [vmem:[#allocation2 + $0x60] sm:$0xff]  ;;  %v332_v41 = vpack.c.bf16 %v216_v38, %v215_v37  ;;  %v767_v42 = vmul.f32 %v4392_v39, %v4392_v39  ;;  %v4398_v45 = vld [vmem:[#allocation2 + $0x78] sm:$0xff]  ;;  %v4400_v46 = vld [vmem:[#allocation2 + $0x70] sm:$0xff]  ;;  %v770_v53 = vmul.f32 %v4367_v0, %v4367_v0  ;;  %v325_v54 = vpack.c.bf16 %v202_v27, %v201_v28 }
  0x71   : > { %884 = vadd.xlane.f32.xlu0 %v755_v12  ;;  %v766_v43 = vmul.f32 %v205_v40, %v205_v40  ;;  %v769_v47 = vmul.f32 %v4398_v45, %v4398_v45  ;;  %v768_v48 = vmul.f32 %v4400_v46, %v4400_v46  ;;  %v217_v49 = vld [vmem:[#allocation2 + $0xc0] sm:$0xff]  ;;  %v218_v50 = vld [vmem:[#allocation2 + $0xc8] sm:$0xff]  ;;  %v773_v55 = vmul.f32 %v4379_v14, %v4379_v14  ;;  %v219_v57 = vld [vmem:[#allocation2 + $0xd0] sm:$0xff]  ;;  %p4106_p3 = pneg %p4105_p2  ;;  %p4112_p6 = por %p4111_p5, %p4110_p4 }
  0x72   : > { %v333_v51 = vpack.c.bf16 %v218_v50, %v217_v49  ;;  %v772_v56 = vmul.f32 %v4377_v13, %v4377_v13  ;;  %v220_v58 = vld [vmem:[#allocation2 + $0xd8] sm:$0xff]  ;;  %v775_v60 = vmul.f32 %v214_v26, %v214_v26  ;;  %v774_v61 = vmul.f32 %v4387_v25, %v4387_v25  ;;  %v221_v1 = vld [vmem:[#allocation2 + $0xe0] sm:$0xff]  ;;  %v222_v2 = vld [vmem:[#allocation2 + $0xe8] sm:$0xff] }
  0x73   : > { %v334_v59 = vpack.c.bf16 %v220_v58, %v219_v57  ;;  %v326_v62 = vpack.c.bf16 %v204_v33, %v203_v34  ;;  %v777_v63 = vmul.f32 %v216_v38, %v216_v38  ;;  %v776_v0 = vmul.f32 %v215_v37, %v215_v37  ;;  %v223_v10 = vld [vmem:[#allocation2 + $0xf0] sm:$0xff]  ;;  %v224_v11 = vld [vmem:[#allocation2 + $0xf8] sm:$0xff]  ;;  %v225_v21 = vld [vmem:[#allocation2 + $0x100] sm:$0xff]  ;;  %p4113_p7 = pnand %p4112_p6, %p4106_p3 }
  0x74   : > { %3450 = vmatpush3.bf16.xpose.msra.mxu1 %v330_v17  ;;  %892 = vadd.xlane.f32.xlu1 %v759_v18  ;;  %v335_v4 = vpack.c.bf16 %v222_v2, %v221_v1  ;;  %v779_v5 = vmul.f32 %v218_v50, %v218_v50  ;;  %v778_v6 = vmul.f32 %v217_v49, %v217_v49  ;;  %v4427_v18 = vld [vmem:[#allocation2 + $0x180] sm:$0xff]  ;;  %v228_v27 = vld [vmem:[#allocation2 + $0x118] sm:$0xff]  ;;  %v227_v28 = vld [vmem:[#allocation2 + $0x110] sm:$0xff]  ;;  %vm1561_vm5 = vcmask 392512  }
  0x75   : > { %890 = vadd.xlane.f32.xlu0 %v758_v19  ;;  %3430 = vmatpush3.bf16.xpose.msra.mxu0 %v322_v20  ;;  %v327_v7 = vpack.c.bf16 %v4392_v39, %v205_v40  ;;  %v781_v8 = vmul.f32 %v220_v58, %v220_v58  ;;  %v780_v9 = vmul.f32 %v219_v57, %v219_v57  ;;  %v4429_v19 = vld [vmem:[#allocation2 + $0x188] sm:$0xff]  ;;  %v4436_v22 = vld [vmem:[%s5734_s2] sm:$0xf]  ;;  %v232_v39 = vld [vmem:[#allocation2 + $0x138] sm:$0xff]  ;;  %vm1568_vm6 = vcmask 458112  }
  0x76   : > { %3431 = vmatprep.subr.bf16.mxu0 %v5744_v3  ;;  %3451 = vmatprep.subr.bf16.mxu1 %v5744_v3  ;;  %v336_v12 = vpack.c.bf16 %v224_v11, %v223_v10  ;;  %v783_v13 = vmul.f32 %v222_v2, %v222_v2  ;;  %v782_v14 = vmul.f32 %v221_v1, %v221_v1  ;;  %v226_v20 = vld [vmem:[#allocation2 + $0x108] sm:$0xff]  ;;  %v229_v34 = vld [vmem:[#allocation2 + $0x120] sm:$0xff]  ;;  %v231_v40 = vld [vmem:[#allocation2 + $0x130] sm:$0xff]  ;;  %vm1575_vm7 = vcmask 523712  }
  0x77   : > { %v328_v15 = vpack.c.bf16 %v4398_v45, %v4400_v46  ;;  %v785_v16 = vmul.f32 %v224_v11, %v224_v11  ;;  %v784_v17 = vmul.f32 %v223_v10, %v223_v10  ;;  %v786_v25 = vmul.f32 %v225_v21, %v225_v21  ;;  %v230_v33 = vld [vmem:[#allocation2 + $0x128] sm:$0xff]  ;;  %v233_v46 = vld [vmem:[#allocation2 + $0x140] sm:$0xff] }
  0x78   : > { %896 = vadd.xlane.f32.xlu1 %v761_v23  ;;  %v345_v23 = vpack.c.bf16 %v4429_v19, %v4427_v18  ;;  %v337_v26 = vpack.c.bf16 %v226_v20, %v225_v21  ;;  %v790_v37 = vmul.f32 %v229_v34, %v229_v34  ;;  %v338_v38 = vpack.c.bf16 %v228_v27, %v227_v28  ;;  %v234_v45 = vld [vmem:[#allocation2 + $0x148] sm:$0xff]  ;;  %v4462_v58 = vld [vmem:[#allocation2 + $0x160] sm:$0xff] }
  0x79   : > { %894 = vadd.xlane.f32.xlu0 %v760_v24  ;;  %v787_v24 = vmul.f32 %v226_v20, %v226_v20  ;;  %v794_v49 = vmul.f32 %v233_v46, %v233_v46  ;;  %v339_v50 = vpack.c.bf16 %v230_v33, %v229_v34  ;;  %v4460_v57 = vld [vmem:[#allocation2 + $0x168] sm:$0xff]  ;;  %v4494_v20 = vld [vmem:[#allocation2 + $0x1e0] sm:$0xff]  ;;  %vm1582_vm8 = vcmask 589312  }
  0x7a   : > { %v4496_v21 = vld [vmem:[#allocation2 + $0x1e8] sm:$0xff]  ;;  %vm1589_vm9 = vcmask 654912   ;;  %vm1596_vm10 = vcmask 720512   ;;  %vm1603_vm11 = vcmask 786112   ;;  %vm1610_vm12 = vcmask 851712  }
  0x7b   : > { %vm1617_vm13 = vcmask 917312   ;;  %vm1624_vm14 = vcmask 982912   ;;  %vm1631_vm15 = vcmask 1048512  }
  0x7c   : > { %3452 = vmatpush3.bf16.xpose.msra.mxu1 %v331_v29  ;;  %900 = vadd.xlane.f32.xlu1 %v763_v30  ;;  %v789_v29 = vmul.f32 %v228_v27, %v228_v27  ;;  %v788_v30 = vmul.f32 %v227_v28, %v227_v28  ;;  %v257_v27 = vld [vmem:[#allocation2 + $0x200] sm:$0xff] }
  0x7d   : > { %898 = vadd.xlane.f32.xlu0 %v762_v31  ;;  %3432 = vmatpush3.bf16.xpose.msra.mxu0 %v323_v32  ;;  %v4442_v31 = vld [vmem:[#allocation2 + $0x190] sm:$0xff]  ;;  %v4444_v32 = vld [vmem:[#allocation2 + $0x198] sm:$0xff]  ;;  %v818_v28 = vmul.f32 %v257_v27, %v257_v27 }
  0x7e   : > { %3433 = vmatprep.subr.bf16.mxu0 %v5744_v3  ;;  %3453 = vmatprep.subr.bf16.mxu1 %v5744_v3  ;;  %v805_v10 = vmul.f32 %v4444_v32, %v4444_v32  ;;  %v804_v11 = vmul.f32 %v4442_v31, %v4442_v31 }
  0x80   : > { %904 = vadd.xlane.f32.xlu1 %v765_v35  ;;  %v346_v35 = vpack.c.bf16 %v4444_v32, %v4442_v31  ;;  %v4506_v31 = vld [vmem:[#allocation2 + $0x1f8] sm:$0xff]  ;;  %v259_v32 = vld [vmem:[#allocation2 + $0x210] sm:$0xff] }
  0x81   : > { %902 = vadd.xlane.f32.xlu0 %v764_v36  ;;  %v791_v36 = vmul.f32 %v230_v33, %v230_v33  ;;  %5779 = vst [vmem:[#allocation25_spill] sm:$0xff] %v4506_v31  ;;  %v258_v33 = vld [vmem:[#allocation2 + $0x208] sm:$0xff] }
  0x84   : > { %3454 = vmatpush3.bf16.xpose.msra.mxu1 %v332_v41  ;;  %908 = vadd.xlane.f32.xlu1 %v767_v42  ;;  %v793_v41 = vmul.f32 %v232_v39, %v232_v39  ;;  %v792_v42 = vmul.f32 %v231_v40, %v231_v40 }
  0x85   : > { %906 = vadd.xlane.f32.xlu0 %v766_v43  ;;  %3434 = vmatpush3.bf16.xpose.msra.mxu0 %v324_v44  ;;  %v4454_v43 = vld [vmem:[#allocation2 + $0x1a0] sm:$0xff]  ;;  %v246_v44 = vld [vmem:[#allocation2 + $0x1a8] sm:$0xff] }
  0x86   : > { %3435 = vmatprep.subr.bf16.mxu0 %v5744_v3  ;;  %3455 = vmatprep.subr.bf16.mxu1 %v5744_v3 }
  0x88   : > { %912 = vadd.xlane.f32.xlu1 %v769_v47  ;;  %v347_v47 = vpack.c.bf16 %v246_v44, %v4454_v43 }
  0x89   : > { %910 = vadd.xlane.f32.xlu0 %v768_v48  ;;  %v795_v48 = vmul.f32 %v234_v45, %v234_v45 }
  0x8c   : > { %3456 = vmatpush3.bf16.xpose.msra.mxu1 %v333_v51  ;;  %916 = vadd.xlane.f32.xlu1 %v771_v52  ;;  %v236_v51 = vld [vmem:[#allocation2 + $0x158] sm:$0xff]  ;;  %v235_v52 = vld [vmem:[#allocation2 + $0x150] sm:$0xff] }
  0x8d   : > { %914 = vadd.xlane.f32.xlu0 %v770_v53  ;;  %3436 = vmatpush3.bf16.xpose.msra.mxu0 %v325_v54  ;;  %v797_v53 = vmul.f32 %v236_v51, %v236_v51  ;;  %v796_v54 = vmul.f32 %v235_v52, %v235_v52 }
  0x8e   : > { %3437 = vmatprep.subr.bf16.mxu0 %v5744_v3  ;;  %3457 = vmatprep.subr.bf16.mxu1 %v5744_v3 }
  0x90   : > { %920 = vadd.xlane.f32.xlu1 %v773_v55  ;;  %v247_v55 = vld [vmem:[#allocation2 + $0x1b0] sm:$0xff] }
  0x91   : > { %918 = vadd.xlane.f32.xlu0 %v772_v56  ;;  %v248_v56 = vld [vmem:[#allocation2 + $0x1b8] sm:$0xff] }
  0x94   : > { %3458 = vmatpush3.bf16.xpose.msra.mxu1 %v334_v59  ;;  %924 = vadd.xlane.f32.xlu1 %v775_v60  ;;  %v348_v59 = vpack.c.bf16 %v248_v56, %v247_v55  ;;  %v799_v60 = vmul.f32 %v4460_v57, %v4460_v57 }
  0x95   : > { %922 = vadd.xlane.f32.xlu0 %v774_v61  ;;  %3438 = vmatpush3.bf16.xpose.msra.mxu0 %v326_v62  ;;  %v798_v61 = vmul.f32 %v4462_v58, %v4462_v58  ;;  %v340_v62 = vpack.c.bf16 %v232_v39, %v231_v40  ;;  %v273_v39 = vld [vmem:[#allocation2 + $0x280] sm:$0xff] }
  0x96   : > { %3439 = vmatprep.subr.bf16.mxu0 %v5744_v3  ;;  %3459 = vmatprep.subr.bf16.mxu1 %v5744_v3 }
  0x98   : > { %928 = vadd.xlane.f32.xlu1 %v777_v63  ;;  %v4469_v63 = vld [vmem:[#allocation2 + $0x178] sm:$0xff] }
  0x99   : > { %926 = vadd.xlane.f32.xlu0 %v776_v0  ;;  %v4471_v0 = vld [vmem:[#allocation2 + $0x170] sm:$0xff]  ;;  %v801_v1 = vmul.f32 %v4469_v63, %v4469_v63 }
  0x9a   : > { %v800_v2 = vmul.f32 %v4471_v0, %v4471_v0 }
  0x9c   : > { %3460 = vmatpush3.bf16.xpose.msra.mxu1 %v335_v4  ;;  %932 = vadd.xlane.f32.xlu1 %v779_v5  ;;  %v249_v4 = vld [vmem:[#allocation2 + $0x1c0] sm:$0xff]  ;;  %v250_v5 = vld [vmem:[#allocation2 + $0x1c8] sm:$0xff] }
  0x9d   : > { %930 = vadd.xlane.f32.xlu0 %v778_v6  ;;  %3440 = vmatpush3.bf16.xpose.msra.mxu0 %v327_v7  ;;  %v349_v6 = vpack.c.bf16 %v250_v5, %v249_v4  ;;  %v803_v7 = vmul.f32 %v4429_v19, %v4429_v19  ;;  %v808_v19 = vmul.f32 %v247_v55, %v247_v55 }
  0x9e   : > { %3441 = vmatprep.subr.bf16.mxu0 %v5744_v3  ;;  %3461 = vmatprep.subr.bf16.mxu1 %v5744_v3 }
  0xa0   : > { %936 = vadd.xlane.f32.xlu1 %v781_v8  ;;  %v802_v8 = vmul.f32 %v4427_v18, %v4427_v18  ;;  %v809_v18 = vmul.f32 %v248_v56, %v248_v56 }
  0xa1   : > { %934 = vadd.xlane.f32.xlu0 %v780_v9  ;;  %v341_v9 = vpack.c.bf16 %v234_v45, %v233_v46  ;;  %v353_v46 = vpack.c.bf16 %v258_v33, %v257_v27 }
  0xa4   : > { %3462 = vmatpush3.bf16.xpose.msra.mxu1 %v336_v12  ;;  %940 = vadd.xlane.f32.xlu1 %v783_v13  ;;  %v251_v12 = vld [vmem:[#allocation2 + $0x1d0] sm:$0xff]  ;;  %v4487_v13 = vld [vmem:[#allocation2 + $0x1d8] sm:$0xff] }
  0xa5   : > { %938 = vadd.xlane.f32.xlu0 %v782_v14  ;;  %3442 = vmatpush3.bf16.xpose.msra.mxu0 %v328_v15  ;;  %v350_v14 = vpack.c.bf16 %v4487_v13, %v251_v12  ;;  %v807_v15 = vmul.f32 %v246_v44, %v246_v44 }
  0xa6   : > { %3467 = vmatprep.subr.bf16.mxu0 %v5744_v3  ;;  %3487 = vmatprep.subr.bf16.mxu1 %v5744_v3 }
  0xa8   : > { %944 = vadd.xlane.f32.xlu1 %v785_v16  ;;  %v806_v16 = vmul.f32 %v4454_v43, %v4454_v43  ;;  %v260_v43 = vld [vmem:[#allocation2 + $0x218] sm:$0xff] }
  0xa9   : > { %942 = vadd.xlane.f32.xlu0 %v784_v17  ;;  %v342_v17 = vpack.c.bf16 %v236_v51, %v235_v52  ;;  %v354_v56 = vpack.c.bf16 %v260_v43, %v259_v32 }
  0xab   : > { %3464 = vmatmul.mubr.bf16.vlgmr.msra.gmra.mrb[0].mxu1 %v4436_v22 }
  0xac   : > { %3444 = vmatmul.mubr.bf16.vlgmr.msra.gmra.mrb[0].mxu0 %v4436_v22  ;;  %3488 = vmatpush3.bf16.xpose.msra.mxu1 %v345_v23  ;;  %v351_v23 = vpack.c.bf16 %v4496_v21, %v4494_v20 }
  0xad   : > { %948 = vadd.xlane.f32.xlu1 %v787_v24  ;;  %946 = vadd.xlane.f32.xlu0 %v786_v25  ;;  %v811_v24 = vmul.f32 %v250_v5, %v250_v5  ;;  %v810_v25 = vmul.f32 %v249_v4, %v249_v4 }
  0xae   : > { %3468 = vmatpush3.bf16.xpose.msra.mxu0 %v337_v26  ;;  %3489 = vmatprep.subr.bf16.mxu1 %v5744_v3  ;;  %v343_v26 = vpack.c.bf16 %v4460_v57, %v4462_v58  ;;  %v4532_v58 = vld [vmem:[#allocation2 + $0x380] sm:$0xff] }
  0xaf   : > { %3469 = vmatprep.subr.bf16.mxu0 %v5744_v3  ;;  %3483 = vmatprep.mubr.msk.bf16.mxu0 %vm4238_vm0, %v5744_v3 }
  0xb0   : > { %3503 = vmatprep.mubr.msk.bf16.mxu1 %vm4238_vm0, %v5744_v3 }
  0xb1   : > { %952 = vadd.xlane.f32.xlu1 %v789_v29  ;;  %950 = vadd.xlane.f32.xlu0 %v788_v30  ;;  %v812_v29 = vmul.f32 %v251_v12, %v251_v12  ;;  %v4504_v30 = vld [vmem:[#allocation2 + $0x1f0] sm:$0xff] }
  0xb2   : > { %v352_v34 = vpack.c.bf16 %v4506_v31, %v4504_v30 }
  0xb4   : > { %3490 = vmatpush3.bf16.xpose.msra.mxu1 %v346_v35  ;;  %v820_v35 = vmul.f32 %v259_v32, %v259_v32 }
  0xb5   : > { %956 = vadd.xlane.f32.xlu1 %v791_v36  ;;  %954 = vadd.xlane.f32.xlu0 %v790_v37  ;;  %v819_v36 = vmul.f32 %v258_v33, %v258_v33  ;;  %v344_v37 = vpack.c.bf16 %v4469_v63, %v4471_v0  ;;  %v262_v0 = vld [vmem:[#allocation2 + $0x228] sm:$0xff] }
  0xb6   : > { %3470 = vmatpush3.bf16.xpose.msra.mxu0 %v338_v38  ;;  %3491 = vmatprep.subr.bf16.mxu1 %v5744_v3  ;;  %v274_v38 = vld [vmem:[#allocation2 + $0x288] sm:$0xff] }
  0xb7   : > { %3471 = vmatprep.subr.bf16.mxu0 %v5744_v3  ;;  %v835_v40 = vmul.f32 %v274_v38, %v274_v38  ;;  %v361_v44 = vpack.c.bf16 %v274_v38, %v273_v39  ;;  %v4574_v38 = vld [vmem:[#allocation2 + $0x2c0] sm:$0xff] }
  0xb9   : > { %960 = vadd.xlane.f32.xlu1 %v793_v41  ;;  %958 = vadd.xlane.f32.xlu0 %v792_v42  ;;  %v834_v41 = vmul.f32 %v273_v39, %v273_v39  ;;  %v275_v42 = vld [vmem:[#allocation2 + $0x290] sm:$0xff]  ;;  %v4576_v39 = vld [vmem:[#allocation2 + $0x2c8] sm:$0xff] }
  0xba   : > { %v836_v45 = vmul.f32 %v275_v42, %v275_v42 }
  0xbc   : > { %3492 = vmatpush3.bf16.xpose.msra.mxu1 %v347_v47  ;;  %v821_v47 = vmul.f32 %v260_v43, %v260_v43 }
  0xbd   : > { %964 = vadd.xlane.f32.xlu1 %v795_v48  ;;  %962 = vadd.xlane.f32.xlu0 %v794_v49  ;;  %v4516_v48 = vld [vmem:[#allocation2 + $0x308] sm:$0xff]  ;;  %v4519_v49 = vld [vmem:[#allocation2 + $0x300] sm:$0xff] }
  0xbe   : > { %3472 = vmatpush3.bf16.xpose.msra.mxu0 %v339_v50  ;;  %3493 = vmatprep.subr.bf16.mxu1 %v5744_v3  ;;  %v276_v50 = vld [vmem:[#allocation2 + $0x298] sm:$0xff]  ;;  %v851_v51 = vmul.f32 %v4516_v48, %v4516_v48  ;;  %v850_v52 = vmul.f32 %v4519_v49, %v4519_v49 }
  0xbf   : > { %3473 = vmatprep.subr.bf16.mxu0 %v5744_v3  ;;  %v837_v55 = vmul.f32 %v276_v50, %v276_v50 }
  0xc1   : > { %968 = vadd.xlane.f32.xlu1 %v797_v53  ;;  %966 = vadd.xlane.f32.xlu0 %v796_v54  ;;  %v261_v53 = vld [vmem:[#allocation2 + $0x220] sm:$0xff]  ;;  %v362_v54 = vpack.c.bf16 %v276_v50, %v275_v42 }
  0xc2   : > { %v822_v57 = vmul.f32 %v261_v53, %v261_v53 }
  0xc4   : > { %3494 = vmatpush3.bf16.xpose.msra.mxu1 %v348_v59  ;;  %v4534_v59 = vld [vmem:[#allocation2 + $0x310] sm:$0xff] }
  0xc5   : > { %972 = vadd.xlane.f32.xlu1 %v799_v60  ;;  %970 = vadd.xlane.f32.xlu0 %v798_v61  ;;  %v866_v60 = vmul.f32 %v4532_v58, %v4532_v58  ;;  %v277_v61 = vld [vmem:[#allocation2 + $0x2a0] sm:$0xff]  ;;  %v852_v63 = vmul.f32 %v4534_v59, %v4534_v59 }
  0xc6   : > { %3474 = vmatpush3.bf16.xpose.msra.mxu0 %v340_v62  ;;  %3495 = vmatprep.subr.bf16.mxu1 %v5744_v3  ;;  %v4539_v62 = vld [vmem:[#allocation2 + $0x2a8] sm:$0xff] }
  0xc7   : > { %3475 = vmatprep.subr.bf16.mxu0 %v5744_v3  ;;  %v363_v4 = vpack.c.bf16 %v4539_v62, %v277_v61 }
  0xc9   : > { %976 = vadd.xlane.f32.xlu1 %v801_v1  ;;  %974 = vadd.xlane.f32.xlu0 %v800_v2  ;;  %v4544_v1 = vld [vmem:[#allocation2 + $0x388] sm:$0xff]  ;;  %v1522_v2 = vlaneseq }
  0xcc   : > { %3496 = vmatpush3.bf16.xpose.msra.mxu1 %v349_v6  ;;  %v823_v6 = vmul.f32 %v262_v0, %v262_v0 }
  0xcd   : > { %980 = vadd.xlane.f32.xlu1 %v803_v7  ;;  %978 = vadd.xlane.f32.xlu0 %v802_v8  ;;  %v355_v8 = vpack.c.bf16 %v262_v0, %v261_v53  ;;  %v4597_v53 = vld [vmem:[#allocation2 + $0x248] sm:$0xff] }
  0xce   : > { %3476 = vmatpush3.bf16.xpose.msra.mxu0 %v341_v9  ;;  %3497 = vmatprep.subr.bf16.mxu1 %v5744_v3  ;;  %v867_v9 = vmul.f32 %v4544_v1, %v4544_v1 }
  0xcf   : > { %3477 = vmatprep.subr.bf16.mxu0 %v5744_v3 }
  0xd1   : > { %984 = vadd.xlane.f32.xlu1 %v805_v10  ;;  %982 = vadd.xlane.f32.xlu0 %v804_v11  ;;  %v4549_v10 = vld [vmem:[#allocation2 + $0x318] sm:$0xff]  ;;  %v4551_v11 = vand.u32 127, %v1522_v2 }
  0xd4   : > { %3498 = vmatpush3.bf16.xpose.msra.mxu1 %v350_v14  ;;  %v853_v14 = vmul.f32 %v4549_v10, %v4549_v10 }
  0xd5   : > { %988 = vadd.xlane.f32.xlu1 %v807_v15  ;;  %986 = vadd.xlane.f32.xlu0 %v806_v16  ;;  %v4556_v15 = vld [vmem:[#allocation2 + $0x2b0] sm:$0xff]  ;;  %v4558_v16 = vld [vmem:[#allocation2 + $0x2b8] sm:$0xff] }
  0xd6   : > { %3478 = vmatpush3.bf16.xpose.msra.mxu0 %v342_v17  ;;  %3499 = vmatprep.subr.bf16.mxu1 %v5744_v3  ;;  %v364_v27 = vpack.c.bf16 %v4558_v16, %v4556_v15 }
  0xd7   : > { %3479 = vmatprep.subr.bf16.mxu0 %v5744_v3 }
  0xd9   : > { %992 = vadd.xlane.f32.xlu1 %v809_v18  ;;  %990 = vadd.xlane.f32.xlu0 %v808_v19  ;;  %v838_v18 = vmul.f32 %v277_v61, %v277_v61  ;;  %v263_v19 = vld [vmem:[#allocation2 + $0x230] sm:$0xff] }
  0xda   : > { %v824_v33 = vmul.f32 %v263_v19, %v263_v19 }
  0xdc   : > { %3500 = vmatpush3.bf16.xpose.msra.mxu1 %v351_v23  ;;  %v264_v23 = vld [vmem:[#allocation2 + $0x238] sm:$0xff] }
  0xdd   : > { %996 = vadd.xlane.f32.xlu1 %v811_v24  ;;  %994 = vadd.xlane.f32.xlu0 %v810_v25  ;;  %v4561_v24 = vld [vmem:[#allocation2 + $0x390] sm:$0xff]  ;;  %v4563_v25 = vshrl.u32 %v1522_v2, 7  ;;  %v825_v0 = vmul.f32 %v264_v23, %v264_v23 }
  0xde   : > { %3480 = vmatpush3.bf16.xpose.msra.mxu0 %v343_v26  ;;  %3501 = vmatprep.subr.bf16.mxu1 %v5744_v3  ;;  %v1535_v26 = vadd.s32 4294967280, %v4551_v11 }
  0xdf   : > { %3481 = vmatprep.subr.bf16.mxu0 %v5744_v3  ;;  %5780 = vst [vmem:[#allocation26_spill] sm:$0xff] %v4563_v25  ;;  %v4583_v42 = vsub.s32 %v4551_v11, %v4563_v25 }
  0xe1   : > { %1010 = vadd.xlane.f32.xlu1 %v818_v28  ;;  %998 = vadd.xlane.f32.xlu0 %v812_v29  ;;  %v1542_v28 = vadd.s32 4294967272, %v4551_v11  ;;  %v1528_v29 = vadd.s32 4294967288, %v4551_v11 }
  0xe4   : > { %3502 = vmatpush3.bf16.xpose.msra.mxu1 %v352_v34 }
  0xe5   : > { %1014 = vadd.xlane.f32.xlu1 %v820_v35  ;;  %1012 = vadd.xlane.f32.xlu0 %v819_v36  ;;  %v356_v35 = vpack.c.bf16 %v264_v23, %v263_v19  ;;  %v868_v36 = vmul.f32 %v4561_v24, %v4561_v24  ;;  %v840_v19 = vmul.f32 %v4556_v15, %v4556_v15  ;;  %v4619_v23 = vld [vmem:[#allocation2 + $0x2d0] sm:$0xff] }
  0xe6   : > { %3482 = vmatpush3.bf16.xpose.msra.mxu0 %v344_v37  ;;  %3527 = vmatprep.subr.bf16.mxu1 %v5744_v3  ;;  %v4572_v37 = vld [vmem:[#allocation2 + $0x320] sm:$0xff] }
  0xe7   : > { %3507 = vmatprep.subr.bf16.mxu0 %v5744_v3  ;;  %v854_v50 = vmul.f32 %v4572_v37, %v4572_v37 }
  0xe9   : > { %1044 = vadd.xlane.f32.xlu1 %v835_v40  ;;  %1042 = vadd.xlane.f32.xlu0 %v834_v41  ;;  %v4579_v41 = vsub.s32 %v1535_v26, %v4563_v25  ;;  %v4621_v26 = vld [vmem:[#allocation2 + $0x2d8] sm:$0xff] }
  0xeb   : > { %3504 = vmatmul.mubr.bf16.vlgmr.msra.gmra.mrb[4].mxu1 %v4436_v22 }
  0xec   : > { %3528 = vmatpush3.bf16.xpose.msra.mxu1 %v361_v44  ;;  %3543 = vmatprep.mubr.msk.bf16.mxu1 %vm4238_vm0, %v5744_v3  ;;  %v4586_v44 = vsub.s32 %v1542_v28, %v4563_v25 }
  0xed   : > { %3484 = vmatmul.mubr.bf16.vlgmr.msra.gmra.mrb[4].mxu0 %v4436_v22  ;;  %1046 = vadd.xlane.f32.xlu1 %v836_v45  ;;  %v4589_v45 = vsub.s32 %v1528_v29, %v4563_v25  ;;  %v1563_v29 = vadd.s32 4294967248, %v4551_v11 }
  0xee   : > { %1016 = vadd.xlane.f32.xlu0 %v821_v47  ;;  %3508 = vmatpush3.bf16.xpose.msra.mxu0 %v353_v46  ;;  %v1556_v46 = vadd.s32 4294967256, %v4551_v11 }
  0xef   : > { %3509 = vmatprep.subr.bf16.mxu0 %v5744_v3  ;;  %3529 = vmatprep.subr.bf16.mxu1 %v5744_v3 }
  0xf0   : > { %3523 = vmatprep.mubr.msk.bf16.mxu0 %vm4238_vm0, %v5744_v3 }
  0xf1   : > { %1076 = vadd.xlane.f32.xlu1 %v851_v51  ;;  %v4595_v51 = vld [vmem:[#allocation2 + $0x398] sm:$0xff] }
  0xf2   : > { %1074 = vadd.xlane.f32.xlu0 %v850_v52  ;;  %v265_v52 = vld [vmem:[#allocation2 + $0x240] sm:$0xff] }
  0xf4   : > { %3530 = vmatpush3.bf16.xpose.msra.mxu1 %v362_v54 }
  0xf5   : > { %1048 = vadd.xlane.f32.xlu1 %v837_v55  ;;  %3531 = vmatprep.subr.bf16.mxu1 %v5744_v3 }
  0xf6   : > { %1018 = vadd.xlane.f32.xlu0 %v822_v57  ;;  %3510 = vmatpush3.bf16.xpose.msra.mxu0 %v354_v56  ;;  %v839_v56 = vmul.f32 %v4539_v62, %v4539_v62  ;;  %v365_v57 = vpack.c.bf16 %v4576_v39, %v4574_v38  ;;  %v357_v62 = vpack.c.bf16 %v4597_v53, %v265_v52 }
  0xf7   : > { %3511 = vmatprep.subr.bf16.mxu0 %v5744_v3 }
  0xf9   : > { %1106 = vadd.xlane.f32.xlu1 %v866_v60  ;;  %v887_v5 = vpop.xlane.xlu1 %886  ;;  %v4603_v60 = vld [vmem:[#allocation2 + $0x328] sm:$0xff] }
  0xfa   : > { %1078 = vadd.xlane.f32.xlu0 %v852_v63  ;;  %3666 = vrsqrt.f32 %v887_v5  ;;  %v883_v7 = vpop.xlane.xlu0 %882  ;;  %v1549_v63 = vadd.s32 4294967264, %v4551_v11 }
  0xfb   : > { %3668 = vrsqrt.f32 %v883_v7  ;;  %v4611_v7 = vsub.s32 %v1556_v46, %v4563_v25  ;;  %v826_v46 = vmul.f32 %v265_v52, %v265_v52  ;;  %v4647_v52 = vsub.s32 %v1563_v29, %v4563_v25 }
  0xfc   : > { %3532 = vmatpush3.bf16.xpose.msra.mxu1 %v363_v4  ;;  %v869_v4 = vmul.f32 %v4595_v51, %v4595_v51  ;;  %v4625_v28 = vsub.s32 %v1549_v63, %v4563_v25 }
  0xfd   : > { %1020 = vadd.xlane.f32.xlu1 %v823_v6  ;;  %v889_v12 = vpop.xlane.xlu1 %888  ;;  %3533 = vmatprep.subr.bf16.mxu1 %v5744_v3 }
  0xfe   : > { %1108 = vadd.xlane.f32.xlu0 %v867_v9  ;;  %3512 = vmatpush3.bf16.xpose.msra.mxu0 %v355_v8  ;;  %3670 = vrsqrt.f32 %v889_v12  ;;  %v885_v17 = vpop.xlane.xlu0 %884  ;;  %v1570_v8 = vadd.s32 4294967240, %v4551_v11  ;;  %v855_v12 = vmul.f32 %v4603_v60, %v4603_v60 }
  0xff   : > { %3672 = vrsqrt.f32 %v885_v17  ;;  %3513 = vmatprep.subr.bf16.mxu0 %v5744_v3 }
 0x101   : > { %1080 = vadd.xlane.f32.xlu1 %v853_v14  ;;  %v893_v32 = vpop.xlane.xlu1 %892 }
 0x102   : > { %1050 = vadd.xlane.f32.xlu0 %v838_v18  ;;  %3674 = vrsqrt.f32 %v893_v32  ;;  %v891_v34 = vpop.xlane.xlu0 %890 }
 0x103   : > { %3676 = vrsqrt.f32 %v891_v34 }
 0x104   : > { %v3667_v40 = vpop.eup %3666  ;;  %3534 = vmatpush3.bf16.xpose.msra.mxu1 %v364_v27 }
 0x105   : > { %v3669_v43 = vpop.eup %3668  ;;  %1022 = vadd.xlane.f32.xlu1 %v824_v33  ;;  %v897_v47 = vpop.xlane.xlu1 %896  ;;  %3535 = vmatprep.subr.bf16.mxu1 %v5744_v3  ;;  %v1268_v61 = vmin.f32 %v3667_v40, 1e+08 }
 0x106   : > { %v1266_v54 = vmin.f32 %v3669_v43, 1e+08  ;;  %1110 = vadd.xlane.f32.xlu0 %v868_v36  ;;  %3514 = vmatpush3.bf16.xpose.msra.mxu0 %v356_v35  ;;  %3678 = vrsqrt.f32 %v897_v47  ;;  %v895_v55 = vpop.xlane.xlu0 %894  ;;  %v4631_v36 = vsub.s32 %v1570_v8, %v4563_v25  ;;  %v366_v43 = vpack.c.bf16 %v4621_v26, %v4619_v23  ;;  %v4636_v47 = vld [vmem:[#allocation2 + $0x3a0] sm:$0xff] }
 0x107   : > { %3680 = vrsqrt.f32 %v895_v55  ;;  %3515 = vmatprep.subr.bf16.mxu0 %v5744_v3  ;;  %v1539_v27 = vrot.slane %v1268_v61, %v4579_v41  ;;  %v1584_v55 = vadd.s32 4294967224, %v4551_v11  ;;  %v4642_v61 = vld [vmem:[#allocation2 + $0x258] sm:$0xff] }
 0x108   : > { %v3671_v2 = vpop.eup %3670  ;;  %v1527_v14 = vrot.slane %v1266_v54, %v4583_v42 }
 0x109   : > { %v3673_v5 = vpop.eup %3672  ;;  %v1269_v6 = vmin.f32 %v3671_v2, 1e+08  ;;  %1082 = vadd.xlane.f32.xlu1 %v854_v50  ;;  %v901_v9 = vpop.xlane.xlu1 %900 }
 0x10a   : > { %v1267_v17 = vmin.f32 %v3673_v5, 1e+08  ;;  %1052 = vadd.xlane.f32.xlu0 %v839_v56  ;;  %3682 = vrsqrt.f32 %v901_v9  ;;  %v899_v18 = vpop.xlane.xlu0 %898  ;;  %v1577_v5 = vadd.s32 4294967232, %v4551_v11 }
 0x10b   : > { %3684 = vrsqrt.f32 %v899_v18  ;;  %v1546_v33 = vrot.slane %v1269_v6, %v4586_v44  ;;  %v870_v6 = vmul.f32 %v4636_v47, %v4636_v47  ;;  %v4657_v18 = vld [vmem:[#allocation2 + $0x330] sm:$0xff] }
 0x10c   : > { %v3675_v32 = vpop.eup %3674  ;;  %v1532_v34 = vrot.slane %v1267_v17, %v4589_v45  ;;  %3536 = vmatpush3.bf16.xpose.msra.mxu1 %v365_v57  ;;  %v4640_v57 = vld [vmem:[#allocation2 + $0x250] sm:$0xff] }
 0x10d   : > { %v3677_v15 = vpop.eup %3676  ;;  %v1271_v35 = vmin.f32 %v3675_v32, 1e+08  ;;  %1024 = vadd.xlane.f32.xlu1 %v825_v0  ;;  %v905_v40 = vpop.xlane.xlu1 %904  ;;  %3537 = vmatprep.subr.bf16.mxu1 %v5744_v3  ;;  %v358_v17 = vpack.c.bf16 %v4642_v61, %v4640_v57  ;;  %v4661_v32 = vsub.s32 %v1584_v55, %v4563_v25 }
 0x10e   : > { %v1534_v50 = vsel %vm1533_vm1, %v1532_v34, %v1527_v14  ;;  %v1270_v54 = vmin.f32 %v3677_v15, 1e+08  ;;  %1112 = vadd.xlane.f32.xlu0 %v869_v4  ;;  %3516 = vmatpush3.bf16.xpose.msra.mxu0 %v357_v62  ;;  %3686 = vrsqrt.f32 %v905_v40  ;;  %v903_v56 = vpop.xlane.xlu0 %902 }
 0x10f   : > { %v1541_v63 = vsel %vm1540_vm2, %v1539_v27, %v1534_v50  ;;  %v1560_v0 = vrot.slane %v1271_v35, %v4611_v7  ;;  %3688 = vrsqrt.f32 %v903_v56  ;;  %3517 = vmatprep.subr.bf16.mxu0 %v5744_v3  ;;  %v4668_v50 = vsub.s32 %v1577_v5, %v4563_v25 }
 0x110   : > { %v3679_v2 = vpop.eup %3678  ;;  %v1548_v4 = vsel %vm1547_vm3, %v1546_v33, %v1541_v63  ;;  %v1553_v62 = vrot.slane %v1270_v54, %v4625_v28  ;;  %v1591_v54 = vadd.s32 4294967216, %v4551_v11  ;;  %v1612_v5 = vadd.s32 4294967192, %v4551_v11 }
 0x111   : > { %v3681_v8 = vpop.eup %3680  ;;  %v1273_v9 = vmin.f32 %v3679_v2, 1e+08  ;;  %1084 = vadd.xlane.f32.xlu1 %v855_v12  ;;  %v909_v14 = vpop.xlane.xlu1 %908  ;;  %v1598_v12 = vadd.s32 4294967208, %v4551_v11  ;;  %v4676_v2 = vld [vmem:[#allocation2 + $0x2e0] sm:$0xff] }
 0x112   : > { %v1555_v27 = vsel %vm1554_vm4, %v1553_v62, %v1548_v4  ;;  %v1272_v29 = vmin.f32 %v3681_v8, 1e+08  ;;  %1054 = vadd.xlane.f32.xlu0 %v840_v19  ;;  %3690 = vrsqrt.f32 %v909_v14  ;;  %v907_v33 = vpop.xlane.xlu0 %906  ;;  %v856_v19 = vmul.f32 %v4657_v18, %v4657_v18  ;;  %5781 = vst [vmem:[#allocation27_spill] sm:$0xff] %v4676_v2  ;;  %v4678_v4 = vld [vmem:[#allocation2 + $0x2e8] sm:$0xff] }
 0x113   : > { %v1574_v34 = vrot.slane %v1273_v9, %v4631_v36  ;;  %v1562_v15 = vsel %vm1561_vm5, %v1560_v0, %v1555_v27  ;;  %3692 = vrsqrt.f32 %v907_v33  ;;  %v841_v0 = vmul.f32 %v4558_v16, %v4558_v16  ;;  %5782 = vst [vmem:[#allocation28_spill] sm:$0xff] %v4678_v4  ;;  %v4684_v9 = vld [vmem:[#allocation2 + $0x260] sm:$0xff]  ;;  %v4686_v16 = vld [vmem:[#allocation2 + $0x268] sm:$0xff] }
 0x114   : > { %v3683_v35 = vpop.eup %3682  ;;  %v1567_v40 = vrot.slane %v1272_v29, %v4647_v52  ;;  %3538 = vmatpush3.bf16.xpose.msra.mxu1 %v366_v43  ;;  %v4691_v29 = vsub.s32 %v1598_v12, %v4563_v25  ;;  %v4696_v33 = vsub.s32 %v1591_v54, %v4563_v25  ;;  %v827_v12 = vmul.f32 %v4597_v53, %v4597_v53 }
 0x115   : > { %v3685_v55 = vpop.eup %3684  ;;  %v1275_v56 = vmin.f32 %v3683_v35, 1e+08  ;;  %1026 = vadd.xlane.f32.xlu1 %v826_v46  ;;  %v913_v63 = vpop.xlane.xlu1 %912  ;;  %3539 = vmatprep.subr.bf16.mxu1 %v5744_v3  ;;  %v4682_v46 = vld [vmem:[#allocation2 + $0x3a8] sm:$0xff]  ;;  %v367_v35 = vpack.c.bf16 %v4678_v4, %v4676_v2 }
 0x116   : > { %v1569_v43 = vsel %vm1568_vm6, %v1567_v40, %v1562_v15  ;;  %v1274_v62 = vmin.f32 %v3685_v55, 1e+08  ;;  %1114 = vadd.xlane.f32.xlu0 %v870_v6  ;;  %3518 = vmatpush3.bf16.xpose.msra.mxu0 %v358_v17  ;;  %3694 = vrsqrt.f32 %v913_v63  ;;  %v911_v8 = vpop.xlane.xlu0 %910  ;;  %5783 = vst [vmem:[#allocation29_spill] sm:$0xff] %v4691_v29  ;;  %5784 = vst [vmem:[#allocation30_spill] sm:$0xff] %v4696_v33  ;;  %v1605_v15 = vadd.s32 4294967200, %v4551_v11 }
 0x117   : > { %v1588_v14 = vrot.slane %v1275_v56, %v4661_v32  ;;  %v1576_v27 = vsel %vm1575_vm7, %v1574_v34, %v1569_v43  ;;  %3696 = vrsqrt.f32 %v911_v8  ;;  %3519 = vmatprep.subr.bf16.mxu0 %v5744_v3  ;;  %v871_v56 = vmul.f32 %v4682_v46, %v4682_v46 }
 0x118   : > { %v3687_v6 = vpop.eup %3686  ;;  %v1581_v17 = vrot.slane %v1274_v62, %v4668_v50  ;;  %v359_v63 = vpack.c.bf16 %v4686_v16, %v4684_v9  ;;  %v4709_v62 = vsub.s32 %v1612_v5, %v4563_v25  ;;  %v1626_v3 = vadd.s32 4294967176, %v4551_v11 }
 0x119   : > { %v3689_v40 = vpop.eup %3688  ;;  %v1277_v55 = vmin.f32 %v3687_v6, 1e+08  ;;  %1086 = vadd.xlane.f32.xlu1 %v856_v19  ;;  %v917_v34 = vpop.xlane.xlu1 %916  ;;  %v4711_v19 = vld [vmem:[#allocation2 + $0x338] sm:$0xff] }
 0x11a   : > { %v1583_v54 = vsel %vm1582_vm8, %v1581_v17, %v1576_v27  ;;  %v1276_v43 = vmin.f32 %v3689_v40, 1e+08  ;;  %5785 = vst [vmem:[#allocation31_spill] sm:$0xff] %v4709_v62  ;;  %1056 = vadd.xlane.f32.xlu0 %v841_v0  ;;  %3698 = vrsqrt.f32 %v917_v34  ;;  %v915_v8 = vpop.xlane.xlu0 %914  ;;  %v4718_v27 = vsub.s32 %v1605_v15, %v4563_v25  ;;  %v4724_v34 = vld [vmem:[#allocation2 + $0x2f0] sm:$0xff] }
 0x11b   : > { %v1602_v6 = vrot.slane %v1277_v55, %v4691_v29  ;;  %v1590_v53 = vsel %vm1589_vm9, %v1588_v14, %v1583_v54  ;;  %3700 = vrsqrt.f32 %v915_v8  ;;  %v1619_v0 = vadd.s32 4294967184, %v4551_v11  ;;  %5788 = vst [vmem:[#allocation33_spill] sm:$0xff] %v4724_v34  ;;  %v4726_v54 = vld [vmem:[#allocation2 + $0x2f8] sm:$0xff] }
 0x11c   : > { %v3691_v4 = vpop.eup %3690  ;;  %v1595_v31 = vrot.slane %v1276_v43, %v4696_v33  ;;  %5786 = vst [vmem:[#allocation32_spill] sm:$0xff] %v4718_v27  ;;  %3540 = vmatpush3.bf16.xpose.msra.mxu1 %v367_v35  ;;  %v857_v14 = vmul.f32 %v4711_v19, %v4711_v19  ;;  %v5787_v55 = vmov 0.0   ;;  %5789 = vst [vmem:[#allocation34_spill] sm:$0xff] %v4726_v54  ;;  %v4731_v35 = vld [vmem:[#allocation2 + $0x3b0] sm:$0xff]  ;;  %v4736_v2 = vsub.s32 %v1626_v3, %v4563_v25 }
 0x11d   : > { %v3693_v5 = vpop.eup %3692  ;;  %v1279_v17 = vmin.f32 %v3691_v4, 1e+08  ;;  %1028 = vadd.xlane.f32.xlu1 %v827_v12  ;;  %v921_v40 = vpop.xlane.xlu1 %920  ;;  %3541 = vmatprep.subr.bf16.mxu1 %v5787_v55  ;;  %v842_v4 = vmul.f32 %v4574_v38, %v4574_v38  ;;  %v4745_v38 = vsub.s32 %v1619_v0, %v4563_v25 }
 0x11e   : > { %v1597_v15 = vsel %vm1596_vm10, %v1595_v31, %v1590_v53  ;;  %v1278_v43 = vmin.f32 %v3693_v5, 1e+08  ;;  %1116 = vadd.xlane.f32.xlu0 %v871_v56  ;;  %3520 = vmatpush3.bf16.xpose.msra.mxu0 %v359_v63  ;;  %3702 = vrsqrt.f32 %v921_v40  ;;  %v919_v11 = vpop.xlane.xlu0 %918  ;;  %5790 = vst [vmem:[#allocation35_spill] sm:$0xff] %v4736_v2  ;;  %v4739_v31 = vld [vmem:[#allocation2 + $0x270] sm:$0xff]  ;;  %v4741_v56 = vld [vmem:[#allocation2 + $0x278] sm:$0xff]  ;;  %v368_v5 = vpack.c.bf16 %v4726_v54, %v4724_v34 }
 0x11f   : > { %v1616_v12 = vrot.slane %v1279_v17, %v4709_v62  ;;  %v1604_v8 = vsel %vm1603_vm11, %v1602_v6, %v1597_v15  ;;  %3704 = vrsqrt.f32 %v919_v11  ;;  %3521 = vmatprep.subr.bf16.mxu0 %v5787_v55  ;;  %5791 = vst [vmem:[#allocation36_spill] sm:$0xff] %v4745_v38  ;;  %v813_v40 = vmul.f32 %v4487_v13, %v4487_v13 }
 0x120   : > { %v3695_v63 = vpop.eup %3694  ;;  %v1609_v53 = vrot.slane %v1278_v43, %v4718_v27  ;;  %v872_v15 = vmul.f32 %v4731_v35, %v4731_v35  ;;  %v360_v25 = vpack.c.bf16 %v4741_v56, %v4739_v31 }
 0x121   : > { %v3697_v6 = vpop.eup %3696  ;;  %v1281_v3 = vmin.f32 %v3695_v63, 1e+08  ;;  %1088 = vadd.xlane.f32.xlu1 %v857_v14  ;;  %v925_v17 = vpop.xlane.xlu1 %924 }
 0x122   : > { %v1611_v11 = vsel %vm1610_vm12, %v1609_v53, %v1604_v8  ;;  %v1280_v43 = vmin.f32 %v3697_v6, 1e+08  ;;  %1058 = vadd.xlane.f32.xlu0 %v842_v4  ;;  %3706 = vrsqrt.f32 %v925_v17  ;;  %v923_v0 = vpop.xlane.xlu0 %922  ;;  %v843_v53 = vmul.f32 %v4576_v39, %v4576_v39  ;;  %v4764_v17 = vld [vmem:[#allocation2 + $0x3b8] sm:$0xff]  ;;  %v4769_v39 = vld [vmem:[#allocation2 + $0x340] sm:$0xff] }
 0x123   : > { %v1630_v54 = vrot.slane %v1281_v3, %v4736_v2  ;;  %3708 = vrsqrt.f32 %v923_v0  ;;  %v1618_v14 = vsel %vm1617_vm13, %v1616_v12, %v1611_v11  ;;  %v828_v3 = vmul.f32 %v4640_v57, %v4640_v57 }
 0x124   : > { %v3699_v63 = vpop.eup %3698  ;;  %v1623_v13 = vrot.slane %v1280_v43, %v4745_v38  ;;  %3542 = vmatpush3.bf16.xpose.msra.mxu1 %v368_v5  ;;  %v369_v43 = vpack.c.bf16 %v4516_v48, %v4519_v49 }
 0x125   : > { %v3701_v34 = vpop.eup %3700  ;;  %v1283_v8 = vmin.f32 %v3699_v63, 1e+08  ;;  %1000 = vadd.xlane.f32.xlu1 %v813_v40  ;;  %v929_v4 = vpop.xlane.xlu1 %928  ;;  %3567 = vmatprep.subr.bf16.mxu1 %v5787_v55  ;;  %v873_v63 = vmul.f32 %v4764_v17, %v4764_v17 }
 0x126   : > { %v1282_v6 = vmin.f32 %v3701_v34, 1e+08  ;;  %1118 = vadd.xlane.f32.xlu0 %v872_v15  ;;  %3522 = vmatpush3.bf16.xpose.msra.mxu0 %v360_v25  ;;  %3710 = vrsqrt.f32 %v929_v4  ;;  %v927_v12 = vpop.xlane.xlu0 %926  ;;  %v1625_v5 = vsel %vm1624_vm14, %v1623_v13, %v1618_v14  ;;  %v377_v15 = vpack.c.bf16 %v4544_v1, %v4532_v58 }
 0x127   : > { %v1640_v40 = vrot.slane %v1283_v8, %v4589_v45  ;;  %3712 = vrsqrt.f32 %v927_v12  ;;  %3547 = vmatprep.subr.bf16.mxu0 %v5787_v55  ;;  %v4772_v34 = vsel %vm1631_vm15, %v1630_v54, %v1625_v5  ;;  %v858_v58 = vmul.f32 %v4769_v39, %v4769_v39 }
 0x128   : > { %v3703_v25 = vpop.eup %3702  ;;  %v1636_v57 = vrot.slane %v1282_v6, %v4583_v42  ;;  %v829_v12 = vmul.f32 %v4642_v61, %v4642_v61 }
 0x129   : > { %v3705_v11 = vpop.eup %3704  ;;  %v1285_v0 = vmin.f32 %v3703_v25, 1e+08  ;;  %1060 = vadd.xlane.f32.xlu1 %v843_v53  ;;  %v933_v14 = vpop.xlane.xlu1 %932 }
 0x12a   : > { %v1641_v13 = vsel %vm1533_vm1, %v1640_v40, %v1636_v57  ;;  %v1284_v54 = vmin.f32 %v3705_v11, 1e+08  ;;  %1030 = vadd.xlane.f32.xlu0 %v828_v3  ;;  %3714 = vrsqrt.f32 %v933_v14  ;;  %v931_v8 = vpop.xlane.xlu0 %930  ;;  %v4793_v40 = vld [vmem:[#allocation2 + $0x348] sm:$0xff]  ;;  %v378_v11 = vpack.c.bf16 %v4595_v51, %v4561_v24 }
 0x12b   : > { %v1650_v1 = vrot.slane %v1285_v0, %v4586_v44  ;;  %3716 = vrsqrt.f32 %v931_v8  ;;  %3544 = vmatmul.mubr.bf16.vlgmr.msra.gmra.mrb[8].mxu1 %v4436_v22  ;;  %v844_v51 = vmul.f32 %v4619_v23, %v4619_v23 }
 0x12c   : > { %v3707_v48 = vpop.eup %3706  ;;  %v1645_v49 = vrot.slane %v1284_v54, %v4579_v41  ;;  %3568 = vmatpush3.bf16.xpose.msra.mxu1 %v377_v15  ;;  %3583 = vmatprep.mubr.msk.bf16.mxu1 %vm4238_vm0, %v5787_v55  ;;  %v814_v15 = vmul.f32 %v4494_v20, %v4494_v20  ;;  %v370_v20 = vpack.c.bf16 %v4549_v10, %v4534_v59  ;;  %v4815_v59 = vld [vmem:[#allocation2 + $0x3c0] sm:$0xff] }
 0x12d   : > { %v3709_v4 = vpop.eup %3708  ;;  %v1287_v53 = vmin.f32 %v3707_v48, 1e+08  ;;  %3524 = vmatmul.mubr.bf16.vlgmr.msra.gmra.mrb[8].mxu0 %v4436_v22  ;;  %1120 = vadd.xlane.f32.xlu1 %v873_v63  ;;  %v937_v6 = vpop.xlane.xlu1 %936 }
 0x12e   : > { %v1646_v3 = vsel %vm1540_vm2, %v1645_v49, %v1641_v13  ;;  %v1286_v5 = vmin.f32 %v3709_v4, 1e+08  ;;  %1090 = vadd.xlane.f32.xlu0 %v858_v58  ;;  %3548 = vmatpush3.bf16.xpose.msra.mxu0 %v369_v43  ;;  %3718 = vrsqrt.f32 %v937_v6  ;;  %v935_v25 = vpop.xlane.xlu0 %934  ;;  %v859_v13 = vmul.f32 %v4793_v40, %v4793_v40 }
 0x12f   : > { %v1660_v57 = vrot.slane %v1287_v53, %v4611_v7  ;;  %v1651_v22 = vsel %vm1547_vm3, %v1650_v1, %v1646_v3  ;;  %3720 = vrsqrt.f32 %v935_v25  ;;  %3549 = vmatprep.subr.bf16.mxu0 %v5787_v55  ;;  %3569 = vmatprep.subr.bf16.mxu1 %v5787_v55  ;;  %v815_v6 = vmul.f32 %v4496_v21, %v4496_v21 }
 0x130   : > { %v3711_v61 = vpop.eup %3710  ;;  %v1655_v43 = vrot.slane %v1286_v5, %v4625_v28  ;;  %3563 = vmatprep.mubr.msk.bf16.mxu0 %vm4238_vm0, %v5787_v55  ;;  %v874_v5 = vmul.f32 %v4815_v59, %v4815_v59  ;;  %v379_v21 = vpack.c.bf16 %v4682_v46, %v4636_v47  ;;  %v830_v47 = vmul.f32 %v4684_v9, %v4684_v9  ;;  %v314_v46 = vld [vmem:[#allocation2 + $0x3c8] sm:$0xff] }
 0x131   : > { %v3713_v0 = vpop.eup %3712  ;;  %v1289_v14 = vmin.f32 %v3711_v61, 1e+08  ;;  %1032 = vadd.xlane.f32.xlu1 %v829_v12  ;;  %v941_v63 = vpop.xlane.xlu1 %940  ;;  %vm2211_vm0 = vcmask 1041409  }
 0x132   : > { %v1656_v54 = vsel %vm1554_vm4, %v1655_v43, %v1651_v22  ;;  %v1288_v8 = vmin.f32 %v3713_v0, 1e+08  ;;  %1002 = vadd.xlane.f32.xlu0 %v814_v15  ;;  %3722 = vrsqrt.f32 %v941_v63  ;;  %v939_v24 = vpop.xlane.xlu0 %938  ;;  %v845_v43 = vmul.f32 %v4621_v26, %v4621_v26  ;;  %v4847_v26 = vld [vmem:[#allocation2 + $0x350] sm:$0xff] }
 0x133   : > { %v1670_v58 = vrot.slane %v1289_v14, %v4631_v36  ;;  %v1661_v1 = vsel %vm1561_vm5, %v1660_v57, %v1656_v54  ;;  %3724 = vrsqrt.f32 %v939_v24  ;;  %v371_v0 = vpack.c.bf16 %v4603_v60, %v4572_v37 }
 0x134   : > { %v3715_v10 = vpop.eup %3714  ;;  %v1665_v48 = vrot.slane %v1288_v8, %v4647_v52  ;;  %3570 = vmatpush3.bf16.xpose.msra.mxu1 %v378_v11 }
 0x135   : > { %v3717_v49 = vpop.eup %3716  ;;  %v1291_v4 = vmin.f32 %v3715_v10, 1e+08  ;;  %1092 = vadd.xlane.f32.xlu1 %v859_v13  ;;  %v4818_v53 = vpop.xlane.xlu1 %944  ;;  %3571 = vmatprep.subr.bf16.mxu1 %v5787_v55 }
 0x136   : > { %v1666_v23 = vsel %vm1568_vm6, %v1665_v48, %v1661_v1  ;;  %v1290_v12 = vmin.f32 %v3717_v49, 1e+08  ;;  %1062 = vadd.xlane.f32.xlu0 %v844_v51  ;;  %3550 = vmatpush3.bf16.xpose.msra.mxu0 %v370_v20  ;;  %v4824_v3 = vpop.xlane.xlu0 %942  ;;  %v860_v49 = vmul.f32 %v4847_v26, %v4847_v26 }
 0x137   : > { %v1680_v25 = vrot.slane %v1291_v4, %v4661_v32  ;;  %v1671_v15 = vsel %vm1575_vm7, %v1670_v58, %v1666_v23  ;;  %3551 = vmatprep.subr.bf16.mxu0 %v5787_v55  ;;  %v875_v58 = vmul.f32 %v314_v46, %v314_v46  ;;  %v380_v23 = vpack.c.bf16 %v4764_v17, %v4731_v35  ;;  %v300_v35 = vld [vmem:[#allocation2 + $0x358] sm:$0xff] }
 0x138   : > { %v3719_v57 = vpop.eup %3718  ;;  %v1675_v22 = vrot.slane %v1290_v12, %v4668_v50  ;;  %3726 = vrsqrt.f32 %v4824_v3 }
 0x139   : > { %v3721_v61 = vpop.eup %3720  ;;  %v1293_v11 = vmin.f32 %v3719_v57, 1e+08  ;;  %1004 = vadd.xlane.f32.xlu1 %v815_v6  ;;  %3728 = vrsqrt.f32 %v4818_v53 }
 0x13a   : > { %v1676_v20 = vsel %vm1582_vm8, %v1675_v22, %v1671_v15  ;;  %v1292_v14 = vmin.f32 %v3721_v61, 1e+08  ;;  %1122 = vadd.xlane.f32.xlu0 %v874_v5  ;;  %v4839_v63 = vpop.xlane.xlu1 %948  ;;  %v4841_v13 = vpop.xlane.xlu0 %946  ;;  %v831_v5 = vmul.f32 %v4686_v16, %v4686_v16  ;;  %v816_v22 = vmul.f32 %v4504_v30, %v4504_v30  ;;  %v5792_v61 = vld [vmem:[#allocation27_spill] sm:$0xff] }
 0x13b   : > { %v1690_v54 = vrot.slane %v1293_v11, %v4691_v29  ;;  %v1681_v8 = vsel %vm1589_vm9, %v1680_v25, %v1676_v20  ;;  %v372_v25 = vpack.c.bf16 %v4711_v19, %v4657_v18  ;;  %v861_v16 = vmul.f32 %v300_v35, %v300_v35  ;;  %v315_v30 = vld [vmem:[#allocation2 + $0x3d0] sm:$0xff] }
 0x13c   : > { %v3723_v24 = vpop.eup %3722  ;;  %v1685_v37 = vrot.slane %v1292_v14, %v4696_v33  ;;  %3572 = vmatpush3.bf16.xpose.msra.mxu1 %v379_v21  ;;  %v846_v11 = vmul.f32 %v5792_v61, %v5792_v61  ;;  %v373_v14 = vpack.c.bf16 %v4793_v40, %v4769_v39  ;;  %v832_v39 = vmul.f32 %v4739_v31, %v4739_v31  ;;  %v301_v40 = vld [vmem:[#allocation2 + $0x360] sm:$0xff] }
 0x13d   : > { %v3725_v60 = vpop.eup %3724  ;;  %v1295_v51 = vmin.f32 %v3723_v24, 1e+08  ;;  %1064 = vadd.xlane.f32.xlu1 %v845_v43  ;;  %3573 = vmatprep.subr.bf16.mxu1 %v5787_v55  ;;  %v381_v43 = vpack.c.bf16 %v314_v46, %v4815_v59  ;;  %v5794_v24 = vld [vmem:[#allocation28_spill] sm:$0xff]  ;;  %v317_v31 = vld [vmem:[#allocation2 + $0x3e0] sm:$0xff]  ;;  %3730 = vrsqrt.f32 %v4839_v63 }
 0x13e   : > { %v1686_v1 = vsel %vm1596_vm10, %v1685_v37, %v1681_v8  ;;  %v1294_v9 = vmin.f32 %v3725_v60, 1e+08  ;;  %1034 = vadd.xlane.f32.xlu0 %v830_v47  ;;  %3552 = vmatpush3.bf16.xpose.msra.mxu0 %v371_v0  ;;  %v4852_v10 = vpop.xlane.xlu1 %952  ;;  %v4854_v48 = vpop.xlane.xlu0 %950  ;;  %v5793_v0 = vld [vmem:[#allocation25_spill] sm:$0xff]  ;;  %v876_v8 = vmul.f32 %v315_v30, %v315_v30  ;;  %v847_v37 = vmul.f32 %v5794_v24, %v5794_v24  ;;  %v316_v59 = vld [vmem:[#allocation2 + $0x3d8] sm:$0xff]  ;;  %v5796_v24 = vld [vmem:[#allocation34_spill] sm:$0xff] }
 0x13f   : > { %v1700_v4 = vrot.slane %v1295_v51, %v4709_v62  ;;  %v1691_v6 = vsel %vm1603_vm11, %v1690_v54, %v1686_v1  ;;  %3553 = vmatprep.subr.bf16.mxu0 %v5787_v55  ;;  %v817_v20 = vmul.f32 %v5793_v0, %v5793_v0  ;;  %v382_v51 = vpack.c.bf16 %v316_v59, %v315_v30 }
 0x140   : > { %v1695_v12 = vrot.slane %v1294_v9, %v4718_v27  ;;  %3732 = vrsqrt.f32 %v4841_v13 }
 0x141   : > { %1124 = vadd.xlane.f32.xlu1 %v875_v58  ;;  %v877_v58 = vmul.f32 %v316_v59, %v316_v59  ;;  %v304_v59 = vld [vmem:[#allocation2 + $0x378] sm:$0xff]  ;;  %3734 = vrsqrt.f32 %v4854_v48 }
 0x142   : > { %v1696_v15 = vsel %vm1610_vm12, %v1695_v12, %v1691_v6  ;;  %1094 = vadd.xlane.f32.xlu0 %v860_v49  ;;  %v4869_v57 = vpop.xlane.xlu1 %956  ;;  %v4871_v21 = vpop.xlane.xlu0 %954  ;;  %v862_v49 = vmul.f32 %v301_v40, %v301_v40  ;;  %v5795_v6 = vld [vmem:[#allocation33_spill] sm:$0xff]  ;;  %v318_v12 = vld [vmem:[#allocation2 + $0x3e8] sm:$0xff]  ;;  %3736 = vrsqrt.f32 %v4852_v10 }
 0x143   : > { %v4876_v17 = vsel %vm1617_vm13, %v1700_v4, %v1696_v15  ;;  %v374_v4 = vpack.c.bf16 %v300_v35, %v4847_v26  ;;  %v833_v15 = vmul.f32 %v4741_v56, %v4741_v56  ;;  %v302_v26 = vld [vmem:[#allocation2 + $0x368] sm:$0xff]  ;;  %v878_v35 = vmul.f32 %v317_v31, %v317_v31  ;;  %v319_v56 = vld [vmem:[#allocation2 + $0x3f0] sm:$0xff] }
 0x144   : > { %3574 = vmatpush3.bf16.xpose.msra.mxu1 %v380_v23  ;;  %v848_v23 = vmul.f32 %v5795_v6, %v5795_v6  ;;  %v375_v30 = vpack.c.bf16 %v302_v26, %v301_v40  ;;  %v865_v40 = vmul.f32 %v304_v59, %v304_v59  ;;  %3738 = vrsqrt.f32 %v4871_v21 }
 0x145   : > { %1036 = vadd.xlane.f32.xlu1 %v831_v5  ;;  %3575 = vmatprep.subr.bf16.mxu1 %v5787_v55  ;;  %3740 = vrsqrt.f32 %v4869_v57 }
 0x146   : > { %1006 = vadd.xlane.f32.xlu0 %v816_v22  ;;  %3554 = vmatpush3.bf16.xpose.msra.mxu0 %v372_v25  ;;  %v4879_v18 = vpop.xlane.xlu1 %960  ;;  %v4881_v19 = vpop.xlane.xlu0 %958  ;;  %v383_v22 = vpack.c.bf16 %v318_v12, %v317_v31 }
 0x147   : > { %3555 = vmatprep.subr.bf16.mxu0 %v5787_v55  ;;  %3742 = vrsqrt.f32 %v4881_v19 }
 0x148   : > { %3744 = vrsqrt.f32 %v4879_v18 }
 0x149   : > { %1096 = vadd.xlane.f32.xlu1 %v861_v16 }
 0x14a   : > { %1066 = vadd.xlane.f32.xlu0 %v846_v11  ;;  %v4891_v47 = vpop.xlane.xlu1 %964  ;;  %v4893_v54 = vpop.xlane.xlu0 %962  ;;  %v863_v11 = vmul.f32 %v302_v26, %v302_v26 }
 0x14b   : > { %3746 = vrsqrt.f32 %v4893_v54 }
 0x14c   : > { %3576 = vmatpush3.bf16.xpose.msra.mxu1 %v381_v43  ;;  %v303_v43 = vld [vmem:[#allocation2 + $0x370] sm:$0xff] }
 0x14d   : > { %1008 = vadd.xlane.f32.xlu1 %v817_v20  ;;  %3577 = vmatprep.subr.bf16.mxu1 %v5787_v55  ;;  %v864_v0 = vmul.f32 %v303_v43, %v303_v43  ;;  %v320_v20 = vld [vmem:[#allocation2 + $0x3f8] sm:$0xff] }
 0x14e   : > { %1126 = vadd.xlane.f32.xlu0 %v876_v8  ;;  %3556 = vmatpush3.bf16.xpose.msra.mxu0 %v373_v14  ;;  %v4898_v46 = vpop.xlane.xlu1 %968  ;;  %v4900_v60 = vpop.xlane.xlu0 %966  ;;  %v881_v6 = vmul.f32 %v320_v20, %v320_v20 }
 0x14f   : > { %3557 = vmatprep.subr.bf16.mxu0 %v5787_v55 }
 0x151   : > { %1068 = vadd.xlane.f32.xlu1 %v847_v37  ;;  %v849_v37 = vmul.f32 %v5796_v24, %v5796_v24  ;;  %v3727_v24 = vpop.eup %3726 }
 0x152   : > { %1038 = vadd.xlane.f32.xlu0 %v832_v39  ;;  %v4905_v1 = vpop.xlane.xlu1 %972  ;;  %v4907_v9 = vpop.xlane.xlu0 %970  ;;  %v384_v39 = vpack.c.bf16 %v320_v20, %v319_v56  ;;  %v1296_v3 = vmin.f32 %v3727_v24, 1e+08 }
 0x154   : > { %3578 = vmatpush3.bf16.xpose.msra.mxu1 %v382_v51 }
 0x155   : > { %1128 = vadd.xlane.f32.xlu1 %v877_v58  ;;  %3579 = vmatprep.subr.bf16.mxu1 %v5787_v55 }
 0x156   : > { %1098 = vadd.xlane.f32.xlu0 %v862_v49  ;;  %3558 = vmatpush3.bf16.xpose.msra.mxu0 %v374_v4  ;;  %v4913_v5 = vpop.xlane.xlu1 %976  ;;  %v4915_v25 = vpop.xlane.xlu0 %974  ;;  %v879_v49 = vmul.f32 %v318_v12, %v318_v12  ;;  %v376_v4 = vpack.c.bf16 %v304_v59, %v303_v43  ;;  %v3940_v12 = vld [vmem:[%s5734_s2] sm:$0xf] }
 0x157   : > { %3559 = vmatprep.subr.bf16.mxu0 %v5787_v55 }
 0x159   : > { %1070 = vadd.xlane.f32.xlu1 %v848_v23 }
 0x15a   : > { %1040 = vadd.xlane.f32.xlu0 %v833_v15  ;;  %v4920_v16 = vpop.xlane.xlu1 %980  ;;  %v4922_v61 = vpop.xlane.xlu0 %978 }
 0x15b   : > { %3748 = vrsqrt.f32 %v4920_v16 }
 0x15c   : > { %3580 = vmatpush3.bf16.xpose.msra.mxu1 %v383_v22  ;;  %3750 = vrsqrt.f32 %v4922_v61 }
 0x15d   : > { %1130 = vadd.xlane.f32.xlu1 %v878_v35  ;;  %3581 = vmatprep.subr.bf16.mxu1 %v5787_v55  ;;  %3752 = vrsqrt.f32 %v4891_v47 }
 0x15e   : > { %1100 = vadd.xlane.f32.xlu0 %v863_v11  ;;  %3560 = vmatpush3.bf16.xpose.msra.mxu0 %v375_v30  ;;  %v4925_v14 = vpop.xlane.xlu1 %984  ;;  %v4927_v8 = vpop.xlane.xlu0 %982 }
 0x15f   : > { %3561 = vmatprep.subr.bf16.mxu0 %v5787_v55  ;;  %v880_v55 = vmul.f32 %v319_v56, %v319_v56  ;;  %3754 = vrsqrt.f32 %v4927_v8 }
 0x160   : > { %3756 = vrsqrt.f32 %v4900_v60 }
 0x161   : > { %1102 = vadd.xlane.f32.xlu1 %v864_v0  ;;  %3758 = vrsqrt.f32 %v4925_v14 }
 0x162   : > { %1072 = vadd.xlane.f32.xlu0 %v849_v37  ;;  %v4932_v51 = vpop.xlane.xlu1 %988  ;;  %v4934_v58 = vpop.xlane.xlu0 %986 }
 0x164   : > { %3582 = vmatpush3.bf16.xpose.msra.mxu1 %v384_v39  ;;  %v3729_v39 = vpop.eup %3728  ;;  %3760 = vrsqrt.f32 %v4898_v46 }
 0x165   : > { %1104 = vadd.xlane.f32.xlu1 %v865_v40 }
 0x166   : > { %1132 = vadd.xlane.f32.xlu0 %v879_v49  ;;  %3562 = vmatpush3.bf16.xpose.msra.mxu0 %v376_v4  ;;  %v4936_v23 = vpop.xlane.xlu1 %992  ;;  %v4938_v31 = vpop.xlane.xlu0 %990 }
 0x169   : > { %1136 = vadd.xlane.f32.xlu1 %v881_v6 }
 0x16a   : > { %1134 = vadd.xlane.f32.xlu0 %v880_v55  ;;  %v4940_v15 = vpop.xlane.xlu1 %996  ;;  %v4942_v26 = vpop.xlane.xlu0 %994 }
 0x16b   : > { %3584 = vmatmul.mubr.bf16.vlgmr.msra.gmra.mrb[12].mxu1 %v3940_v12 }
 0x16d   : > { %3564 = vmatmul.mubr.bf16.vlgmr.msra.gmra.mrb[12].mxu0 %v3940_v12 }
 0x16e   : > { %v4947_v22 = vpop.xlane.xlu1 %1010  ;;  %v4949_v35 = vpop.xlane.xlu0 %998 }
 0x16f   : > { %5797 = vst [vmem:[#allocation27_spill] sm:$0xff] %v4949_v35  ;;  %v1297_v35 = vmin.f32 %v3729_v39, 1e+08 }
 0x171   : > { %v1710_v33 = vrot.slane %v1297_v35, %v4736_v2 }
 0x172   : > { %v4952_v11 = vpop.xlane.xlu1 %1014  ;;  %v4954_v30 = vpop.xlane.xlu0 %1012 }
 0x173   : > { %5798 = vst [vmem:[#allocation25_spill] sm:$0xff] %v4952_v11 }
 0x176   : > { %v4957_v43 = vpop.xlane.xlu1 %1044  ;;  %v4959_v0 = vpop.xlane.xlu0 %1042 }
 0x177   : > { %5799 = vst [vmem:[#allocation28_spill] sm:$0xff] %v4957_v43  ;;  %5800 = vst [vmem:[#allocation33_spill] sm:$0xff] %v4959_v0 }
 0x17a   : > { %v4961_v56 = vpop.xlane.xlu1 %1046 }
 0x17b   : > { %5801 = vst [vmem:[#allocation34_spill] sm:$0xff] %v4961_v56  ;;  %v4963_v20 = vpop.xlane.xlu0 %1016 }
 0x17c   : > { %5802 = vst [vmem:[#allocation37_spill] sm:$0xff] %v4963_v20 }
 0x17e   : > { %v4965_v37 = vpop.xlane.xlu1 %1076  ;;  %v460_v59 = vpop.f32.mrb[0].mxu1 }
 0x17f   : > { %5803 = vst [vmem:[#allocation38_spill] sm:$0xff] %v4965_v37  ;;  %v4967_v40 = vpop.xlane.xlu0 %1074  ;;  %v420_v49 = vpop.f32.mrb[0].mxu0  ;;  %v712_v4 = vrot.slane %v460_v59, 4  ;;  %v1705_v37 = vrot.slane %v1296_v3, %v4745_v38 }
 0x180   : > { %5804 = vst [vmem:[#allocation39_spill] sm:$0xff] %v4967_v40  ;;  %v706_v6 = vrot.slane %v420_v49, 4  ;;  %v3445_v53 = vpop.f32.mrb[1].mxu0  ;;  %v3465_v55 = vpop.f32.mrb[1].mxu1 }
 0x181   : > { %v713_v12 = vmax.f32 %v460_v59, %v712_v4  ;;  %v423_v62 = vpop.f32.mrb[2].mxu0  ;;  %v463_v27 = vpop.f32.mrb[2].mxu1 }
 0x182   : > { %v707_v56 = vmax.f32 %v420_v49, %v706_v6  ;;  %v3466_v29 = vpop.f32.mrb[3].mxu1  ;;  %v4969_v20 = vpop.xlane.xlu1 %1048  ;;  %v1706_v62 = vsel %vm1624_vm14, %v1705_v37, %v4876_v17 }
 0x183   : > { %v714_v0 = vrot.slane %v713_v12, 2  ;;  %v4972_v43 = vpop.xlane.xlu0 %1018  ;;  %v3446_v24 = vpop.f32.mrb[3].mxu0  ;;  %v1711_v49 = vsel %vm1631_vm15, %v1710_v33, %v1706_v62 }
 0x184   : > { %v708_v40 = vrot.slane %v707_v56, 2 }
 0x185   : > { %v715_v11 = vmax.f32 %v713_v12, %v714_v0 }
 0x186   : > { %v709_v53 = vmax.f32 %v707_v56, %v708_v40  ;;  %v4979_v39 = vpop.xlane.xlu1 %1106 }
 0x187   : > { %v716_v55 = vrot.slane %v715_v11, 1  ;;  %v4977_v27 = vpop.xlane.xlu0 %1078 }
 0x188   : > { %v710_v29 = vrot.slane %v709_v53, 1 }
 0x189   : > { %v717_v59 = vmax.f32 %v715_v11, %v716_v55 }
 0x18a   : > { %v711_v3 = vmax.f32 %v709_v53, %v710_v29  ;;  %v4989_v56 = vpop.xlane.xlu1 %1020 }
 0x18b   : > { %v4982_v4 = vmul.f32 %v1711_v49, %v717_v59  ;;  %v4987_v35 = vpop.xlane.xlu0 %1108 }
 0x18c   : > { %v4985_v0 = vmul.f32 %v4772_v34, %v711_v3 }
 0x18d   : > { %5805 = vst [vmem:[#allocation40_spill] sm:$0xff] %v4982_v4 }
 0x18e   : > { %5806 = vst [vmem:[#allocation41_spill] sm:$0xff] %v4985_v0  ;;  %v4993_v17 = vpop.xlane.xlu1 %1080 }
 0x18f   : > { %v4991_v40 = vpop.xlane.xlu0 %1050 }
 0x192   : > { %v4997_v11 = vpop.xlane.xlu1 %1022 }
 0x193   : > { %v4995_v37 = vpop.xlane.xlu0 %1110 }
 0x196   : > { %v5001_v33 = vpop.xlane.xlu1 %1082 }
 0x197   : > { %v4999_v6 = vpop.xlane.xlu0 %1052 }
 0x19a   : > { %v5005_v34 = vpop.xlane.xlu1 %1024 }
 0x19b   : > { %v5003_v12 = vpop.xlane.xlu0 %1112 }
 0x19c   : > { %5807 = vst [vmem:[#allocation42_spill] sm:$0xff] %v5003_v12 }
 0x19e   : > { %v5009_v53 = vpop.xlane.xlu1 %1084 }
 0x19f   : > { %v5007_v24 = vpop.xlane.xlu0 %1054  ;;  %5809 = vst [vmem:[#allocation44_spill] sm:$0xff] %v5009_v53 }
 0x1a0   : > { %5808 = vst [vmem:[#allocation43_spill] sm:$0xff] %v5007_v24 }
 0x1a2   : > { %v5013_v62 = vpop.xlane.xlu1 %1026 }
 0x1a3   : > { %v5011_v55 = vpop.xlane.xlu0 %1114  ;;  %5811 = vst [vmem:[#allocation46_spill] sm:$0xff] %v5013_v62 }
 0x1a4   : > { %5810 = vst [vmem:[#allocation45_spill] sm:$0xff] %v5011_v55 }
 0x1a6   : > { %v5017_v59 = vpop.xlane.xlu1 %1086 }
 0x1a7   : > { %v5015_v29 = vpop.xlane.xlu0 %1056  ;;  %5813 = vst [vmem:[#allocation48_spill] sm:$0xff] %v5017_v59 }
 0x1a8   : > { %5812 = vst [vmem:[#allocation47_spill] sm:$0xff] %v5015_v29 }
 0x1aa   : > { %v5023_v0 = vpop.xlane.xlu1 %1028 }
 0x1ab   : > { %v5019_v3 = vpop.xlane.xlu0 %1116 }
 0x1ac   : > { %5814 = vst [vmem:[#allocation49_spill] sm:$0xff] %v5019_v3 }
 0x1ae   : > { %v5032_v3 = vpop.xlane.xlu1 %1088 }
 0x1af   : > { %v5029_v29 = vpop.xlane.xlu0 %1058 }
 0x1be   : > { %v5021_v49 = vpop.f32.mrb[4].mxu1 }
 0x1bf   : > { %5815 = vst [vmem:[#allocation50_spill] sm:$0xff] %v5021_v49  ;;  %v3505_v4 = vpop.f32.mrb[5].mxu1  ;;  %v3731_v49 = vpop.eup %3730  ;;  %3762 = vrsqrt.f32 %v4934_v58 }
 0x1c0   : > { %v5025_v12 = vpop.f32.mrb[4].mxu0  ;;  %v543_v24 = vpop.f32.mrb[6].mxu1 }
 0x1c1   : > { %5816 = vst [vmem:[#allocation51_spill] sm:$0xff] %v5025_v12  ;;  %v3485_v53 = vpop.f32.mrb[5].mxu0  ;;  %v3506_v55 = vpop.f32.mrb[7].mxu1 }
 0x1c2   : > { %v503_v62 = vpop.f32.mrb[6].mxu0  ;;  %v5035_v4 = vpop.xlane.xlu0 %1118  ;;  %v1299_v53 = vmin.f32 %v3731_v49, 1e+08 }
 0x1c3   : > { %v3486_v59 = vpop.f32.mrb[7].mxu0  ;;  %5817 = vst [vmem:[#allocation52_spill] sm:$0xff] %v5035_v4  ;;  %v3733_v63 = vpop.eup %3732  ;;  %3764 = vrsqrt.f32 %v4907_v9 }
 0x1c4   : > { %v5038_v24 = vpop.xlane.xlu1 %1000  ;;  %v3735_v13 = vpop.eup %3734  ;;  %v1298_v55 = vmin.f32 %v3733_v63, 1e+08  ;;  %v1719_v12 = vrot.slane %v1299_v53, %v4589_v45  ;;  %3766 = vrsqrt.f32 %v4932_v51 }
 0x1c5   : > { %5818 = vst [vmem:[#allocation53_spill] sm:$0xff] %v5038_v24  ;;  %v3737_v48 = vpop.eup %3736  ;;  %v1300_v59 = vmin.f32 %v3735_v13, 1e+08  ;;  %3768 = vrsqrt.f32 %v4905_v1 }
 0x1c6   : > { %v5041_v62 = vpop.xlane.xlu0 %1030  ;;  %v1715_v21 = vrot.slane %v1298_v55, %v4583_v42  ;;  %v3739_v4 = vpop.eup %3738  ;;  %v1301_v24 = vmin.f32 %v3737_v48, 1e+08  ;;  %3770 = vrsqrt.f32 %v4913_v5 }
 0x1c7   : > { %v1724_v49 = vrot.slane %v1300_v59, %v4579_v41  ;;  %v3741_v63 = vpop.eup %3740  ;;  %v1302_v13 = vmin.f32 %v3739_v4, 1e+08  ;;  %3772 = vrsqrt.f32 %v4938_v31 }
 0x1c8   : > { %v5044_v10 = vpop.xlane.xlu1 %1060  ;;  %v1720_v19 = vsel %vm1533_vm1, %v1719_v12, %v1715_v21  ;;  %v1729_v18 = vrot.slane %v1301_v24, %v4586_v44  ;;  %v3743_v48 = vpop.eup %3742  ;;  %v1303_v59 = vmin.f32 %v3741_v63, 1e+08  ;;  %3774 = vrsqrt.f32 %v4915_v25 }
 0x1c9   : > { %v1725_v55 = vsel %vm1540_vm2, %v1724_v49, %v1720_v19  ;;  %v1734_v16 = vrot.slane %v1302_v13, %v4625_v28  ;;  %v3745_v61 = vpop.eup %3744  ;;  %v1304_v4 = vmin.f32 %v3743_v48, 1e+08  ;;  %3776 = vrsqrt.f32 %v4936_v23 }
 0x1ca   : > { %v5049_v57 = vpop.xlane.xlu0 %1090  ;;  %v1730_v12 = vsel %vm1547_vm3, %v1729_v18, %v1725_v55  ;;  %v1739_v47 = vrot.slane %v1303_v59, %v4611_v7  ;;  %v3747_v21 = vpop.eup %3746  ;;  %v1305_v19 = vmin.f32 %v3745_v61, 1e+08  ;;  %3778 = vrsqrt.f32 %v4940_v15 }
 0x1cb   : > { %v1735_v49 = vsel %vm1554_vm4, %v1734_v16, %v1730_v12  ;;  %v3749_v8 = vpop.eup %3748  ;;  %v1744_v13 = vrot.slane %v1304_v4, %v4647_v52  ;;  %v1306_v55 = vmin.f32 %v3747_v21, 1e+08  ;;  %3780 = vrsqrt.f32 %v4942_v26 }
 0x1cc   : > { %v5056_v53 = vpop.xlane.xlu1 %1120  ;;  %v3751_v60 = vpop.eup %3750  ;;  %v1740_v14 = vsel %vm1561_vm5, %v1739_v47, %v1735_v49  ;;  %v1749_v59 = vrot.slane %v1305_v19, %v4631_v36  ;;  %v1315_v58 = vmin.f32 %v3749_v8, 1e+08  ;;  %3782 = vrsqrt.f32 %v4947_v22  ;;  %v5822_v22 = vld [vmem:[#allocation28_spill] sm:$0xff] }
 0x1cd   : > { %v3753_v18 = vpop.eup %3752  ;;  %v1314_v16 = vmin.f32 %v3751_v60, 1e+08  ;;  %v1745_v12 = vsel %vm1568_vm6, %v1744_v13, %v1740_v14  ;;  %v1754_v47 = vrot.slane %v1306_v55, %v4668_v50  ;;  %3784 = vrsqrt.f32 %v4954_v30 }
 0x1ce   : > { %v5062_v54 = vpop.xlane.xlu0 %1002  ;;  %v3755_v46 = vpop.eup %3754  ;;  %v1307_v4 = vmin.f32 %v3753_v18, 1e+08  ;;  %v1750_v1 = vsel %vm1575_vm7, %v1749_v59, %v1745_v12  ;;  %v1798_v49 = vrot.slane %v1315_v58, %v4589_v45  ;;  %v5820_v58 = vld [vmem:[#allocation30_spill] sm:$0xff] }
 0x1cf   : > { %v3757_v61 = vpop.eup %3756  ;;  %v1316_v21 = vmin.f32 %v3755_v46, 1e+08  ;;  %v1794_v8 = vrot.slane %v1314_v16, %v4583_v42  ;;  %v1755_v25 = vsel %vm1582_vm8, %v1754_v47, %v1750_v1  ;;  %v5823_v1 = vld [vmem:[#allocation33_spill] sm:$0xff] }
 0x1d0   : > { %v5068_v24 = vpop.xlane.xlu1 %1032  ;;  %v3759_v51 = vpop.eup %3758  ;;  %v1308_v19 = vmin.f32 %v3757_v61, 1e+08  ;;  %v1759_v13 = vrot.slane %v1307_v4, %v4661_v32  ;;  %v5821_v61 = vld [vmem:[#allocation25_spill] sm:$0xff] }
 0x1d1   : > { %v3761_v5 = vpop.eup %3760  ;;  %v1317_v14 = vmin.f32 %v3759_v51, 1e+08  ;;  %v1803_v18 = vrot.slane %v1316_v21, %v4579_v41  ;;  %v1799_v46 = vsel %vm1533_vm1, %v1798_v49, %v1794_v8  ;;  %3786 = vrsqrt.f32 %v5821_v61  ;;  %v5826_v61 = vld [vmem:[#allocation27_spill] sm:$0xff] }
 0x1d2   : > { %v5074_v63 = vpop.xlane.xlu0 %1062  ;;  %v3763_v60 = vpop.eup %3762  ;;  %v1309_v23 = vmin.f32 %v3761_v5, 1e+08  ;;  %v1764_v16 = vrot.slane %v1308_v19, %v5820_v58  ;;  %v1760_v4 = vsel %vm1589_vm9, %v1759_v13, %v1755_v25  ;;  %3788 = vrsqrt.f32 %v5822_v22  ;;  %v5825_v5 = vld [vmem:[#allocation29_spill] sm:$0xff]  ;;  %v5827_v22 = vld [vmem:[#allocation34_spill] sm:$0xff] }
 0x1d3   : > { %v3765_v55 = vpop.eup %3764  ;;  %v1318_v12 = vmin.f32 %v3763_v60, 1e+08  ;;  %v1808_v51 = vrot.slane %v1317_v14, %v4586_v44  ;;  %v1804_v30 = vsel %vm1540_vm2, %v1803_v18, %v1799_v46  ;;  %3790 = vrsqrt.f32 %v5823_v1  ;;  %v5828_v46 = vld [vmem:[#allocation37_spill] sm:$0xff] }
 0x1d4   : > { %v5080_v48 = vpop.xlane.xlu1 %1092  ;;  %v3767_v59 = vpop.eup %3766  ;;  %v1310_v21 = vmin.f32 %v3765_v55, 1e+08  ;;  %v1769_v19 = vrot.slane %v1309_v23, %v5825_v5  ;;  %3792 = vrsqrt.f32 %v5826_v61  ;;  %v1765_v14 = vsel %vm1596_vm10, %v1764_v16, %v1760_v4  ;;  %v5830_v23 = vld [vmem:[#allocation32_spill] sm:$0xff]  ;;  %v5831_v5 = vld [vmem:[#allocation38_spill] sm:$0xff] }
 0x1d5   : > { %v3769_v26 = vpop.eup %3768  ;;  %v1319_v60 = vmin.f32 %v3767_v59, 1e+08  ;;  %v1813_v25 = vrot.slane %v1318_v12, %v4625_v28  ;;  %3794 = vrsqrt.f32 %v5827_v22  ;;  %v1809_v18 = vsel %vm1547_vm3, %v1808_v51, %v1804_v30  ;;  %v5832_v22 = vld [vmem:[#allocation39_spill] sm:$0xff] }
 0x1d6   : > { %v5087_v9 = vpop.xlane.xlu0 %1122  ;;  %v5112_v47 = vpop.eup %3770  ;;  %3796 = vrsqrt.f32 %v5828_v46  ;;  %v1774_v59 = vrot.slane %v1310_v21, %v5830_v23  ;;  %v1770_v12 = vsel %vm1603_vm11, %v1769_v19, %v1765_v14 }
 0x1d7   : > { %v3773_v8 = vpop.eup %3772  ;;  %3798 = vrsqrt.f32 %v5831_v5  ;;  %v1818_v4 = vrot.slane %v1319_v60, %v4611_v7  ;;  %v1814_v51 = vsel %vm1554_vm4, %v1813_v25, %v1809_v18 }
 0x1d8   : > { %v5096_v31 = vpop.xlane.xlu1 %1004  ;;  %v3775_v13 = vpop.eup %3774  ;;  %v1320_v61 = vmin.f32 %v3773_v8, 1e+08  ;;  %3800 = vrsqrt.f32 %v5832_v22  ;;  %v1775_v19 = vsel %vm1610_vm12, %v1774_v59, %v1770_v12 }
 0x1d9   : > { %v3777_v55 = vpop.eup %3776  ;;  %3802 = vrsqrt.f32 %v4969_v20  ;;  %v1312_v8 = vmin.f32 %v3775_v13, 1e+08  ;;  %v1819_v25 = vsel %vm1561_vm5, %v1818_v4, %v1814_v51 }
 0x1da   : > { %v5105_v15 = vpop.xlane.xlu0 %1034  ;;  %v1321_v23 = vmin.f32 %v3777_v55, 1e+08  ;;  %3804 = vrsqrt.f32 %v4972_v43  ;;  %v1823_v60 = vrot.slane %v1320_v61, %v4647_v52 }
 0x1db   : > { %5819 = vst [vmem:[#allocation54_spill] sm:$0xff] %v5105_v15  ;;  %v1311_v15 = vmin.f32 %v3769_v26, 1e+08  ;;  %3806 = vrsqrt.f32 %v4979_v39  ;;  %v1784_v59 = vrot.slane %v1312_v8, %v4745_v38 }
 0x1dc   : > { %v5116_v49 = vpop.xlane.xlu1 %1064  ;;  %3808 = vrsqrt.f32 %v4977_v27  ;;  %v1828_v39 = vrot.slane %v1321_v23, %v4631_v36  ;;  %v1824_v12 = vsel %vm1568_vm6, %v1823_v60, %v1819_v25 }
 0x1dd   : > { %5824 = vst [vmem:[#allocation30_spill] sm:$0xff] %v5116_v49  ;;  %v5127_v49 = vpop.eup %3778  ;;  %3810 = vrsqrt.f32 %v4989_v56 }
 0x1de   : > { %v5125_v1 = vpop.xlane.xlu0 %1094  ;;  %v3781_v16 = vpop.eup %3780  ;;  %3812 = vrsqrt.f32 %v4987_v35 }
 0x1df   : > { %5829 = vst [vmem:[#allocation25_spill] sm:$0xff] %v5125_v1  ;;  %v3783_v26 = vpop.eup %3782  ;;  %v5833_v1 = vld [vmem:[#allocation31_spill] sm:$0xff]  ;;  %v1322_v4 = vmin.f32 %v3781_v16, 1e+08  ;;  %3814 = vrsqrt.f32 %v4993_v17  ;;  %v1323_v17 = vmin.f32 %v5127_v49, 1e+08 }
 0x1e0   : > { %v5136_v30 = vpop.xlane.xlu1 %1124  ;;  %v3785_v46 = vpop.eup %3784  ;;  %v1779_v21 = vrot.slane %v1311_v15, %v5833_v1  ;;  %v1313_v15 = vmin.f32 %v5112_v47, 1e+08  ;;  %v1330_v13 = vmin.f32 %v3783_v26, 1e+08  ;;  %3816 = vrsqrt.f32 %v4991_v40  ;;  %v5841_v1 = vld [vmem:[#allocation47_spill] sm:$0xff] }
 0x1e1   : > { %v3787_v5 = vpop.eup %3786  ;;  %v1331_v55 = vmin.f32 %v3785_v46, 1e+08  ;;  %3818 = vrsqrt.f32 %v4997_v11  ;;  %v1833_v25 = vrot.slane %v1322_v4, %v4668_v50 }
 0x1e2   : > { %v3789_v14 = vpop.eup %3788  ;;  %v5145_v20 = vpop.xlane.xlu0 %1006  ;;  %v1780_v61 = vsel %vm1617_vm13, %v1779_v21, %v1775_v19  ;;  %v1332_v22 = vmin.f32 %v3787_v5, 1e+08  ;;  %v1789_v23 = vrot.slane %v1313_v15, %v4736_v2  ;;  %v1873_v35 = vrot.slane %v1330_v13, %v4583_v42 }
 0x1e3   : > { %v3791_v18 = vpop.eup %3790  ;;  %v1347_v26 = vmin.f32 %v3789_v14, 1e+08  ;;  %v1877_v21 = vrot.slane %v1331_v55, %v4589_v45  ;;  %v1829_v5 = vsel %vm1575_vm7, %v1828_v39, %v1824_v12  ;;  %3820 = vrsqrt.f32 %v4995_v37 }
 0x1e4   : > { %v5149_v43 = vpop.eup %3792  ;;  %v5157_v47 = vpop.xlane.xlu1 %1036  ;;  %v1346_v51 = vmin.f32 %v3791_v18, 1e+08  ;;  %v1785_v40 = vsel %vm1624_vm14, %v1784_v59, %v1780_v61  ;;  %v1882_v11 = vrot.slane %v1332_v22, %v4579_v41  ;;  %3822 = vrsqrt.f32 %v5001_v33 }
 0x1e5   : > { %v3795_v27 = vpop.eup %3794  ;;  %v1956_v37 = vrot.slane %v1347_v26, %v4589_v45  ;;  %3824 = vrsqrt.f32 %v4999_v6  ;;  %v1878_v4 = vsel %vm1533_vm1, %v1877_v21, %v1873_v35  ;;  %v1838_v26 = vrot.slane %v1323_v17, %v4661_v32 }
 0x1e6   : > { %v3797_v56 = vpop.eup %3796  ;;  %v5170_v19 = vpop.xlane.xlu0 %1066  ;;  %v1348_v18 = vmin.f32 %v3795_v27, 1e+08  ;;  %v1952_v55 = vrot.slane %v1346_v51, %v4583_v42  ;;  %3826 = vrsqrt.f32 %v5005_v34  ;;  %v1324_v6 = vmin.f32 %v5149_v43, 1e+08 }
 0x1e7   : > { %v3799_v46 = vpop.eup %3798  ;;  %v1333_v59 = vmin.f32 %v3797_v56, 1e+08  ;;  %v1834_v56 = vsel %vm1582_vm8, %v1833_v25, %v1829_v5  ;;  %v5191_v35 = vsel %vm1631_vm15, %v1789_v23, %v1785_v40  ;;  %v1883_v21 = vsel %vm1540_vm2, %v1882_v11, %v1878_v4 }
 0x1e8   : > { %v3801_v8 = vpop.eup %3800  ;;  %v1363_v22 = vmin.f32 %v3799_v46, 1e+08  ;;  %v5184_v33 = vpop.xlane.xlu1 %1096  ;;  %v1957_v34 = vsel %vm1533_vm1, %v1956_v37, %v1952_v55  ;;  %v1839_v40 = vsel %vm1589_vm9, %v1838_v26, %v1834_v56  ;;  %v5837_v55 = vld [vmem:[#allocation43_spill] sm:$0xff]  ;;  %v1843_v4 = vrot.slane %v1324_v6, %v5820_v58  ;;  %v5839_v56 = vld [vmem:[#allocation45_spill] sm:$0xff] }
 0x1e9   : > { %v5172_v14 = vpop.eup %3802  ;;  %v1362_v27 = vmin.f32 %v3801_v8, 1e+08  ;;  %v1887_v8 = vrot.slane %v1333_v59, %v4586_v44 }
 0x1ea   : > { %v3805_v13 = vpop.eup %3804  ;;  %v2035_v5 = vrot.slane %v1363_v22, %v4589_v45  ;;  %v1349_v37 = vmin.f32 %v5172_v14, 1e+08  ;;  %v5838_v22 = vld [vmem:[#allocation46_spill] sm:$0xff] }
 0x1eb   : > { %v3807_v12 = vpop.eup %3806  ;;  %v2031_v43 = vrot.slane %v1362_v27, %v4583_v42  ;;  %v1334_v25 = vmin.f32 %v3805_v13, 1e+08 }
 0x1ec   : > { %v5208_v27 = vpop.xlane.xlu1 %1008 }
 0x1fe   : > { %v5164_v16 = vpop.f32.mrb[8].mxu1 }
 0x1ff   : > { %5834 = vst [vmem:[#allocation28_spill] sm:$0xff] %v5164_v16  ;;  %v3545_v60 = vpop.f32.mrb[9].mxu1  ;;  %v5840_v16 = vld [vmem:[#allocation48_spill] sm:$0xff] }
 0x200   : > { %v5177_v15 = vpop.f32.mrb[8].mxu0  ;;  %v623_v49 = vpop.f32.mrb[10].mxu1 }
 0x201   : > { %v3525_v39 = vpop.f32.mrb[9].mxu0  ;;  %v3546_v61 = vpop.f32.mrb[11].mxu1 }
 0x202   : > { %v583_v60 = vpop.f32.mrb[10].mxu0  ;;  %v3809_v49 = vpop.eup %3808  ;;  %v1961_v39 = vrot.slane %v1348_v18, %v4579_v41  ;;  %v5835_v61 = vld [vmem:[#allocation42_spill] sm:$0xff]  ;;  %v5836_v18 = vld [vmem:[#allocation44_spill] sm:$0xff] }
 0x203   : > { %v3526_v2 = vpop.f32.mrb[11].mxu0  ;;  %v3811_v51 = vpop.eup %3810  ;;  %3828 = vrsqrt.f32 %v5835_v61  ;;  %v1364_v11 = vmin.f32 %v3809_v49, 1e+08  ;;  %v1378_v61 = vmin.f32 %v3807_v12, 1e+08  ;;  %v2036_v49 = vsel %vm1533_vm1, %v2035_v5, %v2031_v43 }
 0x204   : > { %v3813_v46 = vpop.eup %3812  ;;  %v5197_v2 = vpop.xlane.xlu0 %1126  ;;  %3830 = vrsqrt.f32 %v5836_v18  ;;  %v1962_v60 = vsel %vm1540_vm2, %v1961_v39, %v1957_v34  ;;  %v1888_v18 = vsel %vm1547_vm3, %v1887_v8, %v1883_v21  ;;  %v1335_v38 = vmin.f32 %v3811_v51, 1e+08 }
 0x205   : > { %v3815_v17 = vpop.eup %3814  ;;  %3832 = vrsqrt.f32 %v5837_v55  ;;  %v1379_v26 = vmin.f32 %v3813_v46, 1e+08  ;;  %v1892_v55 = vrot.slane %v1334_v25, %v4625_v28  ;;  %v1966_v39 = vrot.slane %v1349_v37, %v4586_v44  ;;  %v5842_v25 = vld [vmem:[#allocation49_spill] sm:$0xff] }
 0x206   : > { %v3817_v23 = vpop.eup %3816  ;;  %3834 = vrsqrt.f32 %v5838_v22  ;;  %v1365_v6 = vmin.f32 %v3815_v17, 1e+08  ;;  %v2040_v34 = vrot.slane %v1364_v11, %v4579_v41  ;;  %v2110_v21 = vrot.slane %v1378_v61, %v4583_v42  ;;  %v5228_v11 = vpop.xlane.xlu1 %1068 }
 0x207   : > { %v3819_v59 = vpop.eup %3818  ;;  %3836 = vrsqrt.f32 %v5839_v56  ;;  %v1350_v22 = vmin.f32 %v3817_v23, 1e+08  ;;  %v1897_v17 = vrot.slane %v1335_v38, %v4611_v7  ;;  %v1893_v23 = vsel %vm1554_vm4, %v1892_v55, %v1888_v18  ;;  %v5843_v55 = vld [vmem:[#allocation53_spill] sm:$0xff] }
 0x208   : > { %v3821_v13 = vpop.eup %3820  ;;  %3838 = vrsqrt.f32 %v5840_v16  ;;  %v5218_v51 = vpop.xlane.xlu0 %1038  ;;  %v1336_v8 = vmin.f32 %v3819_v59, 1e+08  ;;  %v2114_v16 = vrot.slane %v1379_v26, %v4589_v45  ;;  %v2041_v59 = vsel %vm1540_vm2, %v2040_v34, %v2036_v49 }
 0x209   : > { %v3823_v14 = vpop.eup %3822  ;;  %3840 = vrsqrt.f32 %v5841_v1  ;;  %v1380_v5 = vmin.f32 %v3821_v13, 1e+08  ;;  %v2045_v1 = vrot.slane %v1365_v6, %v4586_v44  ;;  %v5234_v61 = vsel %vm1596_vm10, %v1843_v4, %v1839_v40  ;;  %v5844_v40 = vld [vmem:[#allocation40_spill] sm:$0xff] }
 0x20a   : > { %v3825_v12 = vpop.eup %3824  ;;  %3842 = vrsqrt.f32 %v5023_v0  ;;  %v1366_v43 = vmin.f32 %v3823_v14, 1e+08  ;;  %v1971_v0 = vrot.slane %v1350_v22, %v4625_v28  ;;  %v1967_v13 = vsel %vm1547_vm3, %v1966_v39, %v1962_v60 }
 0x20b   : > { %v3827_v46 = vpop.eup %3826  ;;  %3844 = vrsqrt.f32 %v5842_v25  ;;  %v1351_v37 = vmin.f32 %v3825_v12, 1e+08  ;;  %v1902_v18 = vrot.slane %v1336_v8, %v4647_v52  ;;  %v1898_v56 = vsel %vm1561_vm5, %v1897_v17, %v1893_v23  ;;  %v5255_v25 = vpop.xlane.xlu1 %1128 }
 0x20c   : > { %3846 = vrsqrt.f32 %v5032_v3  ;;  %v1337_v38 = vmin.f32 %v3827_v46, 1e+08  ;;  %v2119_v3 = vrot.slane %v1380_v5, %v4579_v41  ;;  %v2115_v14 = vsel %vm1533_vm1, %v2114_v16, %v2110_v21  ;;  %v5845_v46 = vld [vmem:[#allocation52_spill] sm:$0xff]  ;;  %v5846_v21 = vld [vmem:[#allocation51_spill] sm:$0xff] }
 0x20d   : > { %v3829_v42 = vpop.eup %3828  ;;  %3848 = vrsqrt.f32 %v5029_v29  ;;  %v2050_v49 = vrot.slane %v1366_v43, %v4625_v28  ;;  %v5243_v29 = vpop.xlane.xlu0 %1098  ;;  %v2210_v4 = vrot.slane %v5844_v40, 7  ;;  %v2046_v60 = vsel %vm1547_vm3, %v2045_v1, %v2041_v59 }
 0x20e   : > { %v3831_v45 = vpop.eup %3830  ;;  %3850 = vrsqrt.f32 %v5843_v55  ;;  %v1976_v12 = vrot.slane %v1351_v37, %v4611_v7  ;;  %v1381_v39 = vmin.f32 %v3829_v42, 1e+08  ;;  %v1972_v34 = vsel %vm1554_vm4, %v1971_v0, %v1967_v13 }
 0x20f   : > { %v3833_v26 = vpop.eup %3832  ;;  %v1907_v22 = vrot.slane %v1337_v38, %v4631_v36  ;;  %3852 = vrsqrt.f32 %v5845_v46  ;;  %v718_v8 = vrot.slane %v5846_v21, 4  ;;  %v1903_v17 = vsel %vm1568_vm6, %v1902_v18, %v1898_v56 }
 0x210   : > { %v3835_v6 = vpop.eup %3834  ;;  %v2120_v16 = vsel %vm1540_vm2, %v2119_v3, %v2115_v14  ;;  %v1367_v43 = vmin.f32 %v3831_v45, 1e+08  ;;  %3854 = vrsqrt.f32 %v5044_v10  ;;  %v2051_v1 = vsel %vm1554_vm4, %v2050_v49, %v2046_v60  ;;  %v5847_v3 = vld [vmem:[#allocation50_spill] sm:$0xff] }
 0x211   : > { %v3837_v41 = vpop.eup %3836  ;;  %v1352_v37 = vmin.f32 %v3833_v26, 1e+08  ;;  %v1338_v42 = vmin.f32 %v3835_v6, 1e+08  ;;  %3856 = vrsqrt.f32 %v5041_v62  ;;  %v1977_v0 = vsel %vm1561_vm5, %v1976_v12, %v1972_v34  ;;  %v5266_v56 = vpop.xlane.xlu0 %1040 }
 0x212   : > { %v3839_v5 = vpop.eup %3838  ;;  %v2124_v38 = vrot.slane %v1381_v39, %v4586_v44  ;;  %v1382_v13 = vmin.f32 %v3837_v41, 1e+08  ;;  %3858 = vrsqrt.f32 %v5056_v53  ;;  %v1908_v10 = vsel %vm1575_vm7, %v1907_v22, %v1903_v17  ;;  %v5276_v41 = vpop.xlane.xlu1 %1070 }
 0x213   : > { %v3841_v23 = vpop.eup %3840  ;;  %3860 = vrsqrt.f32 %v5049_v57  ;;  %v719_v18 = vmax.f32 %v5846_v21, %v718_v8  ;;  %v724_v26 = vrot.slane %v5847_v3, 4  ;;  %v2055_v14 = vrot.slane %v1367_v43, %v4611_v7 }
 0x214   : > { %v3843_v59 = vpop.eup %3842  ;;  %v1368_v49 = vmin.f32 %v3839_v5, 1e+08  ;;  %v1353_v55 = vmin.f32 %v3841_v23, 1e+08  ;;  %3862 = vrsqrt.f32 %v5068_v24  ;;  %v1981_v53 = vrot.slane %v1352_v37, %v4647_v52 }
 0x215   : > { %v3845_v45 = vpop.eup %3844  ;;  %v1912_v6 = vrot.slane %v1338_v42, %v4668_v50  ;;  %v1339_v60 = vmin.f32 %v3843_v59, 1e+08  ;;  %3864 = vrsqrt.f32 %v5062_v54  ;;  %v2125_v57 = vsel %vm1547_vm3, %v2124_v38, %v2120_v16  ;;  %v5287_v43 = vpop.xlane.xlu0 %1100 }
 0x216   : > { %v3847_v62 = vpop.eup %3846  ;;  %v2129_v12 = vrot.slane %v1382_v13, %v4625_v28  ;;  %v1383_v39 = vmin.f32 %v3845_v45, 1e+08  ;;  %3866 = vrsqrt.f32 %v5080_v48  ;;  %v720_v24 = vrot.slane %v719_v18, 2  ;;  %v5848_v13 = vld [vmem:[#allocation30_spill] sm:$0xff] }
 0x217   : > { %v3849_v44 = vpop.eup %3848  ;;  %v1369_v22 = vmin.f32 %v3847_v62, 1e+08  ;;  %v725_v46 = vmax.f32 %v5847_v3, %v724_v26  ;;  %3868 = vrsqrt.f32 %v5074_v63  ;;  %v2056_v21 = vsel %vm1561_vm5, %v2055_v14, %v2051_v1  ;;  %v5849_v26 = vld [vmem:[#allocation54_spill] sm:$0xff] }
 0x218   : > { %v3851_v34 = vpop.eup %3850  ;;  %v2060_v54 = vrot.slane %v1368_v49, %v4647_v52  ;;  %v1986_v8 = vrot.slane %v1353_v55, %v4631_v36  ;;  %v1354_v5 = vmin.f32 %v3849_v44, 1e+08  ;;  %v1982_v17 = vsel %vm1568_vm6, %v1981_v53, %v1977_v0  ;;  %v5850_v44 = vld [vmem:[#allocation29_spill] sm:$0xff] }
 0x219   : > { %v3853_v28 = vpop.eup %3852  ;;  %v1913_v48 = vsel %vm1582_vm8, %v1912_v6, %v1908_v10  ;;  %v1917_v16 = vrot.slane %v1339_v60, %v4661_v32  ;;  %3870 = vrsqrt.f32 %v5096_v31  ;;  %v2130_v63 = vsel %vm1554_vm4, %v2129_v12, %v2125_v57  ;;  %v5851_v60 = vld [vmem:[#allocation25_spill] sm:$0xff] }
 0x21a   : > { %v3855_v23 = vpop.eup %3854  ;;  %v2134_v1 = vrot.slane %v1383_v39, %v4611_v7  ;;  %v1325_v37 = vmin.f32 %v3851_v34, 1e+08  ;;  %3872 = vrsqrt.f32 %v5087_v9  ;;  %v2065_v59 = vrot.slane %v1369_v22, %v4631_v36  ;;  %v5298_v7 = vpop.xlane.xlu1 %1130 }
 0x21b   : > { %v3857_v42 = vpop.eup %3856  ;;  %v721_v0 = vmax.f32 %v719_v18, %v720_v24  ;;  %v726_v38 = vrot.slane %v725_v46, 2  ;;  %3874 = vrsqrt.f32 %v5848_v13  ;;  %v2061_v31 = vsel %vm1568_vm6, %v2060_v54, %v2056_v21  ;;  %v5307_v22 = vpop.xlane.xlu0 %1072 }
 0x21c   : > { %v3859_v45 = vpop.eup %3858  ;;  %v1987_v10 = vsel %vm1575_vm7, %v1986_v8, %v1982_v17  ;;  %v1991_v3 = vrot.slane %v1354_v5, %v4668_v50  ;;  %3876 = vrsqrt.f32 %v5849_v26  ;;  %v1918_v9 = vsel %vm1589_vm9, %v1917_v16, %v1913_v48 }
 0x21d   : > { %v3861_v62 = vpop.eup %3860  ;;  %v1384_v14 = vmin.f32 %v3853_v28, 1e+08  ;;  %v1355_v49 = vmin.f32 %v3855_v23, 1e+08  ;;  %3878 = vrsqrt.f32 %v5136_v30  ;;  %v2135_v55 = vsel %vm1561_vm5, %v2134_v1, %v2130_v63 }
 0x21e   : > { %v3863_v18 = vpop.eup %3862  ;;  %v1848_v53 = vrot.slane %v1325_v37, %v5850_v44  ;;  %v1340_v6 = vmin.f32 %v3857_v42, 1e+08  ;;  %3880 = vrsqrt.f32 %v5851_v60  ;;  %v2066_v12 = vsel %vm1575_vm7, %v2065_v59, %v2061_v31  ;;  %v5318_v16 = vpop.xlane.xlu1 %1102 }
 0x21f   : > { %v3865_v57 = vpop.eup %3864  ;;  %v722_v39 = vrot.slane %v721_v0, 1  ;;  %v727_v34 = vmax.f32 %v725_v46, %v726_v38  ;;  %3882 = vrsqrt.f32 %v5157_v47  ;;  %v1992_v30 = vsel %vm1582_vm8, %v1991_v3, %v1987_v10 }
 0x220   : > { %v3867_v24 = vpop.eup %3866  ;;  %v1385_v21 = vmin.f32 %v3859_v45, 1e+08  ;;  %v1370_v54 = vmin.f32 %v3861_v62, 1e+08  ;;  %3884 = vrsqrt.f32 %v5145_v20  ;;  %v2139_v5 = vrot.slane %v1384_v14, %v4647_v52  ;;  %v5852_v45 = vld [vmem:[#allocation32_spill] sm:$0xff] }
 0x221   : > { %v3869_v8 = vpop.eup %3868  ;;  %v1996_v28 = vrot.slane %v1355_v49, %v4661_v32  ;;  %v1341_v17 = vmin.f32 %v3863_v18, 1e+08  ;;  %3886 = vrsqrt.f32 %v5208_v27  ;;  %v1849_v47 = vsel %vm1603_vm11, %v1848_v53, %v5234_v61 }
 0x222   : > { %v1922_v46 = vrot.slane %v1340_v6, %v5820_v58  ;;  %v1326_v48 = vmin.f32 %v3865_v57, 1e+08  ;;  %3888 = vrsqrt.f32 %v5170_v19  ;;  %v723_v20 = vmax.f32 %v721_v0, %v722_v39  ;;  %v1133_v0 = vpop.xlane.xlu0 %1132  ;;  %v5853_v6 = vld [vmem:[#allocation31_spill] sm:$0xff] }
 0x223   : > { %v3871_v23 = vpop.eup %3870  ;;  %v728_v63 = vrot.slane %v727_v34, 1  ;;  %v1371_v1 = vmin.f32 %v3867_v24, 1e+08  ;;  %3890 = vrsqrt.f32 %v5197_v2  ;;  %v2144_v37 = vrot.slane %v1385_v21, %v4631_v36 }
 0x224   : > { %v3873_v52 = vpop.eup %3872  ;;  %v2070_v27 = vrot.slane %v1370_v54, %v4668_v50  ;;  %v1356_v42 = vmin.f32 %v3869_v8, 1e+08  ;;  %3892 = vrsqrt.f32 %v5228_v11  ;;  %v2140_v59 = vsel %vm1568_vm6, %v2139_v5, %v2135_v55  ;;  %v5854_v54 = vld [vmem:[#allocation28_spill] sm:$0xff] }
 0x225   : > { %v3875_v61 = vpop.eup %3874  ;;  %v1997_v19 = vsel %vm1589_vm9, %v1996_v28, %v1992_v30  ;;  %v1927_v38 = vrot.slane %v1341_v17, %v5850_v44  ;;  %3894 = vrsqrt.f32 %v5218_v51  ;;  %v1923_v2 = vsel %vm1596_vm10, %v1922_v46, %v1918_v9 }
 0x226   : > { %v3877_v13 = vpop.eup %3876  ;;  %v1853_v36 = vrot.slane %v1326_v48, %v5852_v45  ;;  %v1327_v31 = vmin.f32 %v3871_v23, 1e+08  ;;  %3896 = vrsqrt.f32 %v5184_v33  ;;  %v5332_v11 = vmul.f32 %v5191_v35, %v723_v20  ;;  %v1105_v33 = vpop.xlane.xlu1 %1104 }
 0x227   : > { %v3879_v10 = vpop.eup %3878  ;;  %v5334_v3 = vmax.f32 %v727_v34, %v728_v63  ;;  %v2075_v26 = vrot.slane %v1371_v1, %v4661_v32  ;;  %3898 = vrsqrt.f32 %v5255_v25  ;;  %v2145_v62 = vsel %vm1575_vm7, %v2144_v37, %v2140_v59  ;;  %v1135_v24 = vpop.xlane.xlu0 %1134 }
 0x228   : > { %v3881_v51 = vpop.eup %3880  ;;  %v2071_v9 = vsel %vm1582_vm8, %v2070_v27, %v2066_v12  ;;  %v2001_v14 = vrot.slane %v1356_v42, %v5820_v58  ;;  %3900 = vrsqrt.f32 %v5243_v29  ;;  %v1928_v35 = vsel %vm1603_vm11, %v1927_v38, %v1923_v2  ;;  %v5855_v42 = vld [vmem:[#allocation36_spill] sm:$0xff] }
 0x229   : > { %v3883_v49 = vpop.eup %3882  ;;  %v1386_v18 = vmin.f32 %v3873_v52, 1e+08  ;;  %3902 = vrsqrt.f32 %v5276_v41  ;;  %v730_v55 = vrot.slane %v5177_v15, 4  ;;  %v1854_v25 = vsel %vm1610_vm12, %v1853_v36, %v1849_v47 }
 0x22a   : > { %v3885_v53 = vpop.eup %3884  ;;  %v1858_v60 = vrot.slane %v1327_v31, %v5853_v6  ;;  %v1357_v57 = vmin.f32 %v3875_v61, 1e+08  ;;  %3904 = vrsqrt.f32 %v5266_v56  ;;  %v2213_v29 = vrot.slane %v5332_v11, 6  ;;  %v1137_v23 = vpop.xlane.xlu1 %1136 }
 0x22b   : > { %v3887_v12 = vpop.eup %3886  ;;  %v2076_v39 = vsel %vm1589_vm9, %v2075_v26, %v2071_v9  ;;  %v1342_v34 = vmin.f32 %v3877_v13, 1e+08  ;;  %3906 = vrsqrt.f32 %v5298_v7  ;;  %v2002_v30 = vsel %vm1596_vm10, %v2001_v14, %v1997_v19  ;;  %v5856_v13 = vld [vmem:[#allocation35_spill] sm:$0xff] }
 0x22c   : > { %v3889_v41 = vpop.eup %3888  ;;  %v1387_v21 = vmin.f32 %v3879_v10, 1e+08  ;;  %3908 = vrsqrt.f32 %v5307_v22  ;;  %v736_v8 = vrot.slane %v5854_v54, 4  ;;  %v2149_v56 = vrot.slane %v1386_v18, %v4668_v50 }
 0x22d   : > { %v3891_v5 = vpop.eup %3890  ;;  %v1328_v28 = vmin.f32 %v3885_v53, 1e+08  ;;  %3910 = vrsqrt.f32 %v1133_v0  ;;  %v731_v17 = vmax.f32 %v5177_v15, %v730_v55  ;;  %v1859_v46 = vsel %vm1617_vm13, %v1858_v60, %v1854_v25 }
 0x22e   : > { %v3893_v47 = vpop.eup %3892  ;;  %v2006_v7 = vrot.slane %v1357_v57, %v5850_v44  ;;  %v1329_v48 = vmin.f32 %v3887_v12, 1e+08  ;;  %3912 = vrsqrt.f32 %v1135_v24  ;;  %v1932_v22 = vrot.slane %v1342_v34, %v5852_v45 }
 0x22f   : > { %v3895_v20 = vpop.eup %3894  ;;  %v1372_v63 = vmin.f32 %v3881_v51, 1e+08  ;;  %v1343_v1 = vmin.f32 %v3883_v49, 1e+08  ;;  %3914 = vrsqrt.f32 %v5287_v43  ;;  %v2154_v52 = vrot.slane %v1387_v21, %v4661_v32 }
 0x230   : > { %v3897_v50 = vpop.eup %3896  ;;  %v1358_v37 = vmin.f32 %v3889_v41, 1e+08  ;;  %3916 = vrsqrt.f32 %v5318_v16  ;;  %v737_v15 = vmax.f32 %v5854_v54, %v736_v8  ;;  %v1863_v61 = vrot.slane %v1328_v28, %v5855_v42 }
 0x231   : > { %v3899_v27 = vpop.eup %3898  ;;  %v1388_v59 = vmin.f32 %v3891_v5, 1e+08  ;;  %3918 = vrsqrt.f32 %v1137_v23  ;;  %v732_v19 = vrot.slane %v731_v17, 2  ;;  %v2150_v0 = vsel %vm1582_vm8, %v2149_v56, %v2145_v62 }
 0x232   : > { %v3901_v38 = vpop.eup %3900  ;;  %v1868_v2 = vrot.slane %v1329_v48, %v5856_v13  ;;  %v1359_v43 = vmin.f32 %v3893_v47, 1e+08  ;;  %v1344_v36 = vmin.f32 %v3895_v20, 1e+08  ;;  %v2080_v32 = vrot.slane %v1372_v63, %v5820_v58 }
 0x233   : > { %v3903_v31 = vpop.eup %3902  ;;  %v1937_v16 = vrot.slane %v1343_v1, %v5853_v6  ;;  %v1373_v10 = vmin.f32 %v3897_v50, 1e+08  ;;  %3920 = vrsqrt.f32 %v1105_v33  ;;  %v2007_v51 = vsel %vm1603_vm11, %v2006_v7, %v2002_v30 }
 0x234   : > { %v3905_v26 = vpop.eup %3904  ;;  %v1933_v9 = vsel %vm1610_vm12, %v1932_v22, %v1928_v35  ;;  %v2011_v14 = vrot.slane %v1358_v37, %v5852_v45  ;;  %v738_v49 = vrot.slane %v737_v15, 2  ;;  %v2155_v18 = vsel %vm1589_vm9, %v2154_v52, %v2150_v0 }
 0x235   : > { %v3907_v62 = vpop.eup %3906  ;;  %v1864_v55 = vsel %vm1624_vm14, %v1863_v61, %v1859_v46  ;;  %v2159_v53 = vrot.slane %v1388_v59, %v5820_v58  ;;  %v733_v25 = vmax.f32 %v731_v17, %v732_v19  ;;  %v2016_v33 = vrot.slane %v1359_v43, %v5853_v6 }
 0x236   : > { %v3909_v60 = vpop.eup %3908  ;;  %v1869_v57 = vsel %vm1631_vm15, %v1868_v2, %v1864_v55  ;;  %v1942_v12 = vrot.slane %v1344_v36, %v5855_v42  ;;  %v1389_v34 = vmin.f32 %v3899_v27, 1e+08  ;;  %v5378_v24 = vsel %vm1596_vm10, %v2080_v32, %v2076_v39 }
 0x237   : > { %v3911_v35 = vpop.eup %3910  ;;  %v1938_v41 = vsel %vm1617_vm13, %v1937_v16, %v1933_v9  ;;  %v5382_v30 = vrot.slane %v1373_v10, %v5850_v44  ;;  %v1374_v21 = vmin.f32 %v3901_v38, 1e+08  ;;  %v2012_v54 = vsel %vm1610_vm12, %v2011_v14, %v2007_v51 }
 0x238   : > { %v3913_v58 = vpop.eup %3912  ;;  %v1360_v8 = vmin.f32 %v3903_v31, 1e+08  ;;  %v1345_v5 = vmin.f32 %v3905_v26, 1e+08  ;;  %v739_v56 = vmax.f32 %v737_v15, %v738_v49  ;;  %v5386_v17 = vmul.f32 %v1869_v57, %v5334_v3 }
 0x239   : > { %v3915_v28 = vpop.eup %3914  ;;  %v2160_v47 = vsel %vm1596_vm10, %v2159_v53, %v2155_v18  ;;  %v1390_v39 = vmin.f32 %v3907_v62, 1e+08  ;;  %v734_v46 = vrot.slane %v733_v25, 1  ;;  %v2017_v48 = vsel %vm1617_vm13, %v2016_v33, %v2012_v54 }
 0x23a   : > { %v3917_v7 = vpop.eup %3916  ;;  %v2164_v23 = vrot.slane %v1389_v34, %v5850_v44  ;;  %v1391_v20 = vmin.f32 %v3911_v35, 1e+08  ;;  %v1943_v22 = vsel %vm1624_vm14, %v1942_v12, %v1938_v41  ;;  %v2090_v50 = vrot.slane %v1374_v21, %v5852_v45 }
 0x23b   : > { %v3919_v1 = vpop.eup %3918  ;;  %v1361_v52 = vmin.f32 %v3909_v60, 1e+08  ;;  %v1392_v3 = vmin.f32 %v3913_v58, 1e+08  ;;  %v2021_v27 = vrot.slane %v1360_v8, %v5855_v42  ;;  %v1947_v61 = vrot.slane %v1345_v5, %v5856_v13 }
 0x23c   : > { %v1375_v59 = vmin.f32 %v3915_v28, 1e+08  ;;  %v740_v19 = vrot.slane %v739_v56, 1  ;;  %vm2214_vm1 = vcmask 1042434   ;;  %v2169_v2 = vrot.slane %v1390_v39, %v5852_v45 }
 0x23d   : > { %v3921_v0 = vpop.eup %3920  ;;  %v735_v43 = vmax.f32 %v733_v25, %v734_v46  ;;  %vm2217_vm2 = vcmask 1043459   ;;  %v2165_v10 = vsel %vm1603_vm11, %v2164_v23, %v2160_v47  ;;  %v1376_v26 = vmin.f32 %v3917_v7, 1e+08 }
 0x23e   : > { %v700_v63 = vpop.f32.mrb[12].mxu1  ;;  %v2174_v51 = vrot.slane %v1391_v20, %v5853_v6  ;;  %v1393_v9 = vmin.f32 %v3919_v1, 1e+08  ;;  %v2026_v49 = vrot.slane %v1361_v52, %v5856_v13  ;;  %v2179_v62 = vrot.slane %v1392_v3, %v5855_v42  ;;  %v5857_v20 = vld [vmem:[#allocation41_spill] sm:$0xff] }
 0x23f   : > { %v748_v37 = vrot.slane %v700_v63, 4  ;;  %v3585_v15 = vpop.f32.mrb[13].mxu1  ;;  %v1377_v53 = vmin.f32 %v3921_v0, 1e+08  ;;  %v1948_v25 = vsel %vm1631_vm15, %v1947_v61, %v1943_v22  ;;  %v741_v60 = vmax.f32 %v739_v56, %v740_v19 }
 0x240   : > { %v660_v38 = vpop.f32.mrb[12].mxu0  ;;  %v703_v44 = vpop.f32.mrb[14].mxu1  ;;  %v2022_v57 = vsel %vm1624_vm14, %v2021_v27, %v2017_v48  ;;  %v2170_v33 = vsel %vm1610_vm12, %v2169_v2, %v2165_v10  ;;  %v2198_v12 = vmul.f32 %v1948_v25, %v735_v43  ;;  %v2095_v41 = vrot.slane %v1375_v59, %v5853_v6 }
 0x241   : > { %v742_v36 = vrot.slane %v660_v38, 4  ;;  %v749_v31 = vmax.f32 %v700_v63, %v748_v37  ;;  %v3565_v32 = vpop.f32.mrb[13].mxu0  ;;  %v3586_v16 = vpop.f32.mrb[15].mxu1  ;;  %v2100_v21 = vrot.slane %v1376_v26, %v5855_v42  ;;  %v2175_v58 = vsel %vm1617_vm13, %v2174_v51, %v2170_v33 }
 0x242   : > { %v663_v14 = vpop.f32.mrb[14].mxu0  ;;  %v2184_v54 = vrot.slane %v1393_v9, %v5856_v13  ;;  %v2027_v8 = vsel %vm1631_vm15, %v2026_v49, %v2022_v57  ;;  %v2180_v56 = vsel %vm1624_vm14, %v2179_v62, %v2175_v58  ;;  %v2086_v47 = vsel %vm1603_vm11, %v5382_v30, %v5378_v24 }
 0x243   : > { %v743_v18 = vmax.f32 %v660_v38, %v742_v36  ;;  %v750_v55 = vrot.slane %v749_v31, 2  ;;  %v3566_v45 = vpop.f32.mrb[15].mxu0  ;;  %v2216_v39 = vrot.slane %v5386_v17, 5  ;;  %v2105_v6 = vrot.slane %v1377_v53, %v5856_v13 }
 0x244   : > { %v2199_v46 = vmul.f32 %v2027_v8, %v741_v60  ;;  %v2091_v42 = vsel %vm1610_vm12, %v2090_v50, %v2086_v47  ;;  %v2219_v7 = vrot.slane %v2198_v12, 4  ;;  %v2212_v22 = vsel %vm2211_vm0, %v2210_v4, %v5857_v20 }
 0x245   : > { %v744_v34 = vrot.slane %v743_v18, 2  ;;  %v751_v35 = vmax.f32 %v749_v31, %v750_v55  ;;  %v2096_v63 = vsel %vm1617_vm13, %v2095_v41, %v2091_v42  ;;  %v2185_v1 = vsel %vm1631_vm15, %v2184_v54, %v2180_v56 }
 0x246   : > { %vm2220_vm3 = vcmask 1044484   ;;  %v2101_v30 = vsel %vm1624_vm14, %v2100_v21, %v2096_v63  ;;  %v2215_v50 = vsel %vm2214_vm1, %v2213_v29, %v2212_v22  ;;  %v2222_v52 = vrot.slane %v2199_v46, 3  ;;  %v5858_v22 = vld [vmem:[#allocation26_spill] sm:$0xff] }
 0x247   : > { %v745_v5 = vmax.f32 %v743_v18, %v744_v34  ;;  %v752_v28 = vrot.slane %v751_v35, 1  ;;  %v2106_v3 = vsel %vm1631_vm15, %v2105_v6, %v2101_v30  ;;  %v2218_v37 = vsel %vm2217_vm2, %v2216_v39, %v2215_v50 }
 0x248   : > { %v2221_v4 = vsel %vm2220_vm3, %v2219_v7, %v2218_v37  ;;  %vm2223_vm4 = vcmask 1045509   ;;  %vm2226_vm5 = vcmask 1046534   ;;  %vm2229_vm6 = vcmask 1047559  }
 0x249   : > { %v746_v48 = vrot.slane %v745_v5, 1  ;;  %v753_v23 = vmax.f32 %v751_v35, %v752_v28  ;;  %v2224_v59 = vsel %vm2223_vm4, %v2222_v52, %v2221_v4  ;;  %v5443_v63 = vsub.s32 0, %v5858_v22 }
 0x24b   : > { %v747_v24 = vmax.f32 %v745_v5, %v746_v48  ;;  %v2201_v13 = vmul.f32 %v2185_v1, %v753_v23 }
 0x24d   : > { %v2200_v15 = vmul.f32 %v2106_v3, %v747_v24  ;;  %v2228_v27 = vrot.slane %v2201_v13, 1 }
 0x24f   : > { %v2225_v61 = vrot.slane %v2200_v15, 2 }
 0x251   : > { %v2227_v19 = vsel %vm2226_vm5, %v2225_v61, %v2224_v59 }
 0x252   : > { %v2230_v38 = vsel %vm2229_vm6, %v2228_v27, %v2227_v19 }
 0x253   : > { %2232 = vmax.xlane.f32.xlu0 %v2230_v38 }
 0x2e0   : > { %v2233_v29 = vpop.xlane.xlu0 %2232 }
 0x2e1   : > { %v2235_v44 = vrot.slane %v2233_v29, 1  ;;  %v2236_v0 = vrot.slane %v2233_v29, 2  ;;  %v2237_v2 = vrot.slane %v2233_v29, 3  ;;  %v2238_v43 = vrot.slane %v2233_v29, 4 }
 0x2e2   : > { %v2239_v36 = vrot.slane %v2233_v29, 5  ;;  %v2250_v31 = vsub.f32 %v5857_v20, %v2233_v29  ;;  %v2240_v32 = vrot.slane %v2233_v29, 6  ;;  %v2241_v16 = vrot.slane %v2233_v29, 7 }
 0x2e3   : > { %v2251_v10 = vsub.f32 %v5844_v40, %v2235_v44  ;;  %v2252_v26 = vsub.f32 %v5332_v11, %v2236_v0  ;;  %v2253_v51 = vsub.f32 %v5386_v17, %v2237_v2  ;;  %v2254_v9 = vsub.f32 %v2198_v12, %v2238_v43 }
 0x2e4   : > { %v2258_v14 = vmul.f32 1.442695, %v2250_v31  ;;  %v2255_v49 = vsub.f32 %v2199_v46, %v2239_v36  ;;  %v2256_v62 = vsub.f32 %v2200_v15, %v2240_v32  ;;  %v2257_v45 = vsub.f32 %v2201_v13, %v2241_v16 }
 0x2e5   : > { %v2260_v18 = vmul.f32 1.442695, %v2251_v10  ;;  %v2262_v55 = vmul.f32 1.442695, %v2252_v26  ;;  %v2264_v53 = vmul.f32 1.442695, %v2253_v51 }
 0x2e6   : > { %3922 = vpow2.f32 %v2258_v14  ;;  %v2266_v25 = vmul.f32 1.442695, %v2254_v9  ;;  %v2268_v60 = vmul.f32 1.442695, %v2255_v49  ;;  %v2270_v57 = vmul.f32 1.442695, %v2256_v62 }
 0x2e7   : > { %3924 = vpow2.f32 %v2260_v18  ;;  %v2272_v40 = vmul.f32 1.442695, %v2257_v45 }
 0x2e8   : > { %3926 = vpow2.f32 %v2262_v55 }
 0x2e9   : > { %3928 = vpow2.f32 %v2264_v53 }
 0x2ea   : > { %3930 = vpow2.f32 %v2266_v25 }
 0x2eb   : > { %3932 = vpow2.f32 %v2268_v60 }
 0x2ec   : > { %3934 = vpow2.f32 %v2270_v57 }
 0x2ed   : > { %3936 = vpow2.f32 %v2272_v40 }
 0x2f0   : > { %v3923_v11 = vpop.eup %3922 }
 0x2f1   : > { %v3925_v17 = vpop.eup %3924 }
 0x2f2   : > { %v3927_v33 = vpop.eup %3926  ;;  %v2282_v12 = vrot.slane %v3925_v17, 7 }
 0x2f3   : > { %v3929_v34 = vpop.eup %3928  ;;  %v2284_v35 = vrot.slane %v3927_v33, 6 }
 0x2f4   : > { %v3931_v41 = vpop.eup %3930  ;;  %v2283_v21 = vsel %vm2211_vm0, %v2282_v12, %v3923_v11  ;;  %v2286_v58 = vrot.slane %v3929_v34, 5 }
 0x2f5   : > { %v3933_v54 = vpop.eup %3932  ;;  %v2285_v8 = vsel %vm2214_vm1, %v2284_v35, %v2283_v21  ;;  %v2288_v5 = vrot.slane %v3931_v41, 4 }
 0x2f6   : > { %v3935_v28 = vpop.eup %3934  ;;  %v2287_v56 = vsel %vm2217_vm2, %v2286_v58, %v2285_v8  ;;  %v2290_v47 = vrot.slane %v3933_v54, 3 }
 0x2f7   : > { %v3937_v39 = vpop.eup %3936  ;;  %v2289_v6 = vsel %vm2220_vm3, %v2288_v5, %v2287_v56  ;;  %v2292_v46 = vrot.slane %v3935_v28, 2 }
 0x2f8   : > { %v2291_v42 = vsel %vm2223_vm4, %v2290_v47, %v2289_v6  ;;  %v2294_v7 = vrot.slane %v3937_v39, 1 }
 0x2f9   : > { %v2293_v48 = vsel %vm2226_vm5, %v2292_v46, %v2291_v42  ;;  %v3942_v46 = vld [vmem:[#allocation2] sm:$0xff] }
 0x2fa   : > { %v2295_v23 = vsel %vm2229_vm6, %v2294_v7, %v2293_v48  ;;  %v3943_v7 = vld [vmem:[#allocation2 + $0x10] sm:$0xff] }
 0x2fb   : > { %2297 = vadd.xlane.f32.xlu1 %v2295_v23 }
 0x388   : > { %v2298_v20 = vpop.xlane.xlu1 %2297 }
 0x389   : > { %3938 = vrcp.f32 %v2298_v20 }
 0x393   : > { %v3939_v1 = vpop.eup %3938 }
 0x394   : > { %v2316_v24 = vmul.f32 %v3939_v1, %v3923_v11  ;;  %v2301_v30 = vrot.slane %v3939_v1, 1  ;;  %v2302_v13 = vrot.slane %v3939_v1, 2  ;;  %v2303_v50 = vrot.slane %v3939_v1, 3 }
 0x395   : > { %v2304_v52 = vrot.slane %v3939_v1, 4  ;;  %v2305_v3 = vrot.slane %v3939_v1, 5  ;;  %v2306_v37 = vrot.slane %v3939_v1, 6  ;;  %v2307_v15 = vrot.slane %v3939_v1, 7 }
 0x396   : > { %v2327_v4 = vrot.slane %v2316_v24, %v5443_v63  ;;  %v2317_v27 = vmul.f32 %v3925_v17, %v2301_v30  ;;  %v2318_v61 = vmul.f32 %v3927_v33, %v2302_v13  ;;  %v2319_v59 = vmul.f32 %v3929_v34, %v2303_v50  ;;  %v3945_v50 = vld [vmem:[#allocation2 + $0x80] sm:$0xff] }
 0x397   : > { %v2320_v19 = vmul.f32 %v3931_v41, %v2304_v52  ;;  %v2321_v38 = vmul.f32 %v3933_v54, %v2305_v3  ;;  %v2322_v29 = vmul.f32 %v3935_v28, %v2306_v37  ;;  %v2323_v44 = vmul.f32 %v3937_v39, %v2307_v15  ;;  %v3941_v39 = vld [vmem:[#allocation2 + $0x8] sm:$0xff] }
 0x398   : > { %2333 = vbcast.lane.b32.xlu1 %v2327_v4, 264  ;;  %2329 = vbcast.lane.b32.xlu0 %v2327_v4, 256  ;;  %v5447_v0 = vrot.slane %v2319_v59, %v5443_v63  ;;  %v3181_v2 = vrot.slane %v2317_v27, 7  ;;  %v3183_v10 = vrot.slane %v2318_v61, 6  ;;  %v3185_v26 = vrot.slane %v2319_v59, 5  ;;  %v3946_v3 = vld [vmem:[#allocation2 + $0x88] sm:$0xff] }
 0x399   : > { %v5450_v43 = vrot.slane %v2320_v19, %v5443_v63  ;;  %v5453_v36 = vrot.slane %v2321_v38, %v5443_v63  ;;  %v5456_v31 = vrot.slane %v2322_v29, %v5443_v63  ;;  %v5459_v32 = vrot.slane %v2323_v44, %v5443_v63  ;;  %v3948_v59 = vld [vmem:[#allocation2 + $0x20] sm:$0xff] }
 0x39a   : > { %v3182_v16 = vsel %vm2211_vm0, %v3181_v2, %v2316_v24  ;;  %v3187_v9 = vrot.slane %v2320_v19, 4  ;;  %v3189_v49 = vrot.slane %v2321_v38, 3  ;;  %v3191_v18 = vrot.slane %v2322_v29, 2 }
 0x39b   : > { %v3184_v51 = vsel %vm2214_vm1, %v3183_v10, %v3182_v16  ;;  %v3193_v45 = vrot.slane %v2323_v44, 1  ;;  %v2394_v60 = vrot.slane %v2317_v27, %v5443_v63  ;;  %v2461_v57 = vrot.slane %v2318_v61, %v5443_v63  ;;  %v3944_v63 = vld [vmem:[#allocation2 + $0x18] sm:$0xff]  ;;  %v3950_v16 = vld [vmem:[#allocation2 + $0x28] sm:$0xff] }
 0x39c   : > { %2337 = vbcast.lane.b32.xlu1 %v2327_v4, 272  ;;  %2345 = vbcast.lane.b32.xlu0 %v2327_v4, 288  ;;  %v3186_v14 = vsel %vm2217_vm2, %v3185_v26, %v3184_v51  ;;  %v3949_v44 = vld [vmem:[#allocation2 + $0x98] sm:$0xff]  ;;  %v3951_v51 = vld [vmem:[#allocation2 + $0xa0] sm:$0xff] }
 0x39d   : > { %v3188_v62 = vsel %vm2220_vm3, %v3187_v9, %v3186_v14 }
 0x39e   : > { %v3190_v55 = vsel %vm2223_vm4, %v3189_v49, %v3188_v62 }
 0x39f   : > { %v3192_v53 = vsel %vm2226_vm5, %v3191_v18, %v3190_v55  ;;  %v3952_v18 = vld [vmem:[#allocation2 + $0xa8] sm:$0xff] }
 0x3a0   : > { %2341 = vbcast.lane.b32.xlu1 %v2327_v4, 280  ;;  %2353 = vbcast.lane.b32.xlu0 %v2327_v4, 304  ;;  %v3194_v25 = vsel %vm2229_vm6, %v3193_v45, %v3192_v53 }
 0x3a1   : > { %3196 = vst [vmem:[%s4333_s14] sm:$0xff] %v3194_v25  ;;  %v3953_v25 = vld [vmem:[#allocation2 + $0xb0] sm:$0xff] }
 0x3a4   : > { %2349 = vbcast.lane.b32.xlu1 %v2327_v4, 296  ;;  %2361 = vbcast.lane.b32.xlu0 %v2327_v4, 320 }
 0x3a8   : > { %2357 = vbcast.lane.b32.xlu1 %v2327_v4, 312  ;;  %2369 = vbcast.lane.b32.xlu0 %v2327_v4, 336 }
 0x3ac   : > { %2365 = vbcast.lane.b32.xlu1 %v2327_v4, 328  ;;  %2377 = vbcast.lane.b32.xlu0 %v2327_v4, 352 }
 0x3b0   : > { %2373 = vbcast.lane.b32.xlu1 %v2327_v4, 344  ;;  %2385 = vbcast.lane.b32.xlu0 %v2327_v4, 368 }
 0x3b4   : > { %2381 = vbcast.lane.b32.xlu1 %v2327_v4, 360  ;;  %2396 = vbcast.lane.b32.xlu0 %v2394_v60, 256 }
 0x3b8   : > { %2389 = vbcast.lane.b32.xlu1 %v2327_v4, 376  ;;  %2404 = vbcast.lane.b32.xlu0 %v2394_v60, 272  ;;  %v3947_v4 = vld [vmem:[#allocation2 + $0x90] sm:$0xff] }
 0x3bc   : > { %2400 = vbcast.lane.b32.xlu1 %v2394_v60, 264  ;;  %2412 = vbcast.lane.b32.xlu0 %v2394_v60, 288 }
 0x3c0   : > { %2408 = vbcast.lane.b32.xlu1 %v2394_v60, 280  ;;  %2420 = vbcast.lane.b32.xlu0 %v2394_v60, 304 }
 0x3c4   : > { %2416 = vbcast.lane.b32.xlu1 %v2394_v60, 296  ;;  %2428 = vbcast.lane.b32.xlu0 %v2394_v60, 320 }
 0x3c8   : > { %2424 = vbcast.lane.b32.xlu1 %v2394_v60, 312  ;;  %2436 = vbcast.lane.b32.xlu0 %v2394_v60, 336 }
 0x3cc   : > { %2432 = vbcast.lane.b32.xlu1 %v2394_v60, 328  ;;  %2444 = vbcast.lane.b32.xlu0 %v2394_v60, 352 }
 0x3d0   : > { %2440 = vbcast.lane.b32.xlu1 %v2394_v60, 344  ;;  %2452 = vbcast.lane.b32.xlu0 %v2394_v60, 368 }
 0x3d4   : > { %2448 = vbcast.lane.b32.xlu1 %v2394_v60, 360  ;;  %2463 = vbcast.lane.b32.xlu0 %v2461_v57, 256 }
 0x3d8   : > { %2456 = vbcast.lane.b32.xlu1 %v2394_v60, 376  ;;  %2471 = vbcast.lane.b32.xlu0 %v2461_v57, 272 }
 0x3dc   : > { %2467 = vbcast.lane.b32.xlu1 %v2461_v57, 264  ;;  %2479 = vbcast.lane.b32.xlu0 %v2461_v57, 288 }
 0x3e0   : > { %2475 = vbcast.lane.b32.xlu1 %v2461_v57, 280  ;;  %2487 = vbcast.lane.b32.xlu0 %v2461_v57, 304 }
 0x3e4   : > { %2483 = vbcast.lane.b32.xlu1 %v2461_v57, 296  ;;  %2495 = vbcast.lane.b32.xlu0 %v2461_v57, 320 }
 0x3e8   : > { %2491 = vbcast.lane.b32.xlu1 %v2461_v57, 312  ;;  %2503 = vbcast.lane.b32.xlu0 %v2461_v57, 336 }
 0x3ec   : > { %2499 = vbcast.lane.b32.xlu1 %v2461_v57, 328  ;;  %2511 = vbcast.lane.b32.xlu0 %v2461_v57, 352 }
 0x3f0   : > { %2507 = vbcast.lane.b32.xlu1 %v2461_v57, 344  ;;  %2519 = vbcast.lane.b32.xlu0 %v2461_v57, 368 }
 0x3f4   : > { %2515 = vbcast.lane.b32.xlu1 %v2461_v57, 360  ;;  %2530 = vbcast.lane.b32.xlu0 %v5447_v0, 256 }
 0x3f8   : > { %2523 = vbcast.lane.b32.xlu1 %v2461_v57, 376  ;;  %2538 = vbcast.lane.b32.xlu0 %v5447_v0, 272 }
 0x3fc   : > { %2534 = vbcast.lane.b32.xlu1 %v5447_v0, 264  ;;  %2546 = vbcast.lane.b32.xlu0 %v5447_v0, 288 }
 0x400   : > { %2542 = vbcast.lane.b32.xlu1 %v5447_v0, 280  ;;  %2554 = vbcast.lane.b32.xlu0 %v5447_v0, 304 }
 0x404   : > { %2550 = vbcast.lane.b32.xlu1 %v5447_v0, 296  ;;  %2562 = vbcast.lane.b32.xlu0 %v5447_v0, 320 }
 0x408   : > { %2558 = vbcast.lane.b32.xlu1 %v5447_v0, 312  ;;  %2570 = vbcast.lane.b32.xlu0 %v5447_v0, 336 }
 0x40a   : > { %v2334_v40 = vpop.permute.xlu1 %2333  ;;  %v2330_v11 = vpop.permute.xlu0 %2329 }
 0x40b   : > { %v2861_v6 = vmul.f32 %v3941_v39, %v2334_v40  ;;  %v2860_v42 = vmul.f32 %v3942_v46, %v2330_v11  ;;  %v3954_v40 = vld [vmem:[#allocation2 + $0x30] sm:$0xff]  ;;  %v3956_v39 = vld [vmem:[#allocation2 + $0x38] sm:$0xff] }
 0x40c   : > { %2566 = vbcast.lane.b32.xlu1 %v5447_v0, 328  ;;  %2578 = vbcast.lane.b32.xlu0 %v5447_v0, 352 }
 0x40d   : > { %v2988_v22 = vadd.f32 %v2861_v6, %v2860_v42  ;;  %v3957_v42 = vld [vmem:[#allocation2 + $0xc0] sm:$0xff] }
 0x40e   : > { %v2338_v17 = vpop.permute.xlu1 %2337  ;;  %v2346_v33 = vpop.permute.xlu0 %2345 }
 0x40f   : > { %v2862_v48 = vmul.f32 %v3943_v7, %v2338_v17  ;;  %v2864_v19 = vmul.f32 %v3948_v59, %v2346_v33 }
 0x410   : > { %2574 = vbcast.lane.b32.xlu1 %v5447_v0, 344  ;;  %2586 = vbcast.lane.b32.xlu0 %v5447_v0, 368 }
 0x411   : > { %v2989_v24 = vadd.f32 %v2988_v22, %v2862_v48 }
 0x412   : > { %v2342_v12 = vpop.permute.xlu1 %2341  ;;  %v5485_v34 = vpop.permute.xlu0 %2353 }
 0x413   : > { %v2863_v1 = vmul.f32 %v3944_v63, %v2342_v12  ;;  %v2866_v11 = vmul.f32 %v3954_v40, %v5485_v34  ;;  %v3955_v12 = vld [vmem:[#allocation2 + $0xb8] sm:$0xff]  ;;  %v3958_v63 = vld [vmem:[#allocation2 + $0xc8] sm:$0xff] }
 0x414   : > { %2582 = vbcast.lane.b32.xlu1 %v5447_v0, 360  ;;  %2597 = vbcast.lane.b32.xlu0 %v5450_v43, 256 }
 0x415   : > { %v2990_v15 = vadd.f32 %v2989_v24, %v2863_v1 }
 0x416   : > { %v2350_v35 = vpop.permute.xlu1 %2349  ;;  %v5489_v41 = vpop.permute.xlu0 %2361 }
 0x417   : > { %v2865_v10 = vmul.f32 %v3950_v16, %v2350_v35  ;;  %v2991_v26 = vadd.f32 %v2990_v15, %v2864_v19  ;;  %v3961_v15 = vld [vmem:[#allocation2 + $0xd8] sm:$0xff]  ;;  %v3964_v16 = vld [vmem:[#allocation2 + $0xe8] sm:$0xff] }
 0x418   : > { %2590 = vbcast.lane.b32.xlu1 %v5447_v0, 376  ;;  %2605 = vbcast.lane.b32.xlu0 %v5450_v43, 272 }
 0x419   : > { %v2992_v53 = vadd.f32 %v2991_v26, %v2865_v10 }
 0x41a   : > { %v5493_v21 = vpop.permute.xlu1 %2357  ;;  %v5495_v58 = vpop.permute.xlu0 %2369 }
 0x41b   : > { %v2867_v6 = vmul.f32 %v3956_v39, %v5493_v21  ;;  %v2993_v46 = vadd.f32 %v2992_v53, %v2866_v11  ;;  %v3971_v39 = vld [vmem:[#allocation2 + $0x110] sm:$0xff] }
 0x41c   : > { %2601 = vbcast.lane.b32.xlu1 %v5450_v43, 264  ;;  %2613 = vbcast.lane.b32.xlu0 %v5450_v43, 288 }
 0x41d   : > { %v2994_v24 = vadd.f32 %v2993_v46, %v2867_v6  ;;  %v3972_v46 = vld [vmem:[#allocation2 + $0x60] sm:$0xff] }
 0x41e   : > { %v5499_v54 = vpop.permute.xlu1 %2365  ;;  %v5501_v8 = vpop.permute.xlu0 %2377 }
 0x420   : > { %2609 = vbcast.lane.b32.xlu1 %v5450_v43, 280  ;;  %2621 = vbcast.lane.b32.xlu0 %v5450_v43, 304 }
 0x422   : > { %v5505_v5 = vpop.permute.xlu1 %2373  ;;  %v5507_v28 = vpop.permute.xlu0 %2385 }
 0x424   : > { %2617 = vbcast.lane.b32.xlu1 %v5450_v43, 296  ;;  %2629 = vbcast.lane.b32.xlu0 %v5450_v43, 320 }
 0x426   : > { %v5511_v56 = vpop.permute.xlu1 %2381  ;;  %v2397_v47 = vpop.permute.xlu0 %2396 }
 0x427   : > { %v2876_v52 = vmul.f32 %v3945_v50, %v2397_v47  ;;  %v3960_v50 = vld [vmem:[#allocation2 + $0x40] sm:$0xff] }
 0x428   : > { %2625 = vbcast.lane.b32.xlu1 %v5450_v43, 312  ;;  %2637 = vbcast.lane.b32.xlu0 %v5450_v43, 336 }
 0x42a   : > { %v5515_v23 = vpop.permute.xlu1 %2389  ;;  %v2405_v20 = vpop.permute.xlu0 %2404 }
 0x42b   : > { %v2878_v27 = vmul.f32 %v3947_v4, %v2405_v20 }
 0x42c   : > { %2633 = vbcast.lane.b32.xlu1 %v5450_v43, 328  ;;  %2668 = vbcast.lane.b32.xlu0 %v5453_v36, 264 }
 0x42e   : > { %v2401_v30 = vpop.permute.xlu1 %2400  ;;  %v2413_v13 = vpop.permute.xlu0 %2412 }
 0x42f   : > { %v2877_v37 = vmul.f32 %v3946_v3, %v2401_v30  ;;  %v2880_v9 = vmul.f32 %v3951_v51, %v2413_v13  ;;  %v3959_v30 = vld [vmem:[#allocation2 + $0xd0] sm:$0xff] }
 0x430   : > { %2664 = vbcast.lane.b32.xlu1 %v5453_v36, 256  ;;  %2735 = vbcast.lane.b32.xlu0 %v5456_v31, 264  ;;  %v3965_v51 = vld [vmem:[#allocation2 + $0xf0] sm:$0xff] }
 0x431   : > { %v3009_v61 = vadd.f32 %v2877_v37, %v2876_v52  ;;  %v2868_v52 = vmul.f32 %v3960_v50, %v5489_v41 }
 0x432   : > { %v2409_v38 = vpop.permute.xlu1 %2408  ;;  %v2421_v29 = vpop.permute.xlu0 %2420 }
 0x433   : > { %v2879_v0 = vmul.f32 %v3949_v44, %v2409_v38  ;;  %v3010_v2 = vadd.f32 %v3009_v61, %v2878_v27  ;;  %v2882_v60 = vmul.f32 %v3953_v25, %v2421_v29  ;;  %v3962_v61 = vld [vmem:[#allocation2 + $0x48] sm:$0xff]  ;;  %v2995_v19 = vadd.f32 %v2994_v24, %v2868_v52  ;;  %v3963_v38 = vld [vmem:[#allocation2 + $0xe0] sm:$0xff]  ;;  %v3968_v25 = vld [vmem:[#allocation2 + $0x58] sm:$0xff] }
 0x434   : > { %2731 = vbcast.lane.b32.xlu1 %v5456_v31, 256  ;;  %2798 = vbcast.lane.b32.xlu0 %v5459_v32, 256  ;;  %v2869_v59 = vmul.f32 %v3962_v61, %v5499_v54  ;;  %v3978_v61 = vld [vmem:[#allocation2 + $0x70] sm:$0xff] }
 0x435   : > { %v3011_v14 = vadd.f32 %v3010_v2, %v2879_v0 }
 0x436   : > { %v2417_v49 = vpop.permute.xlu1 %2416  ;;  %v2429_v62 = vpop.permute.xlu0 %2428  ;;  %v2996_v26 = vadd.f32 %v2995_v19, %v2869_v59  ;;  %v2874_v59 = vmul.f32 %v3978_v61, %v5507_v28  ;;  %v3991_v61 = vld [vmem:[#allocation2 + $0x190] sm:$0xff] }
 0x437   : > { %v2881_v55 = vmul.f32 %v3952_v18, %v2417_v49  ;;  %v3012_v45 = vadd.f32 %v3011_v14, %v2880_v9  ;;  %v2884_v7 = vmul.f32 %v3957_v42, %v2429_v62  ;;  %v3966_v14 = vld [vmem:[#allocation2 + $0x50] sm:$0xff]  ;;  %v2872_v42 = vmul.f32 %v3972_v46, %v5501_v8 }
 0x438   : > { %2672 = vbcast.lane.b32.xlu1 %v5453_v36, 272  ;;  %2739 = vbcast.lane.b32.xlu0 %v5456_v31, 272  ;;  %v2870_v49 = vmul.f32 %v3966_v14, %v5495_v58  ;;  %v3970_v58 = vld [vmem:[#allocation2 + $0x108] sm:$0xff] }
 0x439   : > { %v3013_v57 = vadd.f32 %v3012_v45, %v2881_v55  ;;  %v3967_v55 = vld [vmem:[#allocation2 + $0xf8] sm:$0xff]  ;;  %v3982_v14 = vld [vmem:[#allocation2 + $0x148] sm:$0xff] }
 0x43a   : > { %v2425_v17 = vpop.permute.xlu1 %2424  ;;  %v2437_v33 = vpop.permute.xlu0 %2436 }
 0x43b   : > { %v2883_v35 = vmul.f32 %v3955_v12, %v2425_v17  ;;  %v3014_v47 = vadd.f32 %v3013_v57, %v2882_v60  ;;  %v2886_v21 = vmul.f32 %v3959_v30, %v2437_v33  ;;  %v2871_v60 = vmul.f32 %v3968_v25, %v5505_v5  ;;  %v3969_v33 = vld [vmem:[#allocation2 + $0x100] sm:$0xff] }
 0x43c   : > { %2802 = vbcast.lane.b32.xlu1 %v5459_v32, 264  ;;  %2806 = vbcast.lane.b32.xlu0 %v5459_v32, 272  ;;  %v2997_v57 = vadd.f32 %v2996_v26, %v2870_v49  ;;  %v3975_v30 = vld [vmem:[#allocation2 + $0x120] sm:$0xff] }
 0x43d   : > { %v3015_v48 = vadd.f32 %v3014_v47, %v2883_v35 }
 0x43e   : > { %v2433_v20 = vpop.permute.xlu1 %2432  ;;  %v2445_v22 = vpop.permute.xlu0 %2444  ;;  %v2998_v47 = vadd.f32 %v2997_v57, %v2871_v60  ;;  %v3984_v60 = vld [vmem:[#allocation2 + $0x158] sm:$0xff] }
 0x43f   : > { %v2885_v34 = vmul.f32 %v3958_v63, %v2433_v20  ;;  %v3016_v1 = vadd.f32 %v3015_v48, %v2884_v7  ;;  %v2888_v29 = vmul.f32 %v3963_v38, %v2445_v22  ;;  %v3973_v20 = vld [vmem:[#allocation2 + $0x118] sm:$0xff] }
 0x440   : > { %2676 = vbcast.lane.b32.xlu1 %v5453_v36, 280  ;;  %2680 = vbcast.lane.b32.xlu0 %v5453_v36, 288  ;;  %v2999_v24 = vadd.f32 %v2998_v47, %v2872_v42 }
 0x441   : > { %v3017_v13 = vadd.f32 %v3016_v1, %v2885_v34  ;;  %v3974_v34 = vld [vmem:[#allocation2 + $0x68] sm:$0xff] }
 0x442   : > { %v2441_v3 = vpop.permute.xlu1 %2440  ;;  %v2453_v37 = vpop.permute.xlu0 %2452  ;;  %v2873_v1 = vmul.f32 %v3974_v34, %v5511_v56 }
 0x443   : > { %v2887_v4 = vmul.f32 %v3961_v15, %v2441_v3  ;;  %v3018_v27 = vadd.f32 %v3017_v13, %v2886_v21  ;;  %v2890_v54 = vmul.f32 %v3965_v51, %v2453_v37  ;;  %v3976_v3 = vld [vmem:[#allocation2 + $0x128] sm:$0xff] }
 0x444   : > { %2743 = vbcast.lane.b32.xlu1 %v5456_v31, 280  ;;  %2747 = vbcast.lane.b32.xlu0 %v5456_v31, 288  ;;  %v3000_v15 = vadd.f32 %v2999_v24, %v2873_v1  ;;  %v3988_v1 = vld [vmem:[#allocation2 + $0x178] sm:$0xff] }
 0x445   : > { %v3019_v44 = vadd.f32 %v3018_v27, %v2887_v4  ;;  %v3977_v4 = vld [vmem:[#allocation2 + $0x130] sm:$0xff] }
 0x446   : > { %v2449_v0 = vpop.permute.xlu1 %2448  ;;  %v2464_v2 = vpop.permute.xlu0 %2463 }
 0x447   : > { %v2889_v41 = vmul.f32 %v3964_v16, %v2449_v0  ;;  %v3020_v10 = vadd.f32 %v3019_v44, %v2888_v29  ;;  %v2892_v12 = vmul.f32 %v3969_v33, %v2464_v2  ;;  %v3979_v29 = vld [vmem:[#allocation2 + $0x138] sm:$0xff]  ;;  %v3985_v33 = vld [vmem:[#allocation2 + $0x160] sm:$0xff] }
 0x448   : > { %2810 = vbcast.lane.b32.xlu1 %v5459_v32, 280  ;;  %2814 = vbcast.lane.b32.xlu0 %v5459_v32, 288  ;;  %v3980_v2 = vld [vmem:[#allocation2 + $0x78] sm:$0xff] }
 0x449   : > { %v3021_v9 = vadd.f32 %v3020_v10, %v2889_v41  ;;  %v2875_v16 = vmul.f32 %v3980_v2, %v5515_v23  ;;  %v3001_v41 = vadd.f32 %v3000_v15, %v2874_v59  ;;  %v3981_v10 = vld [vmem:[#allocation2 + $0x140] sm:$0xff]  ;;  %v3990_v15 = vld [vmem:[#allocation2 + $0x188] sm:$0xff]  ;;  %v3992_v2 = vld [vmem:[#allocation2 + $0x198] sm:$0xff] }
 0x44a   : > { %v2457_v62 = vpop.permute.xlu1 %2456  ;;  %v2472_v18 = vpop.permute.xlu0 %2471 }
 0x44b   : > { %v2891_v45 = vmul.f32 %v3967_v55, %v2457_v62  ;;  %v3022_v53 = vadd.f32 %v3021_v9, %v2890_v54  ;;  %v2894_v5 = vmul.f32 %v3971_v39, %v2472_v18  ;;  %v3002_v62 = vadd.f32 %v3001_v41, %v2875_v16  ;;  %v3983_v18 = vld [vmem:[#allocation2 + $0x150] sm:$0xff] }
 0x44c   : > { %2684 = vbcast.lane.b32.xlu1 %v5453_v36, 296  ;;  %2688 = vbcast.lane.b32.xlu0 %v5453_v36, 304 }
 0x44d   : > { %v5541_v40 = vadd.f32 %v3022_v53, %v2891_v45 }
 0x44e   : > { %v2468_v11 = vpop.permute.xlu1 %2467  ;;  %v2480_v17 = vpop.permute.xlu0 %2479 }
 0x44f   : > { %v2893_v35 = vmul.f32 %v3970_v58, %v2468_v11  ;;  %v2896_v21 = vmul.f32 %v3975_v30, %v2480_v17  ;;  %v3024_v45 = vrot.slane %v5541_v40, 4  ;;  %v3003_v17 = vrot.slane %v3002_v62, 4 }
 0x450   : > { %2751 = vbcast.lane.b32.xlu1 %v5456_v31, 296  ;;  %2755 = vbcast.lane.b32.xlu0 %v5456_v31, 304 }
 0x451   : > { %v3030_v6 = vadd.f32 %v2893_v35, %v2892_v12  ;;  %v3025_v35 = vadd.f32 %v3024_v45, %v5541_v40  ;;  %v3004_v42 = vadd.f32 %v3003_v17, %v3002_v62 }
 0x452   : > { %v2476_v7 = vpop.permute.xlu1 %2475  ;;  %v2488_v48 = vpop.permute.xlu0 %2487 }
 0x453   : > { %v2895_v22 = vmul.f32 %v3973_v20, %v2476_v7  ;;  %v3031_v63 = vadd.f32 %v3030_v6, %v2894_v5  ;;  %v2898_v56 = vmul.f32 %v3977_v4, %v2488_v48  ;;  %v3986_v5 = vld [vmem:[#allocation2 + $0x168] sm:$0xff]  ;;  %v3987_v7 = vld [vmem:[#allocation2 + $0x170] sm:$0xff]  ;;  %v3005_v40 = vrot.slane %v3004_v42, 2 }
 0x454   : > { %2818 = vbcast.lane.b32.xlu1 %v5459_v32, 296  ;;  %2822 = vbcast.lane.b32.xlu0 %v5459_v32, 304 }
 0x455   : > { %v3032_v13 = vadd.f32 %v3031_v63, %v2895_v22  ;;  %v3026_v22 = vrot.slane %v3025_v35, 2 }
 0x456   : > { %v2484_v50 = vpop.permute.xlu1 %2483  ;;  %v2496_v52 = vpop.permute.xlu0 %2495 }
 0x457   : > { %v2897_v8 = vmul.f32 %v3976_v3, %v2484_v50  ;;  %v3033_v37 = vadd.f32 %v3032_v13, %v2896_v21  ;;  %v2900_v26 = vmul.f32 %v3981_v10, %v2496_v52  ;;  %v3027_v13 = vadd.f32 %v3026_v22, %v3025_v35  ;;  %v3989_v3 = vld [vmem:[#allocation2 + $0x180] sm:$0xff]  ;;  %v3999_v22 = vld [vmem:[#allocation2 + $0x1d0] sm:$0xff] }
 0x458   : > { %2692 = vbcast.lane.b32.xlu1 %v5453_v36, 312  ;;  %2696 = vbcast.lane.b32.xlu0 %v5453_v36, 320 }
 0x459   : > { %v3034_v27 = vadd.f32 %v3033_v37, %v2897_v8 }
 0x45a   : > { %v2492_v19 = vpop.permute.xlu1 %2491  ;;  %v2504_v38 = vpop.permute.xlu0 %2503 }
 0x45b   : > { %v2899_v44 = vmul.f32 %v3979_v29, %v2492_v19  ;;  %v3035_v0 = vadd.f32 %v3034_v27, %v2898_v56  ;;  %v2902_v23 = vmul.f32 %v3983_v18, %v2504_v38  ;;  %v3006_v56 = vadd.f32 %v3005_v40, %v3004_v42  ;;  %v3994_v18 = vld [vmem:[#allocation2 + $0x1a8] sm:$0xff] }
 0x45c   : > { %2759 = vbcast.lane.b32.xlu1 %v5456_v31, 312  ;;  %2763 = vbcast.lane.b32.xlu0 %v5456_v31, 320  ;;  %v3028_v38 = vrot.slane %v3027_v13, 1 }
 0x45d   : > { %v3036_v51 = vadd.f32 %v3035_v0, %v2899_v44  ;;  %v3007_v10 = vrot.slane %v3006_v56, 1 }
 0x45e   : > { %v2500_v54 = vpop.permute.xlu1 %2499  ;;  %v2512_v9 = vpop.permute.xlu0 %2511 }
 0x45f   : > { %v2901_v28 = vmul.f32 %v3982_v14, %v2500_v54  ;;  %v3037_v49 = vadd.f32 %v3036_v51, %v2900_v26  ;;  %v2904_v12 = vmul.f32 %v3985_v33, %v2512_v9  ;;  %v3993_v51 = vld [vmem:[#allocation2 + $0x1a0] sm:$0xff]  ;;  %v3029_v14 = vadd.f32 %v3028_v38, %v3027_v13  ;;  %v4004_v38 = vld [vmem:[#allocation2 + $0x1f8] sm:$0xff] }
 0x460   : > { %2826 = vbcast.lane.b32.xlu1 %v5459_v32, 312  ;;  %2830 = vbcast.lane.b32.xlu0 %v5459_v32, 320  ;;  %v3008_v45 = vadd.f32 %v3007_v10, %v3006_v56  ;;  %v4001_v13 = vld [vmem:[#allocation2 + $0x1e0] sm:$0xff]  ;;  %v4003_v56 = vld [vmem:[#allocation2 + $0x1f0] sm:$0xff] }
 0x461   : > { %v3038_v55 = vadd.f32 %v3037_v49, %v2901_v28 }
 0x462   : > { %v2508_v53 = vpop.permute.xlu1 %2507  ;;  %v2520_v25 = vpop.permute.xlu0 %2519 }
 0x463   : > { %v2903_v57 = vmul.f32 %v3984_v60, %v2508_v53  ;;  %v3039_v11 = vadd.f32 %v3038_v55, %v2902_v23  ;;  %v2906_v48 = vmul.f32 %v3987_v7, %v2520_v25  ;;  %v3995_v25 = vld [vmem:[#allocation2 + $0x1b0] sm:$0xff]  ;;  %v3998_v7 = vld [vmem:[#allocation2 + $0x1c8] sm:$0xff] }
 0x464   : > { %2700 = vbcast.lane.b32.xlu1 %v5453_v36, 328  ;;  %2704 = vbcast.lane.b32.xlu0 %v5453_v36, 336 }
 0x465   : > { %v3040_v58 = vadd.f32 %v3039_v11, %v2903_v57  ;;  %v3164_v11 = vsel %vm2211_vm0, %v3029_v14, %v3008_v45 }
 0x466   : > { %v2516_v47 = vpop.permute.xlu1 %2515  ;;  %v2531_v39 = vpop.permute.xlu0 %2530 }
 0x467   : > { %v2905_v6 = vmul.f32 %v3986_v5, %v2516_v47  ;;  %v3041_v46 = vadd.f32 %v3040_v58, %v2904_v12  ;;  %v2908_v8 = vmul.f32 %v3989_v3, %v2531_v39  ;;  %v3996_v58 = vld [vmem:[#allocation2 + $0x1b8] sm:$0xff]  ;;  %v3997_v39 = vld [vmem:[#allocation2 + $0x1c0] sm:$0xff] }
 0x468   : > { %2767 = vbcast.lane.b32.xlu1 %v5456_v31, 328  ;;  %2641 = vbcast.lane.b32.xlu0 %v5450_v43, 344 }
 0x469   : > { %v3042_v20 = vadd.f32 %v3041_v46, %v2905_v6 }
 0x46a   : > { %v2524_v63 = vpop.permute.xlu1 %2523  ;;  %v2539_v34 = vpop.permute.xlu0 %2538 }
 0x46b   : > { %v2907_v24 = vmul.f32 %v3988_v1, %v2524_v63  ;;  %v3043_v30 = vadd.f32 %v3042_v20, %v2906_v48  ;;  %v2910_v59 = vmul.f32 %v3991_v61, %v2539_v34 }
 0x46c   : > { %2834 = vbcast.lane.b32.xlu1 %v5459_v32, 328  ;;  %2708 = vbcast.lane.b32.xlu0 %v5453_v36, 344 }
 0x46d   : > { %v3044_v21 = vadd.f32 %v3043_v30, %v2907_v24  ;;  %v4000_v30 = vld [vmem:[#allocation2 + $0x1d8] sm:$0xff] }
 0x46e   : > { %v2535_v50 = vpop.permute.xlu1 %2534  ;;  %v2547_v52 = vpop.permute.xlu0 %2546 }
 0x46f   : > { %v3045_v37 = vrot.slane %v3044_v21, 4  ;;  %v2909_v4 = vmul.f32 %v3990_v15, %v2535_v50  ;;  %v2912_v54 = vmul.f32 %v3993_v51, %v2547_v52  ;;  %v4006_v51 = vld [vmem:[#allocation2 + $0x208] sm:$0xff] }
 0x470   : > { %2771 = vbcast.lane.b32.xlu1 %v5456_v31, 336  ;;  %2645 = vbcast.lane.b32.xlu0 %v5450_v43, 352 }
 0x471   : > { %v3046_v27 = vadd.f32 %v3045_v37, %v3044_v21  ;;  %v3051_v19 = vadd.f32 %v2909_v4, %v2908_v8  ;;  %v4002_v37 = vld [vmem:[#allocation2 + $0x1e8] sm:$0xff] }
 0x472   : > { %v2543_v29 = vpop.permute.xlu1 %2542  ;;  %v2555_v44 = vpop.permute.xlu0 %2554 }
 0x473   : > { %v3047_v0 = vrot.slane %v3046_v27, 2  ;;  %v2911_v16 = vmul.f32 %v3992_v2, %v2543_v29  ;;  %v3052_v41 = vadd.f32 %v3051_v19, %v2910_v59  ;;  %v2914_v60 = vmul.f32 %v3995_v25, %v2555_v44 }
 0x474   : > { %2838 = vbcast.lane.b32.xlu1 %v5459_v32, 336  ;;  %2712 = vbcast.lane.b32.xlu0 %v5453_v36, 352 }
 0x475   : > { %v3048_v26 = vadd.f32 %v3047_v0, %v3046_v27  ;;  %v3053_v9 = vadd.f32 %v3052_v41, %v2911_v16  ;;  %v4005_v41 = vld [vmem:[#allocation2 + $0x200] sm:$0xff] }
 0x476   : > { %v2551_v28 = vpop.permute.xlu1 %2550  ;;  %v2563_v49 = vpop.permute.xlu0 %2562 }
 0x477   : > { %v3049_v62 = vrot.slane %v3048_v26, 1  ;;  %v2913_v23 = vmul.f32 %v3994_v18, %v2551_v28  ;;  %v3054_v55 = vadd.f32 %v3053_v9, %v2912_v54  ;;  %v2916_v5 = vmul.f32 %v3997_v39, %v2563_v49  ;;  %v4007_v9 = vld [vmem:[#allocation2 + $0x210] sm:$0xff] }
 0x478   : > { %2775 = vbcast.lane.b32.xlu1 %v5456_v31, 344  ;;  %2649 = vbcast.lane.b32.xlu0 %v5450_v43, 360 }
 0x479   : > { %v3050_v53 = vadd.f32 %v3049_v62, %v3048_v26  ;;  %v3055_v57 = vadd.f32 %v3054_v55, %v2913_v23 }
 0x47a   : > { %v2559_v17 = vpop.permute.xlu1 %2558  ;;  %v2571_v33 = vpop.permute.xlu0 %2570 }
 0x47b   : > { %v5573_v12 = vsel %vm2214_vm1, %v3050_v53, %v3164_v11  ;;  %v2915_v35 = vmul.f32 %v3996_v58, %v2559_v17  ;;  %v3056_v47 = vadd.f32 %v3055_v57, %v2914_v60  ;;  %v2918_v63 = vmul.f32 %v3999_v22, %v2571_v33  ;;  %v4009_v53 = vld [vmem:[#allocation2 + $0x220] sm:$0xff]  ;;  %v4010_v17 = vld [vmem:[#allocation2 + $0x228] sm:$0xff] }
 0x47c   : > { %2842 = vbcast.lane.b32.xlu1 %v5459_v32, 344  ;;  %2716 = vbcast.lane.b32.xlu0 %v5453_v36, 360  ;;  %v4013_v22 = vld [vmem:[#allocation2 + $0x240] sm:$0xff] }
 0x47d   : > { %v3057_v6 = vadd.f32 %v3056_v47, %v2915_v35  ;;  %v4011_v47 = vld [vmem:[#allocation2 + $0x230] sm:$0xff] }
 0x47e   : > { %v2567_v46 = vpop.permute.xlu1 %2566  ;;  %v2579_v42 = vpop.permute.xlu0 %2578 }
 0x47f   : > { %v2917_v48 = vmul.f32 %v3998_v7, %v2567_v46  ;;  %v3058_v20 = vadd.f32 %v3057_v6, %v2916_v5  ;;  %v2920_v50 = vmul.f32 %v4001_v13, %v2579_v42  ;;  %v4012_v42 = vld [vmem:[#allocation2 + $0x238] sm:$0xff] }
 0x480   : > { %2779 = vbcast.lane.b32.xlu1 %v5456_v31, 352  ;;  %2653 = vbcast.lane.b32.xlu0 %v5450_v43, 368 }
 0x481   : > { %v3059_v34 = vadd.f32 %v3058_v20, %v2917_v48 }
 0x482   : > { %v2575_v1 = vpop.permute.xlu1 %2574  ;;  %v2587_v24 = vpop.permute.xlu0 %2586 }
 0x483   : > { %v2919_v40 = vmul.f32 %v4000_v30, %v2575_v1  ;;  %v3060_v21 = vadd.f32 %v3059_v34, %v2918_v63  ;;  %v2922_v27 = vmul.f32 %v4003_v56, %v2587_v24  ;;  %v4014_v24 = vld [vmem:[#allocation2 + $0x248] sm:$0xff] }
 0x484   : > { %2846 = vbcast.lane.b32.xlu1 %v5459_v32, 352  ;;  %2720 = vbcast.lane.b32.xlu0 %v5453_v36, 368 }
 0x485   : > { %v3061_v52 = vadd.f32 %v3060_v21, %v2919_v40 }
 0x486   : > { %v2583_v3 = vpop.permute.xlu1 %2582  ;;  %v2598_v8 = vpop.permute.xlu0 %2597 }
 0x487   : > { %v2921_v15 = vmul.f32 %v4002_v37, %v2583_v3  ;;  %v3062_v4 = vadd.f32 %v3061_v52, %v2920_v50  ;;  %v2924_v10 = vmul.f32 %v4005_v41, %v2598_v8 }
 0x488   : > { %2783 = vbcast.lane.b32.xlu1 %v5456_v31, 360  ;;  %2657 = vbcast.lane.b32.xlu0 %v5450_v43, 376 }
 0x489   : > { %v3063_v61 = vadd.f32 %v3062_v4, %v2921_v15 }
 0x48a   : > { %v2591_v59 = vpop.permute.xlu1 %2590  ;;  %v2606_v19 = vpop.permute.xlu0 %2605 }
 0x48b   : > { %v2923_v29 = vmul.f32 %v4004_v38, %v2591_v59  ;;  %v3064_v44 = vadd.f32 %v3063_v61, %v2922_v27  ;;  %v2926_v14 = vmul.f32 %v4007_v9, %v2606_v19 }
 0x48c   : > { %2850 = vbcast.lane.b32.xlu1 %v5459_v32, 360  ;;  %2724 = vbcast.lane.b32.xlu0 %v5453_v36, 376  ;;  %v4008_v36 = vld [vmem:[#allocation2 + $0x218] sm:$0xff] }
 0x48d   : > { %v3065_v0 = vadd.f32 %v3064_v44, %v2923_v29 }
 0x48e   : > { %v2602_v2 = vpop.permute.xlu1 %2601  ;;  %v2614_v16 = vpop.permute.xlu0 %2613 }
 0x48f   : > { %v3066_v26 = vrot.slane %v3065_v0, 4  ;;  %v2925_v43 = vmul.f32 %v4006_v51, %v2602_v2  ;;  %v2928_v25 = vmul.f32 %v4009_v53, %v2614_v16 }
 0x490   : > { %2787 = vbcast.lane.b32.xlu1 %v5456_v31, 368  ;;  %2791 = vbcast.lane.b32.xlu0 %v5456_v31, 376 }
 0x491   : > { %v3067_v54 = vadd.f32 %v3066_v26, %v3065_v0  ;;  %v3072_v28 = vadd.f32 %v2925_v43, %v2924_v10 }
 0x492   : > { %v2610_v49 = vpop.permute.xlu1 %2609  ;;  %v2622_v62 = vpop.permute.xlu0 %2621 }
 0x493   : > { %v3068_v18 = vrot.slane %v3067_v54, 2  ;;  %v2927_v23 = vmul.f32 %v4008_v36, %v2610_v49  ;;  %v3073_v55 = vadd.f32 %v3072_v28, %v2926_v14  ;;  %v2930_v39 = vmul.f32 %v4011_v47, %v2622_v62 }
 0x494   : > { %2854 = vbcast.lane.b32.xlu1 %v5459_v32, 368 }
 0x495   : > { %v3069_v45 = vadd.f32 %v3068_v18, %v3067_v54  ;;  %v3074_v60 = vadd.f32 %v3073_v55, %v2927_v23 }
 0x496   : > { %v2618_v57 = vpop.permute.xlu1 %2617  ;;  %v2630_v11 = vpop.permute.xlu0 %2629 }
 0x497   : > { %v3070_v31 = vrot.slane %v3069_v45, 1  ;;  %v2929_v33 = vmul.f32 %v4010_v17, %v2618_v57  ;;  %v3075_v58 = vadd.f32 %v3074_v60, %v2928_v25  ;;  %v2932_v63 = vmul.f32 %v4013_v22, %v2630_v11 }
 0x498   : > { %2858 = vbcast.lane.b32.xlu1 %v5459_v32, 376 }
 0x499   : > { %v3071_v35 = vadd.f32 %v3070_v31, %v3069_v45  ;;  %v3076_v5 = vadd.f32 %v3075_v58, %v2929_v33 }
 0x49a   : > { %v2626_v6 = vpop.permute.xlu1 %2625  ;;  %v2638_v46 = vpop.permute.xlu0 %2637 }
 0x49b   : > { %v2931_v7 = vmul.f32 %v4012_v42, %v2626_v6  ;;  %v3077_v48 = vadd.f32 %v3076_v5, %v2930_v39  ;;  %v5591_v20 = vsel %vm2217_vm2, %v3071_v35, %v5573_v12  ;;  %v4015_v12 = vld [vmem:[#allocation2 + $0x250] sm:$0xff] }
 0x49c   : > { %v2934_v21 = vmul.f32 %v4015_v12, %v2638_v46 }
 0x49d   : > { %v3078_v32 = vadd.f32 %v3077_v48, %v2931_v7 }
 0x49e   : > { %v2634_v34 = vpop.permute.xlu1 %2633  ;;  %v2669_v1 = vpop.permute.xlu0 %2668 }
 0x49f   : > { %v2933_v30 = vmul.f32 %v4014_v24, %v2634_v34  ;;  %v3079_v40 = vadd.f32 %v3078_v32, %v2932_v63 }
 0x4a1   : > { %v3080_v13 = vadd.f32 %v3079_v40, %v2933_v30 }
 0x4a2   : > { %4116 = shalt.err (!%p4113_p7)
}
 0x4a3   : > { %s4117_s14 = scalar_lea.hbm %s5599_s21, 128  ;;  %s4121_s18 = scalar_lea.hbm %s5736_s4, 256 }
 0x4a4   : > { %p4118_p10 = scmp.ne.s32.totalorder %s5599_s21, %s4117_s14  ;;  %p4122_p13 = scmp.lt.u32.totalorder %s5599_s21, %s5736_s4 }
 0x4a5   : > { %p4123_p0 = scmp.lt.u32.totalorder %s4121_s18, %s4117_s14  ;;  %p4125_p1 = scmp.lt.u32.totalorder %s4117_s14, %s5599_s21 }
 0x4a6   : > { %p4119_p11 = pnand %p4118_p10, %p4316_p8 }
 0x4a7   : > { %p4124_p9 = por %p4123_p0, %p4122_p13 }
 0x4a8   : > { %p4120_p12 = pneg %p4119_p11 }
 0x4a9   : > { %p4126_p2 = por %p4125_p1, %p4124_p9 }
 0x4ab   : > { %p4127_p3 = pnand %p4126_p2, %p4120_p12 }
 0x4ad   : > { %4130 = shalt.err (!%p4127_p3)
}
 0x4ae   : > { %3588 = dma.vmem_to_hbm [thread:$0]  (%p4316_p8), %s5602_s22, 128, %s5599_s21, %s3203_s23   ;;  %v2665_v50 = vpop.permute.xlu1 %2664  ;;  %v2736_v52 = vpop.permute.xlu0 %2735  ;;  %v4016_v3 = vld [vmem:[#allocation2 + $0x288] sm:$0xff]  ;;  %v4017_v37 = vld [vmem:[#allocation2 + $0x280] sm:$0xff]  ;;  %v5626_v4 = vadd.f32 %v3080_v13, %v2934_v21  ;;  %v4020_v16 = vld [vmem:[#allocation2 + $0x290] sm:$0xff] }
 0x4af   : > { %v2941_v8 = vmul.f32 %v4016_v3, %v2669_v1  ;;  %v2940_v15 = vmul.f32 %v4017_v37, %v2665_v50  ;;  %v4018_v59 = vld [vmem:[#allocation2 + $0x308] sm:$0xff]  ;;  %v4019_v38 = vld [vmem:[#allocation2 + $0x300] sm:$0xff]  ;;  %v4023_v42 = vld [vmem:[#allocation2 + $0x298] sm:$0xff]  ;;  %s3216_s19 = sshll.u32 %s4331_s13, 4  ;;  %s5687_s26 = scalar_lea.hbm %s5735_s3, %s3350_s15  ;;  %s5689_s19 = int_to_ptr.vmem [resolvable:$true] %s3216_s19 }
 0x4b0   : > { %v2957_v19 = vmul.f32 %v4018_v59, %v2736_v52  ;;  %v4021_v43 = vld [vmem:[#allocation2 + $0x380] sm:$0xff]  ;;  %v4022_v9 = vld [vmem:[#allocation2 + $0x388] sm:$0xff]  ;;  %v4024_v32 = vld [vmem:[#allocation2 + $0x310] sm:$0xff]  ;;  %s3198_s30 = scalar_lea.sflag [#allocation7], %s4327_s10  ;;  %s4131_s9 = scalar_lea.vmem %s5689_s19, 128 }
 0x4b1   : > { %v3093_v56 = vadd.f32 %v2941_v8, %v2940_v15  ;;  %v4025_v30 = vld [vmem:[#allocation2 + $0x2a0] sm:$0xff]  ;;  %v4026_v12 = vld [vmem:[#allocation2 + $0x2a8] sm:$0xff]  ;;  %v4027_v13 = vld [vmem:[#allocation2 + $0x318] sm:$0xff]  ;;  %p4132_p4 = scmp.ne.s32.totalorder %s5689_s19, %s4131_s9  ;;  %s4240_s0 = smov [#allocation6]  }
 0x4b2   : > { %v2732_v27 = vpop.permute.xlu1 %2731  ;;  %v2799_v61 = vpop.permute.xlu0 %2798  ;;  %v4029_v59 = vld [vmem:[#allocation2 + $0x2b8] sm:$0xff]  ;;  %s4135_s11 = sshll.u32 %s4240_s0, 4  ;;  %s4136_s11 = int_to_ptr.vmem [resolvable:$false] %s4135_s11 }
 0x4b3   : > { %v2956_v29 = vmul.f32 %v4019_v38, %v2732_v27  ;;  %v2972_v54 = vmul.f32 %v4021_v43, %v2799_v61  ;;  %v4028_v27 = vld [vmem:[#allocation2 + $0x2b0] sm:$0xff]  ;;  %p4133_p5 = pnand %p4132_p4, %p4316_p8  ;;  %s4137_s16 = scalar_lea.vmem %s4136_s11, 256 }
 0x4b4   : > { %v4030_v38 = vld [vmem:[#allocation2 + $0x390] sm:$0xff]  ;;  %p4138_p7 = scmp.lt.s32.totalorder %s5689_s19, %s4136_s11  ;;  %p4139_p10 = scmp.lt.s32.totalorder %s4137_s16, %s4131_s9 }
 0x4b5   : > { %v3114_v44 = vadd.f32 %v2957_v19, %v2956_v29  ;;  %p4134_p6 = pneg %p4133_p5 }
 0x4b6   : > { %v2673_v0 = vpop.permute.xlu1 %2672  ;;  %v2740_v2 = vpop.permute.xlu0 %2739  ;;  %p4140_p11 = por %p4139_p10, %p4138_p7 }
 0x4b7   : > { %v2942_v41 = vmul.f32 %v4020_v16, %v2673_v0  ;;  %v2958_v34 = vmul.f32 %v4024_v32, %v2740_v2  ;;  %v4031_v0 = vld [vmem:[#allocation2 + $0x320] sm:$0xff]  ;;  %v4032_v16 = vld [vmem:[#allocation2 + $0x398] sm:$0xff]  ;;  %v4038_v32 = vld [vmem:[#allocation2 + $0x3a8] sm:$0xff] }
 0x4b8   : > { %p4141_p12 = pnand %p4140_p11, %p4134_p6 }
 0x4b9   : > { %v3094_v10 = vadd.f32 %v3093_v56, %v2942_v41  ;;  %v3115_v3 = vadd.f32 %v3114_v44, %v2958_v34  ;;  %v4039_v34 = vld [vmem:[#allocation2 + $0x338] sm:$0xff] }
 0x4ba   : > { %v2803_v26 = vpop.permute.xlu1 %2802  ;;  %v2807_v51 = vpop.permute.xlu0 %2806 }
 0x4bb   : > { %v2973_v14 = vmul.f32 %v4022_v9, %v2803_v26  ;;  %v2974_v29 = vmul.f32 %v4030_v38, %v2807_v51 }
 0x4bd   : > { %v3135_v28 = vadd.f32 %v2973_v14, %v2972_v54 }
 0x4be   : > { %v2677_v49 = vpop.permute.xlu1 %2676  ;;  %v2681_v62 = vpop.permute.xlu0 %2680 }
 0x4bf   : > { %v2943_v7 = vmul.f32 %v4023_v42, %v2677_v49  ;;  %v2944_v40 = vmul.f32 %v4025_v30, %v2681_v62  ;;  %v3136_v9 = vadd.f32 %v3135_v28, %v2974_v29  ;;  %v4035_v42 = vld [vmem:[#allocation2 + $0x2c8] sm:$0xff]  ;;  %v4046_v29 = vld [vmem:[#allocation2 + $0x340] sm:$0xff] }
 0x4c1   : > { %v3095_v63 = vadd.f32 %v3094_v10, %v2943_v7  ;;  %v4033_v10 = vld [vmem:[#allocation2 + $0x328] sm:$0xff]  ;;  %v4036_v7 = vld [vmem:[#allocation2 + $0x3a0] sm:$0xff] }
 0x4c2   : > { %v2744_v18 = vpop.permute.xlu1 %2743  ;;  %v2748_v36 = vpop.permute.xlu0 %2747 }
 0x4c3   : > { %v2959_v50 = vmul.f32 %v4027_v13, %v2744_v18  ;;  %v3096_v52 = vadd.f32 %v3095_v63, %v2944_v40  ;;  %v2960_v2 = vmul.f32 %v4031_v0, %v2748_v36 }
 0x4c5   : > { %v3116_v56 = vadd.f32 %v3115_v3, %v2959_v50 }
 0x4c6   : > { %v2811_v23 = vpop.permute.xlu1 %2810  ;;  %v5628_v55 = vpop.permute.xlu0 %2814 }
 0x4c7   : > { %v2975_v41 = vmul.f32 %v4032_v16, %v2811_v23  ;;  %v3117_v14 = vadd.f32 %v3116_v56, %v2960_v2  ;;  %v2976_v23 = vmul.f32 %v4036_v7, %v5628_v55  ;;  %v4047_v2 = vld [vmem:[#allocation2 + $0x3b8] sm:$0xff]  ;;  %v4048_v16 = vld [vmem:[#allocation2 + $0x348] sm:$0xff] }
 0x4c9   : > { %v3137_v62 = vadd.f32 %v3136_v9, %v2975_v41 }
 0x4ca   : > { %v2685_v45 = vpop.permute.xlu1 %2684  ;;  %v2689_v53 = vpop.permute.xlu0 %2688 }
 0x4cb   : > { %v2945_v21 = vmul.f32 %v4026_v12, %v2685_v45  ;;  %v2946_v61 = vmul.f32 %v4028_v27, %v2689_v53  ;;  %v4040_v12 = vld [vmem:[#allocation2 + $0x258] sm:$0xff]  ;;  %v3138_v13 = vadd.f32 %v3137_v62, %v2976_v23  ;;  %v4042_v27 = vld [vmem:[#allocation2 + $0x2d0] sm:$0xff] }
 0x4cd   : > { %v3097_v15 = vadd.f32 %v3096_v52, %v2945_v21 }
 0x4ce   : > { %v2752_v25 = vpop.permute.xlu1 %2751  ;;  %v5630_v60 = vpop.permute.xlu0 %2755 }
 0x4cf   : > { %v2961_v26 = vmul.f32 %v4033_v10, %v2752_v25  ;;  %v3098_v54 = vadd.f32 %v3097_v15, %v2946_v61  ;;  %v4037_v25 = vld [vmem:[#allocation2 + $0x330] sm:$0xff] }
 0x4d0   : > { %v2962_v63 = vmul.f32 %v4037_v25, %v5630_v60 }
 0x4d1   : > { %v3118_v18 = vadd.f32 %v3117_v14, %v2961_v26 }
 0x4d2   : > { %v5632_v57 = vpop.permute.xlu1 %2818  ;;  %v5634_v11 = vpop.permute.xlu0 %2822 }
 0x4d3   : > { %v2977_v28 = vmul.f32 %v4038_v32, %v5632_v57  ;;  %v3119_v50 = vadd.f32 %v3118_v18, %v2962_v63  ;;  %v4043_v57 = vld [vmem:[#allocation2 + $0x2d8] sm:$0xff]  ;;  %v4054_v63 = vld [vmem:[#allocation2 + $0x2f0] sm:$0xff] }
 0x4d5   : > { %v3139_v56 = vadd.f32 %v3138_v13, %v2977_v28  ;;  %v4055_v28 = vld [vmem:[#allocation2 + $0x278] sm:$0xff]  ;;  %v4058_v13 = vld [vmem:[#allocation2 + $0x360] sm:$0xff] }
 0x4d6   : > { %v2693_v31 = vpop.permute.xlu1 %2692  ;;  %v2697_v17 = vpop.permute.xlu0 %2696 }
 0x4d7   : > { %v2947_v19 = vmul.f32 %v4029_v59, %v2693_v31  ;;  %v4034_v31 = vld [vmem:[#allocation2 + $0x2c0] sm:$0xff]  ;;  %v4044_v59 = vld [vmem:[#allocation2 + $0x268] sm:$0xff] }
 0x4d8   : > { %v2948_v51 = vmul.f32 %v4034_v31, %v2697_v17 }
 0x4d9   : > { %v3099_v49 = vadd.f32 %v3098_v54, %v2947_v19  ;;  %v4049_v54 = vld [vmem:[#allocation2 + $0x2e0] sm:$0xff] }
 0x4da   : > { %v2760_v33 = vpop.permute.xlu1 %2759  ;;  %v5636_v58 = vpop.permute.xlu0 %2763 }
 0x4db   : > { %v2963_v30 = vmul.f32 %v4039_v34, %v2760_v33  ;;  %v3100_v40 = vadd.f32 %v3099_v49, %v2948_v51  ;;  %v2964_v0 = vmul.f32 %v4046_v29, %v5636_v58  ;;  %v4051_v49 = vld [vmem:[#allocation2 + $0x350] sm:$0xff] }
 0x4dd   : > { %v3120_v55 = vadd.f32 %v3119_v50, %v2963_v30  ;;  %v4056_v30 = vld [vmem:[#allocation2 + $0x3c0] sm:$0xff] }
 0x4de   : > { %v5638_v35 = vpop.permute.xlu1 %2826  ;;  %v5640_v47 = vpop.permute.xlu0 %2830 }
 0x4e2   : > { %v2701_v39 = vpop.permute.xlu1 %2700  ;;  %v5642_v5 = vpop.permute.xlu0 %2704 }
 0x4e3   : > { %v2949_v36 = vmul.f32 %v4035_v42, %v2701_v39  ;;  %v4041_v39 = vld [vmem:[#allocation2 + $0x260] sm:$0xff]  ;;  %v2950_v60 = vmul.f32 %v4042_v27, %v5642_v5  ;;  %v4053_v42 = vld [vmem:[#allocation2 + $0x358] sm:$0xff] }
 0x4e5   : > { %v3101_v3 = vadd.f32 %v3100_v40, %v2949_v36  ;;  %v4057_v40 = vld [vmem:[#allocation2 + $0x3c8] sm:$0xff] }
 0x4e6   : > { %v5644_v6 = vpop.permute.xlu1 %2767  ;;  %v2642_v46 = vpop.permute.xlu0 %2641 }
 0x4e7   : > { %v2935_v21 = vmul.f32 %v4040_v12, %v2642_v46  ;;  %v4045_v46 = vld [vmem:[#allocation2 + $0x3b0] sm:$0xff]  ;;  %v2965_v41 = vmul.f32 %v4048_v16, %v5644_v6 }
 0x4e8   : > { %v2978_v38 = vmul.f32 %v4045_v46, %v5634_v11  ;;  %v3121_v11 = vadd.f32 %v3120_v55, %v2964_v0  ;;  %v4063_v0 = vld [vmem:[#allocation2 + $0x3e0] sm:$0xff] }
 0x4e9   : > { %v3082_v61 = vadd.f32 %v5626_v4, %v2935_v21  ;;  %v3102_v4 = vadd.f32 %v3101_v3, %v2950_v60  ;;  %v4059_v3 = vld [vmem:[#allocation2 + $0x3d0] sm:$0xff]  ;;  %v4060_v60 = vld [vmem:[#allocation2 + $0x368] sm:$0xff] }
 0x4ea   : > { %v5646_v48 = vpop.permute.xlu1 %2834  ;;  %v5648_v22 = vpop.permute.xlu0 %2708  ;;  %v3140_v14 = vadd.f32 %v3139_v56, %v2978_v38  ;;  %v3122_v6 = vadd.f32 %v3121_v11, %v2965_v41 }
 0x4eb   : > { %v2951_v33 = vmul.f32 %v4043_v57, %v5648_v22  ;;  %v2981_v12 = vmul.f32 %v4057_v40, %v5646_v48  ;;  %v4062_v48 = vld [vmem:[#allocation2 + $0x3d8] sm:$0xff] }
 0x4ed   : > { %v3103_v62 = vadd.f32 %v3102_v4, %v2951_v33  ;;  %v4064_v4 = vld [vmem:[#allocation2 + $0x370] sm:$0xff] }
 0x4ee   : > { %v5650_v1 = vpop.permute.xlu1 %2771  ;;  %v2646_v24 = vpop.permute.xlu0 %2645 }
 0x4ef   : > { %v2936_v15 = vmul.f32 %v4041_v39, %v2646_v24  ;;  %v2979_v24 = vmul.f32 %v4047_v2, %v5638_v35  ;;  %v2966_v58 = vmul.f32 %v4051_v49, %v5650_v1  ;;  %v4052_v35 = vld [vmem:[#allocation2 + $0x2e8] sm:$0xff]  ;;  %v2980_v1 = vmul.f32 %v4056_v30, %v5640_v47  ;;  %v4061_v47 = vld [vmem:[#allocation2 + $0x2f8] sm:$0xff] }
 0x4f1   : > { %v3083_v26 = vadd.f32 %v3082_v61, %v2936_v15  ;;  %v3141_v51 = vadd.f32 %v3140_v14, %v2979_v24 }
 0x4f2   : > { %v5652_v8 = vpop.permute.xlu1 %2838  ;;  %v5654_v37 = vpop.permute.xlu0 %2712 }
 0x4f3   : > { %v2952_v22 = vmul.f32 %v4049_v54, %v5654_v37  ;;  %v2982_v39 = vmul.f32 %v4059_v3, %v5652_v8 }
 0x4f5   : > { %v3104_v25 = vadd.f32 %v3103_v62, %v2952_v22  ;;  %v4065_v22 = vld [vmem:[#allocation2 + $0x3e8] sm:$0xff] }
 0x4f6   : > { %v5656_v43 = vpop.permute.xlu1 %2775  ;;  %v2650_v44 = vpop.permute.xlu0 %2649 }
 0x4f7   : > { %v2937_v19 = vmul.f32 %v4044_v59, %v2650_v44  ;;  %v4050_v44 = vld [vmem:[#allocation2 + $0x270] sm:$0xff]  ;;  %v2967_v36 = vmul.f32 %v4053_v42, %v5656_v43  ;;  %v3142_v43 = vadd.f32 %v3141_v51, %v2980_v1 }
 0x4f9   : > { %v3084_v18 = vadd.f32 %v3083_v26, %v2937_v19  ;;  %v3143_v59 = vadd.f32 %v3142_v43, %v2981_v12 }
 0x4fa   : > { %v5658_v45 = vpop.permute.xlu1 %2842  ;;  %v2717_v53 = vpop.permute.xlu0 %2716 }
 0x4fb   : > { %v2953_v31 = vmul.f32 %v4052_v35, %v2717_v53  ;;  %v3123_v53 = vadd.f32 %v3122_v6, %v2966_v58  ;;  %v2983_v19 = vmul.f32 %v4062_v48, %v5658_v45  ;;  %v3144_v29 = vadd.f32 %v3143_v59, %v2982_v39  ;;  %v4066_v45 = vld [vmem:[#allocation2 + $0x378] sm:$0xff] }
 0x4fd   : > { %v3105_v21 = vadd.f32 %v3104_v25, %v2953_v31  ;;  %v3124_v15 = vadd.f32 %v3123_v53, %v2967_v36  ;;  %v3145_v54 = vadd.f32 %v3144_v29, %v2983_v19  ;;  %v4067_v31 = vld [vmem:[#allocation2 + $0x3f0] sm:$0xff] }
 0x4fe   : > { %v2780_v52 = vpop.permute.xlu1 %2779  ;;  %v2654_v17 = vpop.permute.xlu0 %2653 }
 0x4ff   : > { %v2938_v9 = vmul.f32 %v4050_v44, %v2654_v17  ;;  %v2968_v50 = vmul.f32 %v4058_v13, %v2780_v52 }
 0x501   : > { %v3085_v37 = vadd.f32 %v3084_v18, %v2938_v9  ;;  %v3125_v46 = vadd.f32 %v3124_v15, %v2968_v50 }
 0x502   : > { %v2847_v5 = vpop.permute.xlu1 %2846  ;;  %v2721_v10 = vpop.permute.xlu0 %2720 }
 0x503   : > { %v2954_v32 = vmul.f32 %v4054_v63, %v2721_v10  ;;  %v2984_v2 = vmul.f32 %v4063_v0, %v2847_v5 }
 0x505   : > { %v3106_v27 = vadd.f32 %v3105_v21, %v2954_v32  ;;  %v3146_v58 = vadd.f32 %v3145_v54, %v2984_v2  ;;  %v4068_v32 = vld [vmem:[#allocation2 + $0x3f8] sm:$0xff] }
 0x506   : > { %v2784_v7 = vpop.permute.xlu1 %2783  ;;  %v2658_v23 = vpop.permute.xlu0 %2657 }
 0x507   : > { %v2939_v34 = vmul.f32 %v4055_v28, %v2658_v23  ;;  %v2969_v61 = vmul.f32 %v4060_v60, %v2784_v7 }
 0x509   : > { %v3086_v17 = vadd.f32 %v3085_v37, %v2939_v34  ;;  %v3126_v16 = vadd.f32 %v3125_v46, %v2969_v61 }
 0x50a   : > { %v2851_v56 = vpop.permute.xlu1 %2850  ;;  %v2725_v55 = vpop.permute.xlu0 %2724 }
 0x50b   : > { %v3087_v57 = vrot.slane %v3086_v17, 4  ;;  %v2955_v33 = vmul.f32 %v4061_v47, %v2725_v55  ;;  %v2985_v44 = vmul.f32 %v4065_v22, %v2851_v56 }
 0x50d   : > { %v3088_v52 = vadd.f32 %v3087_v57, %v3086_v17  ;;  %v3107_v38 = vadd.f32 %v3106_v27, %v2955_v33  ;;  %v3147_v6 = vadd.f32 %v3146_v58, %v2985_v44 }
 0x50e   : > { %v2788_v8 = vpop.permute.xlu1 %2787  ;;  %v2792_v24 = vpop.permute.xlu0 %2791 }
 0x50f   : > { %v3089_v41 = vrot.slane %v3088_v52, 2  ;;  %v3108_v10 = vrot.slane %v3107_v38, 4  ;;  %v2970_v26 = vmul.f32 %v4064_v4, %v2788_v8  ;;  %v2971_v49 = vmul.f32 %v4066_v45, %v2792_v24 }
 0x511   : > { %v3090_v9 = vadd.f32 %v3089_v41, %v3088_v52  ;;  %v3109_v14 = vadd.f32 %v3108_v10, %v3107_v38  ;;  %v3127_v11 = vadd.f32 %v3126_v16, %v2970_v26 }
 0x512   : > { %v2855_v62 = vpop.permute.xlu1 %2854 }
 0x513   : > { %v3091_v18 = vrot.slane %v3090_v9, 1  ;;  %v3110_v35 = vrot.slane %v3109_v14, 2  ;;  %v3128_v5 = vadd.f32 %v3127_v11, %v2971_v49  ;;  %v2986_v51 = vmul.f32 %v4067_v31, %v2855_v62 }
 0x515   : > { %v3092_v42 = vadd.f32 %v3091_v18, %v3090_v9  ;;  %v3111_v36 = vadd.f32 %v3110_v35, %v3109_v14  ;;  %v3129_v7 = vrot.slane %v3128_v5, 4  ;;  %v3148_v23 = vadd.f32 %v3147_v6, %v2986_v51 }
 0x516   : > { %v2859_v25 = vpop.permute.xlu1 %2858 }
 0x517   : > { %v3112_v37 = vrot.slane %v3111_v36, 1  ;;  %v3130_v63 = vadd.f32 %v3129_v7, %v3128_v5  ;;  %v2987_v28 = vmul.f32 %v4068_v32, %v2859_v25  ;;  %v3167_v34 = vsel %vm2220_vm3, %v3092_v42, %v5591_v20 }
 0x519   : > { %v3113_v30 = vadd.f32 %v3112_v37, %v3111_v36  ;;  %v3131_v1 = vrot.slane %v3130_v63, 2  ;;  %v3149_v40 = vadd.f32 %v3148_v23, %v2987_v28 }
 0x51b   : > { %v3132_v12 = vadd.f32 %v3131_v1, %v3130_v63  ;;  %v3150_v53 = vrot.slane %v3149_v40, 4  ;;  %v3168_v21 = vsel %vm2223_vm4, %v3113_v30, %v3167_v34 }
 0x51d   : > { %v3133_v13 = vrot.slane %v3132_v12, 1  ;;  %v3151_v50 = vadd.f32 %v3150_v53, %v3149_v40 }
 0x51f   : > { %v3134_v17 = vadd.f32 %v3133_v13, %v3132_v12  ;;  %v3152_v43 = vrot.slane %v3151_v50, 2 }
 0x521   : > { %v3153_v3 = vadd.f32 %v3152_v43, %v3151_v50  ;;  %v3169_v39 = vsel %vm2226_vm5, %v3134_v17, %v3168_v21 }
 0x523   : > { %v3154_v15 = vrot.slane %v3153_v3, 1 }
 0x525   : > { %v3155_v20 = vadd.f32 %v3154_v15, %v3153_v3 }
 0x527   : > { %v3170_v56 = vsel %vm2229_vm6, %v3155_v20, %v3169_v39 }
 0x528   : > { %3172 = vst [vmem:[%s4331_s13] sm:$0xff] %v3170_v56 }
 0x529   : > { %4144 = shalt.err (!%p4141_p12)
}
 0x52a   : > { %s4145_s10 = scalar_lea.hbm %s5687_s26, 128  ;;  %s4149_s20 = scalar_lea.hbm %s5735_s3, 256 }
 0x52b   : > { %p4146_p13 = scmp.ne.s32.totalorder %s5687_s26, %s4145_s10  ;;  %p4150_p1 = scmp.lt.u32.totalorder %s5687_s26, %s5735_s3 }
 0x52c   : > { %p4151_p2 = scmp.lt.u32.totalorder %s4149_s20, %s4145_s10  ;;  %p4153_p4 = scmp.lt.u32.totalorder %s4145_s10, %s5687_s26 }
 0x52d   : > { %p4147_p0 = pnand %p4146_p13, %p4316_p8 }
 0x52e   : > { %p4152_p3 = por %p4151_p2, %p4150_p1 }
 0x52f   : > { %p4148_p9 = pneg %p4147_p0 }
 0x530   : > { %p4154_p5 = por %p4153_p4, %p4152_p3 }
 0x532   : > { %p4155_p6 = pnand %p4154_p5, %p4148_p9 }
 0x534   : > { %4158 = shalt.err (!%p4155_p6)
}
 0x535   : > { %3587 = dma.vmem_to_hbm [thread:$0]  (%p4316_p8), %s5689_s19, 128, %s5687_s26, %s3198_s30  }
 0x536 PF: > { %s5859_s23 = sld [smem:[#allocation21_spill]]  ;;  %s5860_s24 = sld [smem:[#allocation18_spill]] }
 0x537   : > { %s5861_s29 = sld [smem:[#allocation24_spill]] }
 0x53c   : > { %p3598_p7 = scmp.ge.s32.totalorder %s5859_s23, 2  ;;  %s3241_s5 = sand.u32 1, %s5860_s24  }
 0x53d   : > { %p5862_p10 = scmp.ne.s32.totalorder %s5861_s29, 0  ;;  %s3242_s6 = scalar_lea.sflag [#allocation7], %s3241_s5 }
 0x53f   : > { %p3592_p11 = pnand %p3598_p7, %p5862_p10 }
 0x541   : > { %4196 = dma.done.wait (!%p3592_p11), %s3242_s6, 128  }
 0x542   : > { %4198 = vsyncadd (!%p3592_p11), %s3242_s6, 4294967168  ;;  %s3251_s14 = scalar_lea.sflag [#allocation9], %s3241_s5 }
 0x543   : > { %4200 = dma.done.wait (!%p3592_p11), %s3251_s14, 128  }
 0x544   : > { %4202 = vsyncadd (!%p3592_p11), %s3251_s14, 4294967168  ;;  %s5863_s28 = sld [smem:[#allocation22_spill]]  ;;  %s5864_s25 = sld [smem:[#allocation19_spill]] }
 0x545   : > { %s5865_s26 = sld [smem:[#allocation20_spill]]  ;;  %s5866_s27 = sld [smem:[#allocation23_spill]] }
 0x54a   : > { %p22_p8 = scmp.ge.s32.totalorder %s5863_s28, 4  }
 0x54c   :  { %24 = sbr.rel (!%p22_p8) target bundleno = 17 (0x11), region = 151 }
 0x553   :  { %3256 = vsyncpa [#allocation7], 1 }
 0x554   :  { %3258 = vsyncpa [#allocation7 + $0x1], 1 }
 0x555   :  { %3259 = vsyncpa [#allocation9], 1 }
 0x556   :  { %3261 = vsyncpa [#allocation9 + $0x1], 1 }
 0x557   :  { %3262 = vsyncmov [#allocation3] }
 0x55a   :  { %s3263_s8 = vpop.sfrf %3262 }
 0x55b   :  { %p3354_p12 = scmp.ne.s32.totalorder %s3263_s8, 0 }
 0x55d   :  { %3267 = shalt.err (%p3354_p12)  }

</bundles_post_ra>
